<compile_context>
chip_gen: v5e
topology: v5e:2x2
jax: 0.10.0
libtpu: 0.0.40
codegen_flags: <defaults>
</compile_context>

<pallas_src>
import functools

import jax
import jax.numpy as jnp
import numpy as np
from jax import lax
from jax.experimental import pallas as pl
from jax.experimental.pallas import tpu as pltpu


def _round_up(x, m):
    return (x + m - 1) // m * m


# ----------------------------------------------------------------------------
# Pallas kernel: one (direction, time-chunk) tile of the recurrence.
# h/c scratch persists across time chunks; init at chunk 0.
# ----------------------------------------------------------------------------
def _lstm_chunk_kernel(g_ref, m_ref, whh_ref, out_ref, h_scr, c_scr, *, unroll):
    # g_ref:   (TT, Bp, 4*Hp) pre-gates = x @ W_ih + b, already time-oriented
    # m_ref:   (TT, Bp, 1)    float validity mask (same time orientation)
    # whh_ref: (Hp, 4*Hp)     recurrent weights
    # out_ref: (TT, Bp, Hp)   per-step hidden states
    TT = g_ref.shape[0]
    Hp = h_scr.shape[-1]

    @pl.when(pl.program_id(1) == 0)
    def _():
        h_scr[...] = jnp.zeros_like(h_scr)
        c_scr[...] = jnp.zeros_like(c_scr)

    def step(t, carry):
        h = h_scr[...]                                     # (Bp, Hp)
        c = c_scr[...]
        gates = g_ref[t] + jnp.dot(h, whh_ref[...],
                                   preferred_element_type=jnp.float32)
        m = m_ref[t]                                       # (Bp, 1)

        # 128-lane-aligned gate slices (Hp is a multiple of 128).
        i = jax.nn.sigmoid(gates[:, 0:Hp])
        f = jax.nn.sigmoid(gates[:, Hp:2 * Hp])
        g = jnp.tanh(gates[:, 2 * Hp:3 * Hp])
        o = jax.nn.sigmoid(gates[:, 3 * Hp:4 * Hp])

        c_new = f * c + i * g
        h_new = o * jnp.tanh(c_new)

        # Masked (packed-sequence) update: padded steps leave state unchanged.
        h_upd = h + m * (h_new - h)
        c_upd = c + m * (c_new - c)
        h_scr[...] = h_upd
        c_scr[...] = c_upd
        out_ref[t] = h_upd                                  # lane-dense store
        return carry

    lax.fori_loop(0, TT, step, 0, unroll=unroll)


def _pad_gate_cols(w, H, Hp):
    """Zero-pad each of the 4 gate blocks of the last (4H) axis to width Hp."""
    if Hp == H:
        return w
    parts = jnp.split(w, 4, axis=-1)
    pad_width = [(0, 0)] * (w.ndim - 1) + [(0, Hp - H)]
    return jnp.concatenate([jnp.pad(p, pad_width) for p in parts], axis=-1)


def _run_bilstm_layer(x, mask, layer_params, H, time_chunk=None):
    """One bidirectional LSTM layer.

    x:    (T, Bp, D_in) float32, time-major, batch padded to multiple of 8
    mask: (T, Bp, 1)    float32 validity mask
    layer_params: ((w_ih_f, w_hh_f, b_f), (w_ih_b, w_hh_b, b_b)) with
        w_ih: (D_in, 4H), w_hh: (H, 4H), b: (1, 4H)
    returns (T, Bp, 2H)
    """
    T0, Bp, D = x.shape
    Hp = _round_up(H, 128)

    # ---- Time-chunk selection: biggest chunk whose double-buffered slabs fit ----
    bytes_per_step = Bp * (4 * Hp + Hp + 1) * 4            # g + out + mask (f32)
    budget = 6 << 20                                       # per-buffer VMEM budget
    auto_tt = max(1, min(T0, budget // max(bytes_per_step, 1)))
    TT = int(time_chunk) if time_chunk is not None else auto_tt
    TT = max(1, min(TT, T0))
    Tp = _round_up(T0, TT)
    if Tp != T0:                                           # pad time; mask=0 there
        x = jnp.pad(x, ((0, Tp - T0), (0, 0), (0, 0)))
        mask = jnp.pad(mask, ((0, Tp - T0), (0, 0), (0, 0)))
    n_chunks = Tp // TT

    # ---- Hoisted input projection: one big MXU matmul for both directions ----
    wih_p, b_p, whh_p = [], [], []
    for (w_ih, w_hh, b) in layer_params:
        wih_p.append(_pad_gate_cols(w_ih, H, Hp))                       # (D, 4Hp)
        b_p.append(_pad_gate_cols(b, H, Hp))                            # (1, 4Hp)
        whh_p.append(_pad_gate_cols(jnp.pad(w_hh, ((0, Hp - H), (0, 0))),
                                    H, Hp))                             # (Hp, 4Hp)
    wih_cat = jnp.concatenate(wih_p, axis=1)                            # (D, 8Hp)
    b_cat = jnp.concatenate(b_p, axis=1)                                # (1, 8Hp)
    g_cat = (jnp.dot(x.reshape(Tp * Bp, D), wih_cat,
                     preferred_element_type=jnp.float32) + b_cat)
    g_cat = g_cat.reshape(Tp, Bp, 8 * Hp)
    g_fwd = g_cat[:, :, :4 * Hp]
    g_bwd = g_cat[:, :, 4 * Hp:]

    # Direction 0: forward time order; direction 1: time-flipped backward.
    g_all = jnp.stack([g_fwd, g_bwd[::-1]], axis=0)                     # (2,Tp,Bp,4Hp)
    m_all = jnp.stack([mask, mask[::-1]], axis=0)                       # (2,Tp,Bp,1)
    w_all = jnp.stack(whh_p, axis=0)                                    # (2,Hp,4Hp)

    unroll = min(TT, 8)
    kernel = functools.partial(_lstm_chunk_kernel, unroll=unroll)

    # VMEM budget (f32): double-buffered blocks + weights + state scratch.
    blk = TT * Bp * (4 * Hp + 1 + Hp) + Hp * 4 * Hp
    need = 4 * (2 * blk + 2 * Bp * Hp)
    vmem_limit = int(min(max(need + (4 << 20), 32 << 20), 64 << 20))

    out = pl.pallas_call(
        kernel,
        out_shape=jax.ShapeDtypeStruct((2, Tp, Bp, Hp), jnp.float32),
        grid=(2, n_chunks),
        in_specs=[
            pl.BlockSpec((None, TT, Bp, 4 * Hp), lambda d, t: (d, t, 0, 0)),
            pl.BlockSpec((None, TT, Bp, 1), lambda d, t: (d, t, 0, 0)),
            pl.BlockSpec((None, Hp, 4 * Hp), lambda d, t: (d, 0, 0)),
        ],
        out_specs=pl.BlockSpec((None, TT, Bp, Hp), lambda d, t: (d, t, 0, 0)),
        scratch_shapes=[
            pltpu.VMEM((Bp, Hp), jnp.float32),   # h (carries across time chunks)
            pltpu.VMEM((Bp, Hp), jnp.float32),   # c
        ],
        compiler_params=pltpu.CompilerParams(
            dimension_semantics=("parallel", "arbitrary"),
            vmem_limit_bytes=vmem_limit),
    )(g_all, m_all, w_all)

    h_fwd = out[0, :T0, :, :H]                   # (T0, Bp, H)
    h_bwd = out[1, ::-1][:T0, :, :H]             # flip back to original time order
    return jnp.concatenate([h_fwd, h_bwd], axis=-1)   # (T0, Bp, 2H)


# ----------------------------------------------------------------------------
# BiLSTMEncoder forward
# ----------------------------------------------------------------------------
def bilstm_encoder(sent, sent_len, params, time_chunk=None):
    """sent: (B, T, D) batch-first; sent_len: (B,) int32.
    params: per-layer [(w_ih_f, w_hh_f, b_f), (w_ih_b, w_hh_b, b_b)],
    with w_ih: (D_in, 4H), w_hh: (H, 4H), b: (1, 4H).
    Returns (B, 2H): BiLSTM output at each example's last valid timestep."""
    B, T, _ = sent.shape
    H = params[0][0][1].shape[0]
    Bp = _round_up(B, 8)                                    # sublane-aligned batch

    x = jnp.transpose(sent, (1, 0, 2))                      # (T, B, D) time-major
    x = jnp.pad(x, ((0, 0), (0, Bp - B), (0, 0)))           # (T, Bp, D)

    len_p = jnp.pad(sent_len, (0, Bp - B), constant_values=1)
    mask = (jnp.arange(T)[:, None] < len_p[None, :]).astype(jnp.float32)
    mask = mask[:, :, None]                                 # (T, Bp, 1)

    for layer_params in params:
        x = _run_bilstm_layer(x, mask, layer_params, H,
                              time_chunk=time_chunk)        # (T, Bp, 2H)

    # pad_packed + "embedding[:len][-1]"  ==  output at timestep len-1
    return x[sent_len - 1, jnp.arange(B), :]                # (B, 2H)


# ----------------------------------------------------------------------------
# Pure-JAX reference (lax.scan) for correctness checking
# ----------------------------------------------------------------------------
def _ref_lstm_direction(x, mask, w_ih, w_hh, b, *, reverse):
    T, B, D = x.shape
    H = w_hh.shape[0]

    def step(carry, inp):
        h, c = carry
        xt, mt = inp
        gates = xt @ w_ih + h @ w_hh + b
        i = jax.nn.sigmoid(gates[:, :H])
        f = jax.nn.sigmoid(gates[:, H:2 * H])
        g = jnp.tanh(gates[:, 2 * H:3 * H])
        o = jax.nn.sigmoid(gates[:, 3 * H:])
        c_new = f * c + i * g
        h_new = o * jnp.tanh(c_new)
        h = mt * h_new + (1.0 - mt) * h
        c = mt * c_new + (1.0 - mt) * c
        return (h, c), h

    xs = (x[::-1], mask[::-1]) if reverse else (x, mask)
    h0 = jnp.zeros((B, H), jnp.float32)
    (_, _), ys = lax.scan(step, (h0, h0), xs)
    return ys[::-1] if reverse else ys


def _ref_bilstm_encoder(sent, sent_len, params):
    B, T, _ = sent.shape
    x = jnp.transpose(sent, (1, 0, 2))
    mask = (jnp.arange(T)[:, None] < sent_len[None, :]).astype(jnp.float32)[:, :, None]
    for layer in params:
        outs = []
        for d, reverse in enumerate((False, True)):
            w_ih, w_hh, b = layer[d]
            outs.append(_ref_lstm_direction(x, mask, w_ih, w_hh, b, reverse=reverse))
        x = jnp.concatenate(outs, axis=-1)
    return x[sent_len - 1, jnp.arange(B), :]


# ----------------------------------------------------------------------------
# Deterministic synthetic parameter init (nn.LSTM shapes: weight_ih (4H, D_in),
# weight_hh (4H, H), bias_ih/bias_hh (4H,); stored pre-transposed, biases summed).
# ----------------------------------------------------------------------------
def init_params(key, word_embed_dim, enc_n_layers, enc_h_dim):
    H = enc_h_dim
    k = 1.0 / np.sqrt(H)
    params = []
    for layer in range(enc_n_layers):
        d_in = word_embed_dim if layer == 0 else 2 * H
        layer_params = []
        for _direction in range(2):
            key, k1, k2, k3, k4 = jax.random.split(key, 5)
            w_ih = jax.random.uniform(k1, (4 * H, d_in), jnp.float32, -k, k)
            w_hh = jax.random.uniform(k2, (4 * H, H), jnp.float32, -k, k)
            b_ih = jax.random.uniform(k3, (4 * H,), jnp.float32, -k, k)
            b_hh = jax.random.uniform(k4, (4 * H,), jnp.float32, -k, k)
            layer_params.append(
                (w_ih.T, w_hh.T, (b_ih + b_hh).reshape(1, 4 * H)))
        params.append(layer_params)
    return params


if __name__ == "__main__":
    # ---- Case 1: module hyperparameters from the spec ----
    word_embed_dim = 16
    enc_n_layers = 1
    enc_h_dim = 32
    B, T = 4, 8

    root = jax.random.PRNGKey(0)
    k_params, k_sent = jax.random.split(root)

    params = init_params(k_params, word_embed_dim, enc_n_layers, enc_h_dim)
    sent = jax.random.normal(k_sent, (B, T, word_embed_dim), jnp.float32)
    sent_len = jnp.array([8, 5, 8, 3], dtype=jnp.int32)

    out = jax.block_until_ready(bilstm_encoder(sent, sent_len, params))
    assert out.shape == (B, 2 * enc_h_dim), out.shape
    ref = jax.block_until_ready(_ref_bilstm_encoder(sent, sent_len, params))
    np.testing.assert_allclose(np.asarray(out), np.asarray(ref),
                               rtol=2e-2, atol=2e-2)

    # ---- Case 2: multi-layer, odd batch (exercises padding + stacking) ----
    k2p, k2s = jax.random.split(jax.random.PRNGKey(1))
    params2 = init_params(k2p, word_embed_dim, 2, enc_h_dim)
    B2, T2 = 5, 8
    sent2 = jax.random.normal(k2s, (B2, T2, word_embed_dim), jnp.float32)
    sent_len2 = jnp.array([8, 1, 6, 3, 7], dtype=jnp.int32)

    out2 = jax.block_until_ready(bilstm_encoder(sent2, sent_len2, params2))
    assert out2.shape == (B2, 2 * enc_h_dim), out2.shape
    ref2 = jax.block_until_ready(_ref_bilstm_encoder(sent2, sent_len2, params2))
    np.testing.assert_allclose(np.asarray(out2), np.asarray(ref2),
                               rtol=2e-2, atol=2e-2)

    # ---- Case 3: longer, non-multiple sequence with forced time-chunking
    #      (exercises cross-chunk state carry + time padding in the pipeline) ----
    k3p, k3s = jax.random.split(jax.random.PRNGKey(2))
    params3 = init_params(k3p, word_embed_dim, 1, enc_h_dim)
    B3, T3 = 3, 21
    sent3 = jax.random.normal(k3s, (B3, T3, word_embed_dim), jnp.float32)
    sent_len3 = jnp.array([21, 13, 5], dtype=jnp.int32)

    out3 = jax.block_until_ready(
        bilstm_encoder(sent3, sent_len3, params3, time_chunk=8))
    assert out3.shape == (B3, 2 * enc_h_dim), out3.shape
    ref3 = jax.block_until_ready(_ref_bilstm_encoder(sent3, sent_len3, params3))
    np.testing.assert_allclose(np.asarray(out3), np.asarray(ref3),
                               rtol=2e-2, atol=2e-2)

    print("KERNEL_OK")
</pallas_src>

<mosaic_0001>
module attributes {stable_mosaic.version = 11 : i64} {
  func.func @_lstm_chunk_kernel(%arg0: i32, %arg1: i32, %arg2: memref<1x8x8x512xf32, #tpu.memory_space<vmem>>, %arg3: memref<1x8x8x1xf32, #tpu.memory_space<vmem>>, %arg4: memref<1x128x512xf32, #tpu.memory_space<vmem>>, %arg5: memref<1x8x8x128xf32, #tpu.memory_space<vmem>>, %arg6: memref<8x128xf32, #tpu.memory_space<vmem>>, %arg7: memref<8x128xf32, #tpu.memory_space<vmem>>) attributes {dimension_semantics = [#tpu.dimension_semantics<parallel>, #tpu.dimension_semantics<arbitrary>], iteration_bounds = array<i64: 2, 1>, scalar_prefetch = 0 : i64, scratch_operands = 2 : i64, tpu.core_type = #tpu.core_type<tc>, window_params = [{transform_indices = @transform_0, window_bounds = array<i64: 1, 8, 8, 512>}, {transform_indices = @transform_1, window_bounds = array<i64: 1, 8, 8, 1>}, {transform_indices = @transform_2, window_bounds = array<i64: 1, 128, 512>}, {transform_indices = @transform_3, window_bounds = array<i64: 1, 8, 8, 128>}]} {
    %c0_i32 = arith.constant 0 : i32
    %0 = arith.cmpi eq, %arg1, %c0_i32 : i32
    %1 = arith.extui %0 : i1 to i32
    %c0_i32_0 = arith.constant 0 : i32
    %2 = arith.cmpi ne, %1, %c0_i32_0 : i32
    scf.if %2 {
      %cst_192 = arith.constant 0.000000e+00 : f32
      %411 = vector.broadcast %cst_192 : f32 to vector<8x128xf32>
      %c0_193 = arith.constant 0 : index
      %c0_194 = arith.constant 0 : index
      %412 = vector.load %arg6[%c0_193, %c0_194] : memref<8x128xf32, #tpu.memory_space<vmem>>, vector<8x128xf32>
      tpu.vector_store %arg6[%c0_193, %c0_194], %411 {strides = array<i32>} : memref<8x128xf32, #tpu.memory_space<vmem>>, vector<8x128xf32>,
      %cst_195 = arith.constant 0.000000e+00 : f32
      %413 = vector.broadcast %cst_195 : f32 to vector<8x128xf32>
      %c0_196 = arith.constant 0 : index
      %c0_197 = arith.constant 0 : index
      %414 = vector.load %arg7[%c0_196, %c0_197] : memref<8x128xf32, #tpu.memory_space<vmem>>, vector<8x128xf32>
      tpu.vector_store %arg7[%c0_196, %c0_197], %413 {strides = array<i32>} : memref<8x128xf32, #tpu.memory_space<vmem>>, vector<8x128xf32>,
    } else {
    }
    %c0_i32_1 = arith.constant 0 : i32
    %c0 = arith.constant 0 : index
    %c0_2 = arith.constant 0 : index
    %3 = vector.load %arg6[%c0, %c0_2] : memref<8x128xf32, #tpu.memory_space<vmem>>, vector<8x128xf32>
    %c0_3 = arith.constant 0 : index
    %c0_4 = arith.constant 0 : index
    %4 = vector.load %arg7[%c0_3, %c0_4] : memref<8x128xf32, #tpu.memory_space<vmem>>, vector<8x128xf32>
    %c0_5 = arith.constant 0 : index
    %5 = arith.index_cast %c0_i32_1 : i32 to index
    %c0_6 = arith.constant 0 : index
    %c0_7 = arith.constant 0 : index
    %6 = vector.load %arg2[%c0_5, %5, %c0_6, %c0_7] : memref<1x8x8x512xf32, #tpu.memory_space<vmem>>, vector<1x1x8x512xf32>
    %7 = vector.shape_cast %6 : vector<1x1x8x512xf32> to vector<8x512xf32>
    %c0_8 = arith.constant 0 : index
    %c0_9 = arith.constant 0 : index
    %c0_10 = arith.constant 0 : index
    %8 = vector.load %arg4[%c0_8, %c0_9, %c0_10] : memref<1x128x512xf32, #tpu.memory_space<vmem>>, vector<1x128x512xf32>
    %9 = vector.shape_cast %8 : vector<1x128x512xf32> to vector<128x512xf32>
    %cst = arith.constant dense<0.000000e+00> : vector<8x512xf32>
    %10 = tpu.matmul %3, %9, %cst {dimension_numbers = #tpu.dot_dimension_numbers<[1], [0], [0], [1], [0, 0, 1, 1], [], []>} : vector<8x128xf32>, vector<128x512xf32>, vector<8x512xf32> -> vector<8x512xf32>
    %11 = arith.addf %7, %10 : vector<8x512xf32>
    %c0_11 = arith.constant 0 : index
    %12 = arith.index_cast %c0_i32_1 : i32 to index
    %c0_12 = arith.constant 0 : index
    %c0_13 = arith.constant 0 : index
    %13 = vector.load %arg3[%c0_11, %12, %c0_12, %c0_13] : memref<1x8x8x1xf32, #tpu.memory_space<vmem>>, vector<1x1x8x1xf32>
    %14 = vector.shape_cast %13 : vector<1x1x8x1xf32> to vector<8x1xf32>
    %15 = vector.extract_strided_slice %11 {offsets = [0, 0], sizes = [8, 128], strides = [1, 1]} : vector<8x512xf32> to vector<8x128xf32>
    %16 = arith.negf %15 : vector<8x128xf32>
    %17 = math.exp %16 : vector<8x128xf32>
    %cst_14 = arith.constant 1.000000e+00 : f32
    %18 = vector.broadcast %cst_14 : f32 to vector<8x128xf32>
    %19 = arith.addf %18, %17 : vector<8x128xf32>
    %20 = arith.divf %18, %19 : vector<8x128xf32>
    %21 = vector.extract_strided_slice %11 {offsets = [0, 128], sizes = [8, 128], strides = [1, 1]} : vector<8x512xf32> to vector<8x128xf32>
    %22 = arith.negf %21 : vector<8x128xf32>
    %23 = math.exp %22 : vector<8x128xf32>
    %cst_15 = arith.constant 1.000000e+00 : f32
    %24 = vector.broadcast %cst_15 : f32 to vector<8x128xf32>
    %25 = arith.addf %24, %23 : vector<8x128xf32>
    %26 = arith.divf %24, %25 : vector<8x128xf32>
    %27 = vector.extract_strided_slice %11 {offsets = [0, 256], sizes = [8, 128], strides = [1, 1]} : vector<8x512xf32> to vector<8x128xf32>
    %28 = math.tanh %27 : vector<8x128xf32>
    %29 = vector.extract_strided_slice %11 {offsets = [0, 384], sizes = [8, 128], strides = [1, 1]} : vector<8x512xf32> to vector<8x128xf32>
    %30 = arith.negf %29 : vector<8x128xf32>
    %31 = math.exp %30 : vector<8x128xf32>
    %cst_16 = arith.constant 1.000000e+00 : f32
    %32 = vector.broadcast %cst_16 : f32 to vector<8x128xf32>
    %33 = arith.addf %32, %31 : vector<8x128xf32>
    %34 = arith.divf %32, %33 : vector<8x128xf32>
    %35 = arith.mulf %26, %4 : vector<8x128xf32>
    %36 = arith.mulf %20, %28 : vector<8x128xf32>
    %37 = arith.addf %35, %36 : vector<8x128xf32>
    %38 = math.tanh %37 : vector<8x128xf32>
    %39 = arith.mulf %34, %38 : vector<8x128xf32>
    %40 = arith.subf %39, %3 : vector<8x128xf32>
    %41 = vector.broadcast %14 : vector<8x1xf32> to vector<8x128xf32>
    %42 = arith.mulf %41, %40 : vector<8x128xf32>
    %43 = arith.addf %3, %42 : vector<8x128xf32>
    %44 = arith.subf %37, %4 : vector<8x128xf32>
    %45 = vector.broadcast %14 : vector<8x1xf32> to vector<8x128xf32>
    %46 = arith.mulf %45, %44 : vector<8x128xf32>
    %47 = arith.addf %4, %46 : vector<8x128xf32>
    %c0_17 = arith.constant 0 : index
    %c0_18 = arith.constant 0 : index
    %48 = vector.load %arg6[%c0_17, %c0_18] : memref<8x128xf32, #tpu.memory_space<vmem>>, vector<8x128xf32>
    tpu.vector_store %arg6[%c0_17, %c0_18], %43 {strides = array<i32>} : memref<8x128xf32, #tpu.memory_space<vmem>>, vector<8x128xf32>,
    %c0_19 = arith.constant 0 : index
    %c0_20 = arith.constant 0 : index
    %49 = vector.load %arg7[%c0_19, %c0_20] : memref<8x128xf32, #tpu.memory_space<vmem>>, vector<8x128xf32>
    tpu.vector_store %arg7[%c0_19, %c0_20], %47 {strides = array<i32>} : memref<8x128xf32, #tpu.memory_space<vmem>>, vector<8x128xf32>,
    %c0_21 = arith.constant 0 : index
    %50 = arith.index_cast %c0_i32_1 : i32 to index
    %c0_22 = arith.constant 0 : index
    %c0_23 = arith.constant 0 : index
    %51 = vector.load %arg5[%c0_21, %50, %c0_22, %c0_23] : memref<1x8x8x128xf32, #tpu.memory_space<vmem>>, vector<1x1x8x128xf32>
    %52 = vector.shape_cast %51 : vector<1x1x8x128xf32> to vector<8x128xf32>
    %53 = vector.shape_cast %43 : vector<8x128xf32> to vector<1x1x8x128xf32>
    tpu.vector_store %arg5[%c0_21, %50, %c0_22, %c0_23], %53 {strides = array<i32>} : memref<1x8x8x128xf32, #tpu.memory_space<vmem>>, vector<1x1x8x128xf32>,
    %c1_i32 = arith.constant 1 : i32
    %c0_24 = arith.constant 0 : index
    %c0_25 = arith.constant 0 : index
    %54 = vector.load %arg6[%c0_24, %c0_25] : memref<8x128xf32, #tpu.memory_space<vmem>>, vector<8x128xf32>
    %c0_26 = arith.constant 0 : index
    %c0_27 = arith.constant 0 : index
    %55 = vector.load %arg7[%c0_26, %c0_27] : memref<8x128xf32, #tpu.memory_space<vmem>>, vector<8x128xf32>
    %c0_28 = arith.constant 0 : index
    %56 = arith.index_cast %c1_i32 : i32 to index
    %c0_29 = arith.constant 0 : index
    %c0_30 = arith.constant 0 : index
    %57 = vector.load %arg2[%c0_28, %56, %c0_29, %c0_30] : memref<1x8x8x512xf32, #tpu.memory_space<vmem>>, vector<1x1x8x512xf32>
    %58 = vector.shape_cast %57 : vector<1x1x8x512xf32> to vector<8x512xf32>
    %c0_31 = arith.constant 0 : index
    %c0_32 = arith.constant 0 : index
    %c0_33 = arith.constant 0 : index
    %59 = vector.load %arg4[%c0_31, %c0_32, %c0_33] : memref<1x128x512xf32, #tpu.memory_space<vmem>>, vector<1x128x512xf32>
    %60 = vector.shape_cast %59 : vector<1x128x512xf32> to vector<128x512xf32>
    %cst_34 = arith.constant dense<0.000000e+00> : vector<8x512xf32>
    %61 = tpu.matmul %54, %60, %cst_34 {dimension_numbers = #tpu.dot_dimension_numbers<[1], [0], [0], [1], [0, 0, 1, 1], [], []>} : vector<8x128xf32>, vector<128x512xf32>, vector<8x512xf32> -> vector<8x512xf32>
    %62 = arith.addf %58, %61 : vector<8x512xf32>
    %c0_35 = arith.constant 0 : index
    %63 = arith.index_cast %c1_i32 : i32 to index
    %c0_36 = arith.constant 0 : index
    %c0_37 = arith.constant 0 : index
    %64 = vector.load %arg3[%c0_35, %63, %c0_36, %c0_37] : memref<1x8x8x1xf32, #tpu.memory_space<vmem>>, vector<1x1x8x1xf32>
    %65 = vector.shape_cast %64 : vector<1x1x8x1xf32> to vector<8x1xf32>
    %66 = vector.extract_strided_slice %62 {offsets = [0, 0], sizes = [8, 128], strides = [1, 1]} : vector<8x512xf32> to vector<8x128xf32>
    %67 = arith.negf %66 : vector<8x128xf32>
    %68 = math.exp %67 : vector<8x128xf32>
    %cst_38 = arith.constant 1.000000e+00 : f32
    %69 = vector.broadcast %cst_38 : f32 to vector<8x128xf32>
    %70 = arith.addf %69, %68 : vector<8x128xf32>
    %71 = arith.divf %69, %70 : vector<8x128xf32>
    %72 = vector.extract_strided_slice %62 {offsets = [0, 128], sizes = [8, 128], strides = [1, 1]} : vector<8x512xf32> to vector<8x128xf32>
    %73 = arith.negf %72 : vector<8x128xf32>
    %74 = math.exp %73 : vector<8x128xf32>
    %cst_39 = arith.constant 1.000000e+00 : f32
    %75 = vector.broadcast %cst_39 : f32 to vector<8x128xf32>
    %76 = arith.addf %75, %74 : vector<8x128xf32>
    %77 = arith.divf %75, %76 : vector<8x128xf32>
    %78 = vector.extract_strided_slice %62 {offsets = [0, 256], sizes = [8, 128], strides = [1, 1]} : vector<8x512xf32> to vector<8x128xf32>
    %79 = math.tanh %78 : vector<8x128xf32>
    %80 = vector.extract_strided_slice %62 {offsets = [0, 384], sizes = [8, 128], strides = [1, 1]} : vector<8x512xf32> to vector<8x128xf32>
    %81 = arith.negf %80 : vector<8x128xf32>
    %82 = math.exp %81 : vector<8x128xf32>
    %cst_40 = arith.constant 1.000000e+00 : f32
    %83 = vector.broadcast %cst_40 : f32 to vector<8x128xf32>
    %84 = arith.addf %83, %82 : vector<8x128xf32>
    %85 = arith.divf %83, %84 : vector<8x128xf32>
    %86 = arith.mulf %77, %55 : vector<8x128xf32>
    %87 = arith.mulf %71, %79 : vector<8x128xf32>
    %88 = arith.addf %86, %87 : vector<8x128xf32>
    %89 = math.tanh %88 : vector<8x128xf32>
    %90 = arith.mulf %85, %89 : vector<8x128xf32>
    %91 = arith.subf %90, %54 : vector<8x128xf32>
    %92 = vector.broadcast %65 : vector<8x1xf32> to vector<8x128xf32>
    %93 = arith.mulf %92, %91 : vector<8x128xf32>
    %94 = arith.addf %54, %93 : vector<8x128xf32>
    %95 = arith.subf %88, %55 : vector<8x128xf32>
    %96 = vector.broadcast %65 : vector<8x1xf32> to vector<8x128xf32>
    %97 = arith.mulf %96, %95 : vector<8x128xf32>
    %98 = arith.addf %55, %97 : vector<8x128xf32>
    %c0_41 = arith.constant 0 : index
    %c0_42 = arith.constant 0 : index
    %99 = vector.load %arg6[%c0_41, %c0_42] : memref<8x128xf32, #tpu.memory_space<vmem>>, vector<8x128xf32>
    tpu.vector_store %arg6[%c0_41, %c0_42], %94 {strides = array<i32>} : memref<8x128xf32, #tpu.memory_space<vmem>>, vector<8x128xf32>,
    %c0_43 = arith.constant 0 : index
    %c0_44 = arith.constant 0 : index
    %100 = vector.load %arg7[%c0_43, %c0_44] : memref<8x128xf32, #tpu.memory_space<vmem>>, vector<8x128xf32>
    tpu.vector_store %arg7[%c0_43, %c0_44], %98 {strides = array<i32>} : memref<8x128xf32, #tpu.memory_space<vmem>>, vector<8x128xf32>,
    %c0_45 = arith.constant 0 : index
    %101 = arith.index_cast %c1_i32 : i32 to index
    %c0_46 = arith.constant 0 : index
    %c0_47 = arith.constant 0 : index
    %102 = vector.load %arg5[%c0_45, %101, %c0_46, %c0_47] : memref<1x8x8x128xf32, #tpu.memory_space<vmem>>, vector<1x1x8x128xf32>
    %103 = vector.shape_cast %102 : vector<1x1x8x128xf32> to vector<8x128xf32>
    %104 = vector.shape_cast %94 : vector<8x128xf32> to vector<1x1x8x128xf32>
    tpu.vector_store %arg5[%c0_45, %101, %c0_46, %c0_47], %104 {strides = array<i32>} : memref<1x8x8x128xf32, #tpu.memory_space<vmem>>, vector<1x1x8x128xf32>,
    %c2_i32 = arith.constant 2 : i32
    %c0_48 = arith.constant 0 : index
    %c0_49 = arith.constant 0 : index
    %105 = vector.load %arg6[%c0_48, %c0_49] : memref<8x128xf32, #tpu.memory_space<vmem>>, vector<8x128xf32>
    %c0_50 = arith.constant 0 : index
    %c0_51 = arith.constant 0 : index
    %106 = vector.load %arg7[%c0_50, %c0_51] : memref<8x128xf32, #tpu.memory_space<vmem>>, vector<8x128xf32>
    %c0_52 = arith.constant 0 : index
    %107 = arith.index_cast %c2_i32 : i32 to index
    %c0_53 = arith.constant 0 : index
    %c0_54 = arith.constant 0 : index
    %108 = vector.load %arg2[%c0_52, %107, %c0_53, %c0_54] : memref<1x8x8x512xf32, #tpu.memory_space<vmem>>, vector<1x1x8x512xf32>
    %109 = vector.shape_cast %108 : vector<1x1x8x512xf32> to vector<8x512xf32>
    %c0_55 = arith.constant 0 : index
    %c0_56 = arith.constant 0 : index
    %c0_57 = arith.constant 0 : index
    %110 = vector.load %arg4[%c0_55, %c0_56, %c0_57] : memref<1x128x512xf32, #tpu.memory_space<vmem>>, vector<1x128x512xf32>
    %111 = vector.shape_cast %110 : vector<1x128x512xf32> to vector<128x512xf32>
    %cst_58 = arith.constant dense<0.000000e+00> : vector<8x512xf32>
    %112 = tpu.matmul %105, %111, %cst_58 {dimension_numbers = #tpu.dot_dimension_numbers<[1], [0], [0], [1], [0, 0, 1, 1], [], []>} : vector<8x128xf32>, vector<128x512xf32>, vector<8x512xf32> -> vector<8x512xf32>
    %113 = arith.addf %109, %112 : vector<8x512xf32>
    %c0_59 = arith.constant 0 : index
    %114 = arith.index_cast %c2_i32 : i32 to index
    %c0_60 = arith.constant 0 : index
    %c0_61 = arith.constant 0 : index
    %115 = vector.load %arg3[%c0_59, %114, %c0_60, %c0_61] : memref<1x8x8x1xf32, #tpu.memory_space<vmem>>, vector<1x1x8x1xf32>
    %116 = vector.shape_cast %115 : vector<1x1x8x1xf32> to vector<8x1xf32>
    %117 = vector.extract_strided_slice %113 {offsets = [0, 0], sizes = [8, 128], strides = [1, 1]} : vector<8x512xf32> to vector<8x128xf32>
    %118 = arith.negf %117 : vector<8x128xf32>
    %119 = math.exp %118 : vector<8x128xf32>
    %cst_62 = arith.constant 1.000000e+00 : f32
    %120 = vector.broadcast %cst_62 : f32 to vector<8x128xf32>
    %121 = arith.addf %120, %119 : vector<8x128xf32>
    %122 = arith.divf %120, %121 : vector<8x128xf32>
    %123 = vector.extract_strided_slice %113 {offsets = [0, 128], sizes = [8, 128], strides = [1, 1]} : vector<8x512xf32> to vector<8x128xf32>
    %124 = arith.negf %123 : vector<8x128xf32>
    %125 = math.exp %124 : vector<8x128xf32>
    %cst_63 = arith.constant 1.000000e+00 : f32
    %126 = vector.broadcast %cst_63 : f32 to vector<8x128xf32>
    %127 = arith.addf %126, %125 : vector<8x128xf32>
    %128 = arith.divf %126, %127 : vector<8x128xf32>
    %129 = vector.extract_strided_slice %113 {offsets = [0, 256], sizes = [8, 128], strides = [1, 1]} : vector<8x512xf32> to vector<8x128xf32>
    %130 = math.tanh %129 : vector<8x128xf32>
    %131 = vector.extract_strided_slice %113 {offsets = [0, 384], sizes = [8, 128], strides = [1, 1]} : vector<8x512xf32> to vector<8x128xf32>
    %132 = arith.negf %131 : vector<8x128xf32>
    %133 = math.exp %132 : vector<8x128xf32>
    %cst_64 = arith.constant 1.000000e+00 : f32
    %134 = vector.broadcast %cst_64 : f32 to vector<8x128xf32>
    %135 = arith.addf %134, %133 : vector<8x128xf32>
    %136 = arith.divf %134, %135 : vector<8x128xf32>
    %137 = arith.mulf %128, %106 : vector<8x128xf32>
    %138 = arith.mulf %122, %130 : vector<8x128xf32>
    %139 = arith.addf %137, %138 : vector<8x128xf32>
    %140 = math.tanh %139 : vector<8x128xf32>
    %141 = arith.mulf %136, %140 : vector<8x128xf32>
    %142 = arith.subf %141, %105 : vector<8x128xf32>
    %143 = vector.broadcast %116 : vector<8x1xf32> to vector<8x128xf32>
    %144 = arith.mulf %143, %142 : vector<8x128xf32>
    %145 = arith.addf %105, %144 : vector<8x128xf32>
    %146 = arith.subf %139, %106 : vector<8x128xf32>
    %147 = vector.broadcast %116 : vector<8x1xf32> to vector<8x128xf32>
    %148 = arith.mulf %147, %146 : vector<8x128xf32>
    %149 = arith.addf %106, %148 : vector<8x128xf32>
    %c0_65 = arith.constant 0 : index
    %c0_66 = arith.constant 0 : index
    %150 = vector.load %arg6[%c0_65, %c0_66] : memref<8x128xf32, #tpu.memory_space<vmem>>, vector<8x128xf32>
    tpu.vector_store %arg6[%c0_65, %c0_66], %145 {strides = array<i32>} : memref<8x128xf32, #tpu.memory_space<vmem>>, vector<8x128xf32>,
    %c0_67 = arith.constant 0 : index
    %c0_68 = arith.constant 0 : index
    %151 = vector.load %arg7[%c0_67, %c0_68] : memref<8x128xf32, #tpu.memory_space<vmem>>, vector<8x128xf32>
    tpu.vector_store %arg7[%c0_67, %c0_68], %149 {strides = array<i32>} : memref<8x128xf32, #tpu.memory_space<vmem>>, vector<8x128xf32>,
    %c0_69 = arith.constant 0 : index
    %152 = arith.index_cast %c2_i32 : i32 to index
    %c0_70 = arith.constant 0 : index
    %c0_71 = arith.constant 0 : index
    %153 = vector.load %arg5[%c0_69, %152, %c0_70, %c0_71] : memref<1x8x8x128xf32, #tpu.memory_space<vmem>>, vector<1x1x8x128xf32>
    %154 = vector.shape_cast %153 : vector<1x1x8x128xf32> to vector<8x128xf32>
    %155 = vector.shape_cast %145 : vector<8x128xf32> to vector<1x1x8x128xf32>
    tpu.vector_store %arg5[%c0_69, %152, %c0_70, %c0_71], %155 {strides = array<i32>} : memref<1x8x8x128xf32, #tpu.memory_space<vmem>>, vector<1x1x8x128xf32>,
    %c3_i32 = arith.constant 3 : i32
    %c0_72 = arith.constant 0 : index
    %c0_73 = arith.constant 0 : index
    %156 = vector.load %arg6[%c0_72, %c0_73] : memref<8x128xf32, #tpu.memory_space<vmem>>, vector<8x128xf32>
    %c0_74 = arith.constant 0 : index
    %c0_75 = arith.constant 0 : index
    %157 = vector.load %arg7[%c0_74, %c0_75] : memref<8x128xf32, #tpu.memory_space<vmem>>, vector<8x128xf32>
    %c0_76 = arith.constant 0 : index
    %158 = arith.index_cast %c3_i32 : i32 to index
    %c0_77 = arith.constant 0 : index
    %c0_78 = arith.constant 0 : index
    %159 = vector.load %arg2[%c0_76, %158, %c0_77, %c0_78] : memref<1x8x8x512xf32, #tpu.memory_space<vmem>>, vector<1x1x8x512xf32>
    %160 = vector.shape_cast %159 : vector<1x1x8x512xf32> to vector<8x512xf32>
    %c0_79 = arith.constant 0 : index
    %c0_80 = arith.constant 0 : index
    %c0_81 = arith.constant 0 : index
    %161 = vector.load %arg4[%c0_79, %c0_80, %c0_81] : memref<1x128x512xf32, #tpu.memory_space<vmem>>, vector<1x128x512xf32>
    %162 = vector.shape_cast %161 : vector<1x128x512xf32> to vector<128x512xf32>
    %cst_82 = arith.constant dense<0.000000e+00> : vector<8x512xf32>
    %163 = tpu.matmul %156, %162, %cst_82 {dimension_numbers = #tpu.dot_dimension_numbers<[1], [0], [0], [1], [0, 0, 1, 1], [], []>} : vector<8x128xf32>, vector<128x512xf32>, vector<8x512xf32> -> vector<8x512xf32>
    %164 = arith.addf %160, %163 : vector<8x512xf32>
    %c0_83 = arith.constant 0 : index
    %165 = arith.index_cast %c3_i32 : i32 to index
    %c0_84 = arith.constant 0 : index
    %c0_85 = arith.constant 0 : index
    %166 = vector.load %arg3[%c0_83, %165, %c0_84, %c0_85] : memref<1x8x8x1xf32, #tpu.memory_space<vmem>>, vector<1x1x8x1xf32>
    %167 = vector.shape_cast %166 : vector<1x1x8x1xf32> to vector<8x1xf32>
    %168 = vector.extract_strided_slice %164 {offsets = [0, 0], sizes = [8, 128], strides = [1, 1]} : vector<8x512xf32> to vector<8x128xf32>
    %169 = arith.negf %168 : vector<8x128xf32>
    %170 = math.exp %169 : vector<8x128xf32>
    %cst_86 = arith.constant 1.000000e+00 : f32
    %171 = vector.broadcast %cst_86 : f32 to vector<8x128xf32>
    %172 = arith.addf %171, %170 : vector<8x128xf32>
    %173 = arith.divf %171, %172 : vector<8x128xf32>
    %174 = vector.extract_strided_slice %164 {offsets = [0, 128], sizes = [8, 128], strides = [1, 1]} : vector<8x512xf32> to vector<8x128xf32>
    %175 = arith.negf %174 : vector<8x128xf32>
    %176 = math.exp %175 : vector<8x128xf32>
    %cst_87 = arith.constant 1.000000e+00 : f32
    %177 = vector.broadcast %cst_87 : f32 to vector<8x128xf32>
    %178 = arith.addf %177, %176 : vector<8x128xf32>
    %179 = arith.divf %177, %178 : vector<8x128xf32>
    %180 = vector.extract_strided_slice %164 {offsets = [0, 256], sizes = [8, 128], strides = [1, 1]} : vector<8x512xf32> to vector<8x128xf32>
    %181 = math.tanh %180 : vector<8x128xf32>
    %182 = vector.extract_strided_slice %164 {offsets = [0, 384], sizes = [8, 128], strides = [1, 1]} : vector<8x512xf32> to vector<8x128xf32>
    %183 = arith.negf %182 : vector<8x128xf32>
    %184 = math.exp %183 : vector<8x128xf32>
    %cst_88 = arith.constant 1.000000e+00 : f32
    %185 = vector.broadcast %cst_88 : f32 to vector<8x128xf32>
    %186 = arith.addf %185, %184 : vector<8x128xf32>
    %187 = arith.divf %185, %186 : vector<8x128xf32>
    %188 = arith.mulf %179, %157 : vector<8x128xf32>
    %189 = arith.mulf %173, %181 : vector<8x128xf32>
    %190 = arith.addf %188, %189 : vector<8x128xf32>
    %191 = math.tanh %190 : vector<8x128xf32>
    %192 = arith.mulf %187, %191 : vector<8x128xf32>
    %193 = arith.subf %192, %156 : vector<8x128xf32>
    %194 = vector.broadcast %167 : vector<8x1xf32> to vector<8x128xf32>
    %195 = arith.mulf %194, %193 : vector<8x128xf32>
    %196 = arith.addf %156, %195 : vector<8x128xf32>
    %197 = arith.subf %190, %157 : vector<8x128xf32>
    %198 = vector.broadcast %167 : vector<8x1xf32> to vector<8x128xf32>
    %199 = arith.mulf %198, %197 : vector<8x128xf32>
    %200 = arith.addf %157, %199 : vector<8x128xf32>
    %c0_89 = arith.constant 0 : index
    %c0_90 = arith.constant 0 : index
    %201 = vector.load %arg6[%c0_89, %c0_90] : memref<8x128xf32, #tpu.memory_space<vmem>>, vector<8x128xf32>
    tpu.vector_store %arg6[%c0_89, %c0_90], %196 {strides = array<i32>} : memref<8x128xf32, #tpu.memory_space<vmem>>, vector<8x128xf32>,
    %c0_91 = arith.constant 0 : index
    %c0_92 = arith.constant 0 : index
    %202 = vector.load %arg7[%c0_91, %c0_92] : memref<8x128xf32, #tpu.memory_space<vmem>>, vector<8x128xf32>
    tpu.vector_store %arg7[%c0_91, %c0_92], %200 {strides = array<i32>} : memref<8x128xf32, #tpu.memory_space<vmem>>, vector<8x128xf32>,
    %c0_93 = arith.constant 0 : index
    %203 = arith.index_cast %c3_i32 : i32 to index
    %c0_94 = arith.constant 0 : index
    %c0_95 = arith.constant 0 : index
    %204 = vector.load %arg5[%c0_93, %203, %c0_94, %c0_95] : memref<1x8x8x128xf32, #tpu.memory_space<vmem>>, vector<1x1x8x128xf32>
    %205 = vector.shape_cast %204 : vector<1x1x8x128xf32> to vector<8x128xf32>
    %206 = vector.shape_cast %196 : vector<8x128xf32> to vector<1x1x8x128xf32>
    tpu.vector_store %arg5[%c0_93, %203, %c0_94, %c0_95], %206 {strides = array<i32>} : memref<1x8x8x128xf32, #tpu.memory_space<vmem>>, vector<1x1x8x128xf32>,
    %c4_i32 = arith.constant 4 : i32
    %c0_96 = arith.constant 0 : index
    %c0_97 = arith.constant 0 : index
    %207 = vector.load %arg6[%c0_96, %c0_97] : memref<8x128xf32, #tpu.memory_space<vmem>>, vector<8x128xf32>
    %c0_98 = arith.constant 0 : index
    %c0_99 = arith.constant 0 : index
    %208 = vector.load %arg7[%c0_98, %c0_99] : memref<8x128xf32, #tpu.memory_space<vmem>>, vector<8x128xf32>
    %c0_100 = arith.constant 0 : index
    %209 = arith.index_cast %c4_i32 : i32 to index
    %c0_101 = arith.constant 0 : index
    %c0_102 = arith.constant 0 : index
    %210 = vector.load %arg2[%c0_100, %209, %c0_101, %c0_102] : memref<1x8x8x512xf32, #tpu.memory_space<vmem>>, vector<1x1x8x512xf32>
    %211 = vector.shape_cast %210 : vector<1x1x8x512xf32> to vector<8x512xf32>
    %c0_103 = arith.constant 0 : index
    %c0_104 = arith.constant 0 : index
    %c0_105 = arith.constant 0 : index
    %212 = vector.load %arg4[%c0_103, %c0_104, %c0_105] : memref<1x128x512xf32, #tpu.memory_space<vmem>>, vector<1x128x512xf32>
    %213 = vector.shape_cast %212 : vector<1x128x512xf32> to vector<128x512xf32>
    %cst_106 = arith.constant dense<0.000000e+00> : vector<8x512xf32>
    %214 = tpu.matmul %207, %213, %cst_106 {dimension_numbers = #tpu.dot_dimension_numbers<[1], [0], [0], [1], [0, 0, 1, 1], [], []>} : vector<8x128xf32>, vector<128x512xf32>, vector<8x512xf32> -> vector<8x512xf32>
    %215 = arith.addf %211, %214 : vector<8x512xf32>
    %c0_107 = arith.constant 0 : index
    %216 = arith.index_cast %c4_i32 : i32 to index
    %c0_108 = arith.constant 0 : index
    %c0_109 = arith.constant 0 : index
    %217 = vector.load %arg3[%c0_107, %216, %c0_108, %c0_109] : memref<1x8x8x1xf32, #tpu.memory_space<vmem>>, vector<1x1x8x1xf32>
    %218 = vector.shape_cast %217 : vector<1x1x8x1xf32> to vector<8x1xf32>
    %219 = vector.extract_strided_slice %215 {offsets = [0, 0], sizes = [8, 128], strides = [1, 1]} : vector<8x512xf32> to vector<8x128xf32>
    %220 = arith.negf %219 : vector<8x128xf32>
    %221 = math.exp %220 : vector<8x128xf32>
    %cst_110 = arith.constant 1.000000e+00 : f32
    %222 = vector.broadcast %cst_110 : f32 to vector<8x128xf32>
    %223 = arith.addf %222, %221 : vector<8x128xf32>
    %224 = arith.divf %222, %223 : vector<8x128xf32>
    %225 = vector.extract_strided_slice %215 {offsets = [0, 128], sizes = [8, 128], strides = [1, 1]} : vector<8x512xf32> to vector<8x128xf32>
    %226 = arith.negf %225 : vector<8x128xf32>
    %227 = math.exp %226 : vector<8x128xf32>
    %cst_111 = arith.constant 1.000000e+00 : f32
    %228 = vector.broadcast %cst_111 : f32 to vector<8x128xf32>
    %229 = arith.addf %228, %227 : vector<8x128xf32>
    %230 = arith.divf %228, %229 : vector<8x128xf32>
    %231 = vector.extract_strided_slice %215 {offsets = [0, 256], sizes = [8, 128], strides = [1, 1]} : vector<8x512xf32> to vector<8x128xf32>
    %232 = math.tanh %231 : vector<8x128xf32>
    %233 = vector.extract_strided_slice %215 {offsets = [0, 384], sizes = [8, 128], strides = [1, 1]} : vector<8x512xf32> to vector<8x128xf32>
    %234 = arith.negf %233 : vector<8x128xf32>
    %235 = math.exp %234 : vector<8x128xf32>
    %cst_112 = arith.constant 1.000000e+00 : f32
    %236 = vector.broadcast %cst_112 : f32 to vector<8x128xf32>
    %237 = arith.addf %236, %235 : vector<8x128xf32>
    %238 = arith.divf %236, %237 : vector<8x128xf32>
    %239 = arith.mulf %230, %208 : vector<8x128xf32>
    %240 = arith.mulf %224, %232 : vector<8x128xf32>
    %241 = arith.addf %239, %240 : vector<8x128xf32>
    %242 = math.tanh %241 : vector<8x128xf32>
    %243 = arith.mulf %238, %242 : vector<8x128xf32>
    %244 = arith.subf %243, %207 : vector<8x128xf32>
    %245 = vector.broadcast %218 : vector<8x1xf32> to vector<8x128xf32>
    %246 = arith.mulf %245, %244 : vector<8x128xf32>
    %247 = arith.addf %207, %246 : vector<8x128xf32>
    %248 = arith.subf %241, %208 : vector<8x128xf32>
    %249 = vector.broadcast %218 : vector<8x1xf32> to vector<8x128xf32>
    %250 = arith.mulf %249, %248 : vector<8x128xf32>
    %251 = arith.addf %208, %250 : vector<8x128xf32>
    %c0_113 = arith.constant 0 : index
    %c0_114 = arith.constant 0 : index
    %252 = vector.load %arg6[%c0_113, %c0_114] : memref<8x128xf32, #tpu.memory_space<vmem>>, vector<8x128xf32>
    tpu.vector_store %arg6[%c0_113, %c0_114], %247 {strides = array<i32>} : memref<8x128xf32, #tpu.memory_space<vmem>>, vector<8x128xf32>,
    %c0_115 = arith.constant 0 : index
    %c0_116 = arith.constant 0 : index
    %253 = vector.load %arg7[%c0_115, %c0_116] : memref<8x128xf32, #tpu.memory_space<vmem>>, vector<8x128xf32>
    tpu.vector_store %arg7[%c0_115, %c0_116], %251 {strides = array<i32>} : memref<8x128xf32, #tpu.memory_space<vmem>>, vector<8x128xf32>,
    %c0_117 = arith.constant 0 : index
    %254 = arith.index_cast %c4_i32 : i32 to index
    %c0_118 = arith.constant 0 : index
    %c0_119 = arith.constant 0 : index
    %255 = vector.load %arg5[%c0_117, %254, %c0_118, %c0_119] : memref<1x8x8x128xf32, #tpu.memory_space<vmem>>, vector<1x1x8x128xf32>
    %256 = vector.shape_cast %255 : vector<1x1x8x128xf32> to vector<8x128xf32>
    %257 = vector.shape_cast %247 : vector<8x128xf32> to vector<1x1x8x128xf32>
    tpu.vector_store %arg5[%c0_117, %254, %c0_118, %c0_119], %257 {strides = array<i32>} : memref<1x8x8x128xf32, #tpu.memory_space<vmem>>, vector<1x1x8x128xf32>,
    %c5_i32 = arith.constant 5 : i32
    %c0_120 = arith.constant 0 : index
    %c0_121 = arith.constant 0 : index
    %258 = vector.load %arg6[%c0_120, %c0_121] : memref<8x128xf32, #tpu.memory_space<vmem>>, vector<8x128xf32>
    %c0_122 = arith.constant 0 : index
    %c0_123 = arith.constant 0 : index
    %259 = vector.load %arg7[%c0_122, %c0_123] : memref<8x128xf32, #tpu.memory_space<vmem>>, vector<8x128xf32>
    %c0_124 = arith.constant 0 : index
    %260 = arith.index_cast %c5_i32 : i32 to index
    %c0_125 = arith.constant 0 : index
    %c0_126 = arith.constant 0 : index
    %261 = vector.load %arg2[%c0_124, %260, %c0_125, %c0_126] : memref<1x8x8x512xf32, #tpu.memory_space<vmem>>, vector<1x1x8x512xf32>
    %262 = vector.shape_cast %261 : vector<1x1x8x512xf32> to vector<8x512xf32>
    %c0_127 = arith.constant 0 : index
    %c0_128 = arith.constant 0 : index
    %c0_129 = arith.constant 0 : index
    %263 = vector.load %arg4[%c0_127, %c0_128, %c0_129] : memref<1x128x512xf32, #tpu.memory_space<vmem>>, vector<1x128x512xf32>
    %264 = vector.shape_cast %263 : vector<1x128x512xf32> to vector<128x512xf32>
    %cst_130 = arith.constant dense<0.000000e+00> : vector<8x512xf32>
    %265 = tpu.matmul %258, %264, %cst_130 {dimension_numbers = #tpu.dot_dimension_numbers<[1], [0], [0], [1], [0, 0, 1, 1], [], []>} : vector<8x128xf32>, vector<128x512xf32>, vector<8x512xf32> -> vector<8x512xf32>
    %266 = arith.addf %262, %265 : vector<8x512xf32>
    %c0_131 = arith.constant 0 : index
    %267 = arith.index_cast %c5_i32 : i32 to index
    %c0_132 = arith.constant 0 : index
    %c0_133 = arith.constant 0 : index
    %268 = vector.load %arg3[%c0_131, %267, %c0_132, %c0_133] : memref<1x8x8x1xf32, #tpu.memory_space<vmem>>, vector<1x1x8x1xf32>
    %269 = vector.shape_cast %268 : vector<1x1x8x1xf32> to vector<8x1xf32>
    %270 = vector.extract_strided_slice %266 {offsets = [0, 0], sizes = [8, 128], strides = [1, 1]} : vector<8x512xf32> to vector<8x128xf32>
    %271 = arith.negf %270 : vector<8x128xf32>
    %272 = math.exp %271 : vector<8x128xf32>
    %cst_134 = arith.constant 1.000000e+00 : f32
    %273 = vector.broadcast %cst_134 : f32 to vector<8x128xf32>
    %274 = arith.addf %273, %272 : vector<8x128xf32>
    %275 = arith.divf %273, %274 : vector<8x128xf32>
    %276 = vector.extract_strided_slice %266 {offsets = [0, 128], sizes = [8, 128], strides = [1, 1]} : vector<8x512xf32> to vector<8x128xf32>
    %277 = arith.negf %276 : vector<8x128xf32>
    %278 = math.exp %277 : vector<8x128xf32>
    %cst_135 = arith.constant 1.000000e+00 : f32
    %279 = vector.broadcast %cst_135 : f32 to vector<8x128xf32>
    %280 = arith.addf %279, %278 : vector<8x128xf32>
    %281 = arith.divf %279, %280 : vector<8x128xf32>
    %282 = vector.extract_strided_slice %266 {offsets = [0, 256], sizes = [8, 128], strides = [1, 1]} : vector<8x512xf32> to vector<8x128xf32>
    %283 = math.tanh %282 : vector<8x128xf32>
    %284 = vector.extract_strided_slice %266 {offsets = [0, 384], sizes = [8, 128], strides = [1, 1]} : vector<8x512xf32> to vector<8x128xf32>
    %285 = arith.negf %284 : vector<8x128xf32>
    %286 = math.exp %285 : vector<8x128xf32>
    %cst_136 = arith.constant 1.000000e+00 : f32
    %287 = vector.broadcast %cst_136 : f32 to vector<8x128xf32>
    %288 = arith.addf %287, %286 : vector<8x128xf32>
    %289 = arith.divf %287, %288 : vector<8x128xf32>
    %290 = arith.mulf %281, %259 : vector<8x128xf32>
    %291 = arith.mulf %275, %283 : vector<8x128xf32>
    %292 = arith.addf %290, %291 : vector<8x128xf32>
    %293 = math.tanh %292 : vector<8x128xf32>
    %294 = arith.mulf %289, %293 : vector<8x128xf32>
    %295 = arith.subf %294, %258 : vector<8x128xf32>
    %296 = vector.broadcast %269 : vector<8x1xf32> to vector<8x128xf32>
    %297 = arith.mulf %296, %295 : vector<8x128xf32>
    %298 = arith.addf %258, %297 : vector<8x128xf32>
    %299 = arith.subf %292, %259 : vector<8x128xf32>
    %300 = vector.broadcast %269 : vector<8x1xf32> to vector<8x128xf32>
    %301 = arith.mulf %300, %299 : vector<8x128xf32>
    %302 = arith.addf %259, %301 : vector<8x128xf32>
    %c0_137 = arith.constant 0 : index
    %c0_138 = arith.constant 0 : index
    %303 = vector.load %arg6[%c0_137, %c0_138] : memref<8x128xf32, #tpu.memory_space<vmem>>, vector<8x128xf32>
    tpu.vector_store %arg6[%c0_137, %c0_138], %298 {strides = array<i32>} : memref<8x128xf32, #tpu.memory_space<vmem>>, vector<8x128xf32>,
    %c0_139 = arith.constant 0 : index
    %c0_140 = arith.constant 0 : index
    %304 = vector.load %arg7[%c0_139, %c0_140] : memref<8x128xf32, #tpu.memory_space<vmem>>, vector<8x128xf32>
    tpu.vector_store %arg7[%c0_139, %c0_140], %302 {strides = array<i32>} : memref<8x128xf32, #tpu.memory_space<vmem>>, vector<8x128xf32>,
    %c0_141 = arith.constant 0 : index
    %305 = arith.index_cast %c5_i32 : i32 to index
    %c0_142 = arith.constant 0 : index
    %c0_143 = arith.constant 0 : index
    %306 = vector.load %arg5[%c0_141, %305, %c0_142, %c0_143] : memref<1x8x8x128xf32, #tpu.memory_space<vmem>>, vector<1x1x8x128xf32>
    %307 = vector.shape_cast %306 : vector<1x1x8x128xf32> to vector<8x128xf32>
    %308 = vector.shape_cast %298 : vector<8x128xf32> to vector<1x1x8x128xf32>
    tpu.vector_store %arg5[%c0_141, %305, %c0_142, %c0_143], %308 {strides = array<i32>} : memref<1x8x8x128xf32, #tpu.memory_space<vmem>>, vector<1x1x8x128xf32>,
    %c6_i32 = arith.constant 6 : i32
    %c0_144 = arith.constant 0 : index
    %c0_145 = arith.constant 0 : index
    %309 = vector.load %arg6[%c0_144, %c0_145] : memref<8x128xf32, #tpu.memory_space<vmem>>, vector<8x128xf32>
    %c0_146 = arith.constant 0 : index
    %c0_147 = arith.constant 0 : index
    %310 = vector.load %arg7[%c0_146, %c0_147] : memref<8x128xf32, #tpu.memory_space<vmem>>, vector<8x128xf32>
    %c0_148 = arith.constant 0 : index
    %311 = arith.index_cast %c6_i32 : i32 to index
    %c0_149 = arith.constant 0 : index
    %c0_150 = arith.constant 0 : index
    %312 = vector.load %arg2[%c0_148, %311, %c0_149, %c0_150] : memref<1x8x8x512xf32, #tpu.memory_space<vmem>>, vector<1x1x8x512xf32>
    %313 = vector.shape_cast %312 : vector<1x1x8x512xf32> to vector<8x512xf32>
    %c0_151 = arith.constant 0 : index
    %c0_152 = arith.constant 0 : index
    %c0_153 = arith.constant 0 : index
    %314 = vector.load %arg4[%c0_151, %c0_152, %c0_153] : memref<1x128x512xf32, #tpu.memory_space<vmem>>, vector<1x128x512xf32>
    %315 = vector.shape_cast %314 : vector<1x128x512xf32> to vector<128x512xf32>
    %cst_154 = arith.constant dense<0.000000e+00> : vector<8x512xf32>
    %316 = tpu.matmul %309, %315, %cst_154 {dimension_numbers = #tpu.dot_dimension_numbers<[1], [0], [0], [1], [0, 0, 1, 1], [], []>} : vector<8x128xf32>, vector<128x512xf32>, vector<8x512xf32> -> vector<8x512xf32>
    %317 = arith.addf %313, %316 : vector<8x512xf32>
    %c0_155 = arith.constant 0 : index
    %318 = arith.index_cast %c6_i32 : i32 to index
    %c0_156 = arith.constant 0 : index
    %c0_157 = arith.constant 0 : index
    %319 = vector.load %arg3[%c0_155, %318, %c0_156, %c0_157] : memref<1x8x8x1xf32, #tpu.memory_space<vmem>>, vector<1x1x8x1xf32>
    %320 = vector.shape_cast %319 : vector<1x1x8x1xf32> to vector<8x1xf32>
    %321 = vector.extract_strided_slice %317 {offsets = [0, 0], sizes = [8, 128], strides = [1, 1]} : vector<8x512xf32> to vector<8x128xf32>
    %322 = arith.negf %321 : vector<8x128xf32>
    %323 = math.exp %322 : vector<8x128xf32>
    %cst_158 = arith.constant 1.000000e+00 : f32
    %324 = vector.broadcast %cst_158 : f32 to vector<8x128xf32>
    %325 = arith.addf %324, %323 : vector<8x128xf32>
    %326 = arith.divf %324, %325 : vector<8x128xf32>
    %327 = vector.extract_strided_slice %317 {offsets = [0, 128], sizes = [8, 128], strides = [1, 1]} : vector<8x512xf32> to vector<8x128xf32>
    %328 = arith.negf %327 : vector<8x128xf32>
    %329 = math.exp %328 : vector<8x128xf32>
    %cst_159 = arith.constant 1.000000e+00 : f32
    %330 = vector.broadcast %cst_159 : f32 to vector<8x128xf32>
    %331 = arith.addf %330, %329 : vector<8x128xf32>
    %332 = arith.divf %330, %331 : vector<8x128xf32>
    %333 = vector.extract_strided_slice %317 {offsets = [0, 256], sizes = [8, 128], strides = [1, 1]} : vector<8x512xf32> to vector<8x128xf32>
    %334 = math.tanh %333 : vector<8x128xf32>
    %335 = vector.extract_strided_slice %317 {offsets = [0, 384], sizes = [8, 128], strides = [1, 1]} : vector<8x512xf32> to vector<8x128xf32>
    %336 = arith.negf %335 : vector<8x128xf32>
    %337 = math.exp %336 : vector<8x128xf32>
    %cst_160 = arith.constant 1.000000e+00 : f32
    %338 = vector.broadcast %cst_160 : f32 to vector<8x128xf32>
    %339 = arith.addf %338, %337 : vector<8x128xf32>
    %340 = arith.divf %338, %339 : vector<8x128xf32>
    %341 = arith.mulf %332, %310 : vector<8x128xf32>
    %342 = arith.mulf %326, %334 : vector<8x128xf32>
    %343 = arith.addf %341, %342 : vector<8x128xf32>
    %344 = math.tanh %343 : vector<8x128xf32>
    %345 = arith.mulf %340, %344 : vector<8x128xf32>
    %346 = arith.subf %345, %309 : vector<8x128xf32>
    %347 = vector.broadcast %320 : vector<8x1xf32> to vector<8x128xf32>
    %348 = arith.mulf %347, %346 : vector<8x128xf32>
    %349 = arith.addf %309, %348 : vector<8x128xf32>
    %350 = arith.subf %343, %310 : vector<8x128xf32>
    %351 = vector.broadcast %320 : vector<8x1xf32> to vector<8x128xf32>
    %352 = arith.mulf %351, %350 : vector<8x128xf32>
    %353 = arith.addf %310, %352 : vector<8x128xf32>
    %c0_161 = arith.constant 0 : index
    %c0_162 = arith.constant 0 : index
    %354 = vector.load %arg6[%c0_161, %c0_162] : memref<8x128xf32, #tpu.memory_space<vmem>>, vector<8x128xf32>
    tpu.vector_store %arg6[%c0_161, %c0_162], %349 {strides = array<i32>} : memref<8x128xf32, #tpu.memory_space<vmem>>, vector<8x128xf32>,
    %c0_163 = arith.constant 0 : index
    %c0_164 = arith.constant 0 : index
    %355 = vector.load %arg7[%c0_163, %c0_164] : memref<8x128xf32, #tpu.memory_space<vmem>>, vector<8x128xf32>
    tpu.vector_store %arg7[%c0_163, %c0_164], %353 {strides = array<i32>} : memref<8x128xf32, #tpu.memory_space<vmem>>, vector<8x128xf32>,
    %c0_165 = arith.constant 0 : index
    %356 = arith.index_cast %c6_i32 : i32 to index
    %c0_166 = arith.constant 0 : index
    %c0_167 = arith.constant 0 : index
    %357 = vector.load %arg5[%c0_165, %356, %c0_166, %c0_167] : memref<1x8x8x128xf32, #tpu.memory_space<vmem>>, vector<1x1x8x128xf32>
    %358 = vector.shape_cast %357 : vector<1x1x8x128xf32> to vector<8x128xf32>
    %359 = vector.shape_cast %349 : vector<8x128xf32> to vector<1x1x8x128xf32>
    tpu.vector_store %arg5[%c0_165, %356, %c0_166, %c0_167], %359 {strides = array<i32>} : memref<1x8x8x128xf32, #tpu.memory_space<vmem>>, vector<1x1x8x128xf32>,
    %c7_i32 = arith.constant 7 : i32
    %c0_168 = arith.constant 0 : index
    %c0_169 = arith.constant 0 : index
    %360 = vector.load %arg6[%c0_168, %c0_169] : memref<8x128xf32, #tpu.memory_space<vmem>>, vector<8x128xf32>
    %c0_170 = arith.constant 0 : index
    %c0_171 = arith.constant 0 : index
    %361 = vector.load %arg7[%c0_170, %c0_171] : memref<8x128xf32, #tpu.memory_space<vmem>>, vector<8x128xf32>
    %c0_172 = arith.constant 0 : index
    %362 = arith.index_cast %c7_i32 : i32 to index
    %c0_173 = arith.constant 0 : index
    %c0_174 = arith.constant 0 : index
    %363 = vector.load %arg2[%c0_172, %362, %c0_173, %c0_174] : memref<1x8x8x512xf32, #tpu.memory_space<vmem>>, vector<1x1x8x512xf32>
    %364 = vector.shape_cast %363 : vector<1x1x8x512xf32> to vector<8x512xf32>
    %c0_175 = arith.constant 0 : index
    %c0_176 = arith.constant 0 : index
    %c0_177 = arith.constant 0 : index
    %365 = vector.load %arg4[%c0_175, %c0_176, %c0_177] : memref<1x128x512xf32, #tpu.memory_space<vmem>>, vector<1x128x512xf32>
    %366 = vector.shape_cast %365 : vector<1x128x512xf32> to vector<128x512xf32>
    %cst_178 = arith.constant dense<0.000000e+00> : vector<8x512xf32>
    %367 = tpu.matmul %360, %366, %cst_178 {dimension_numbers = #tpu.dot_dimension_numbers<[1], [0], [0], [1], [0, 0, 1, 1], [], []>} : vector<8x128xf32>, vector<128x512xf32>, vector<8x512xf32> -> vector<8x512xf32>
    %368 = arith.addf %364, %367 : vector<8x512xf32>
    %c0_179 = arith.constant 0 : index
    %369 = arith.index_cast %c7_i32 : i32 to index
    %c0_180 = arith.constant 0 : index
    %c0_181 = arith.constant 0 : index
    %370 = vector.load %arg3[%c0_179, %369, %c0_180, %c0_181] : memref<1x8x8x1xf32, #tpu.memory_space<vmem>>, vector<1x1x8x1xf32>
    %371 = vector.shape_cast %370 : vector<1x1x8x1xf32> to vector<8x1xf32>
    %372 = vector.extract_strided_slice %368 {offsets = [0, 0], sizes = [8, 128], strides = [1, 1]} : vector<8x512xf32> to vector<8x128xf32>
    %373 = arith.negf %372 : vector<8x128xf32>
    %374 = math.exp %373 : vector<8x128xf32>
    %cst_182 = arith.constant 1.000000e+00 : f32
    %375 = vector.broadcast %cst_182 : f32 to vector<8x128xf32>
    %376 = arith.addf %375, %374 : vector<8x128xf32>
    %377 = arith.divf %375, %376 : vector<8x128xf32>
    %378 = vector.extract_strided_slice %368 {offsets = [0, 128], sizes = [8, 128], strides = [1, 1]} : vector<8x512xf32> to vector<8x128xf32>
    %379 = arith.negf %378 : vector<8x128xf32>
    %380 = math.exp %379 : vector<8x128xf32>
    %cst_183 = arith.constant 1.000000e+00 : f32
    %381 = vector.broadcast %cst_183 : f32 to vector<8x128xf32>
    %382 = arith.addf %381, %380 : vector<8x128xf32>
    %383 = arith.divf %381, %382 : vector<8x128xf32>
    %384 = vector.extract_strided_slice %368 {offsets = [0, 256], sizes = [8, 128], strides = [1, 1]} : vector<8x512xf32> to vector<8x128xf32>
    %385 = math.tanh %384 : vector<8x128xf32>
    %386 = vector.extract_strided_slice %368 {offsets = [0, 384], sizes = [8, 128], strides = [1, 1]} : vector<8x512xf32> to vector<8x128xf32>
    %387 = arith.negf %386 : vector<8x128xf32>
    %388 = math.exp %387 : vector<8x128xf32>
    %cst_184 = arith.constant 1.000000e+00 : f32
    %389 = vector.broadcast %cst_184 : f32 to vector<8x128xf32>
    %390 = arith.addf %389, %388 : vector<8x128xf32>
    %391 = arith.divf %389, %390 : vector<8x128xf32>
    %392 = arith.mulf %383, %361 : vector<8x128xf32>
    %393 = arith.mulf %377, %385 : vector<8x128xf32>
    %394 = arith.addf %392, %393 : vector<8x128xf32>
    %395 = math.tanh %394 : vector<8x128xf32>
    %396 = arith.mulf %391, %395 : vector<8x128xf32>
    %397 = arith.subf %396, %360 : vector<8x128xf32>
    %398 = vector.broadcast %371 : vector<8x1xf32> to vector<8x128xf32>
    %399 = arith.mulf %398, %397 : vector<8x128xf32>
    %400 = arith.addf %360, %399 : vector<8x128xf32>
    %401 = arith.subf %394, %361 : vector<8x128xf32>
    %402 = vector.broadcast %371 : vector<8x1xf32> to vector<8x128xf32>
    %403 = arith.mulf %402, %401 : vector<8x128xf32>
    %404 = arith.addf %361, %403 : vector<8x128xf32>
    %c0_185 = arith.constant 0 : index
    %c0_186 = arith.constant 0 : index
    %405 = vector.load %arg6[%c0_185, %c0_186] : memref<8x128xf32, #tpu.memory_space<vmem>>, vector<8x128xf32>
    tpu.vector_store %arg6[%c0_185, %c0_186], %400 {strides = array<i32>} : memref<8x128xf32, #tpu.memory_space<vmem>>, vector<8x128xf32>,
    %c0_187 = arith.constant 0 : index
    %c0_188 = arith.constant 0 : index
    %406 = vector.load %arg7[%c0_187, %c0_188] : memref<8x128xf32, #tpu.memory_space<vmem>>, vector<8x128xf32>
    tpu.vector_store %arg7[%c0_187, %c0_188], %404 {strides = array<i32>} : memref<8x128xf32, #tpu.memory_space<vmem>>, vector<8x128xf32>,
    %c0_189 = arith.constant 0 : index
    %407 = arith.index_cast %c7_i32 : i32 to index
    %c0_190 = arith.constant 0 : index
    %c0_191 = arith.constant 0 : index
    %408 = vector.load %arg5[%c0_189, %407, %c0_190, %c0_191] : memref<1x8x8x128xf32, #tpu.memory_space<vmem>>, vector<1x1x8x128xf32>
    %409 = vector.shape_cast %408 : vector<1x1x8x128xf32> to vector<8x128xf32>
    %410 = vector.shape_cast %400 : vector<8x128xf32> to vector<1x1x8x128xf32>
    tpu.vector_store %arg5[%c0_189, %407, %c0_190, %c0_191], %410 {strides = array<i32>} : memref<1x8x8x128xf32, #tpu.memory_space<vmem>>, vector<1x1x8x128xf32>,
    %c8_i32 = arith.constant 8 : i32
    return
  }
  func.func @transform_0(%arg0: i32, %arg1: i32) -> (i32, i32, i32, i32) {
    %c0_i32 = arith.constant 0 : i32
    %c0_i32_0 = arith.constant 0 : i32
    %c0_i32_1 = arith.constant 0 : i32
    return %arg0, %arg1, %c0_i32, %c0_i32_0 : i32, i32, i32, i32
  }
  func.func @transform_1(%arg0: i32, %arg1: i32) -> (i32, i32, i32, i32) {
    %c0_i32 = arith.constant 0 : i32
    %c0_i32_0 = arith.constant 0 : i32
    %c0_i32_1 = arith.constant 0 : i32
    return %arg0, %arg1, %c0_i32, %c0_i32_0 : i32, i32, i32, i32
  }
  func.func @transform_2(%arg0: i32, %arg1: i32) -> (i32, i32, i32) {
    %c0_i32 = arith.constant 0 : i32
    %c0_i32_0 = arith.constant 0 : i32
    %c0_i32_1 = arith.constant 0 : i32
    return %arg0, %c0_i32, %c0_i32_0 : i32, i32, i32
  }
  func.func @transform_3(%arg0: i32, %arg1: i32) -> (i32, i32, i32, i32) {
    %c0_i32 = arith.constant 0 : i32
    %c0_i32_0 = arith.constant 0 : i32
    %c0_i32_1 = arith.constant 0 : i32
    return %arg0, %arg1, %c0_i32, %c0_i32_0 : i32, i32, i32, i32
  }
}

</mosaic_0001>

<bundles_post_ra>
// kernel: tpu_custom_call.1
= control target key start
LH: loop header
LB: loop body
LE: loop exit
PB: predicated region body
PF: predicated region fallthrough
CT: control target
= control target key end

     0   :  { %s4253_s0 = inlined_call_operand.hbm [shape: f32[2,8,8,512], index: 0, kind: input, shape index: {}]   ;;  %s4254_s1 = inlined_call_operand.vmem [shape: f32[2,8,8,1], index: 1, kind: input, shape index: {}]   ;;  %s4255_s2 = inlined_call_operand.hbm [shape: f32[2,128,512], index: 2, kind: input, shape index: {}]   ;;  %s4256_s3 = inlined_call_operand.hbm [shape: f32[2,8,8,128], index: 3, kind: output, shape index: {}]  }
   0x1   :  { %4312 = sst [smem:[#allocation34_spill]] %s4253_s0 }
   0x2   :  { %8 = vsyncpa [#allocation5], 0 }
   0x3   :  { %10 = vsyncpa [#allocation5 + $0x1], 0 }
   0x4   :  { %11 = vsyncpa [#allocation8], 0 }
   0x5   :  { %13 = vsyncpa [#allocation8 + $0x1], 0 }
   0x6   :  { %14 = vsyncpa [#allocation6], 0 }
   0x7   :  { %16 = vsyncpa [#allocation6 + $0x1], 0  ;;  %s2788_s12 = smov 0   ;;  %s2790_s13 = smov 0  }
   0x8   :  { %s2792_s14 = smov 0   ;;  %s2794_s15 = smov 0  }
   0x9   :  { %s2796_s16 = smov 0   ;;  %s2798_s17 = smov 0  }
   0xa LB: > { %s2319_s18 = sadd.s32 4294967295, %s2760_s17   ;;  %s2320_s19 = sadd.s32 4294967294, %s2760_s17   ;;  %s2760_s17 = sphi %s2798_s17, %s22_s17   ;;  %s2756_s16 = sphi %s2796_s16, %s4400_s16   ;;  %s2752_s15 = sphi %s2794_s15, %s4399_s15   ;;  %s2748_s14 = sphi %s2792_s14, %s4398_s14   ;;  %s2744_s13 = sphi %s2790_s13, %s4397_s13   ;;  %s2740_s12 = sphi %s2788_s12, %s4396_s12  }
   0xb   : > { %s34_s20 = sadd.s32 1, %s2756_s16  ;;  %s43_s21 = sadd.s32 1, %s2748_s14 }
   0xc   : > { %p36_p0 = scmp.ge.s32.totalorder %s34_s20, 2  ;;  %p50_p1 = scmp.ne.s32.totalorder %s2748_s14, %s2744_s13 }
   0xd   : > { %p51_p2 = scmp.eq.s32.totalorder %s2760_s17, 0  ;;  %p56_p3 = scmp.ne.s32.totalorder %s2744_s13, %s2740_s12 }
   0xe   : > { %s4402_s20 = smov (%p36_p0, %s34_s20), 0  ;;  %p57_p5 = scmp.eq.s32.totalorder %s2319_s18, 0 }
   0xf   : > { %p2829_p4 = por %p51_p2, %p50_p1  ;;  %s38_s23 = ssub.s32 %s2756_s16, %s4402_s20 }
  0x10   : > { %p136_p6 = scmp.eq.s32.totalorder %s2319_s18, 1  ;;  %p41_p7 = scmp.eq.s32.totalorder %s38_s23, 0 }
  0x11   : > { %p2835_p8 = por %p57_p5, %p56_p3  ;;  %p142_p10 = scmp.eq.s32.totalorder %s2320_s19, 1 }
  0x12   : > { %p2839_p9 = por %p136_p6, %p50_p1  ;;  %p2322_p12 = scmp.ge.s32.totalorder %s2760_s17, 2 }
  0x13   : > { %s2844_s26 = scalar_select %p41_p7, %s2748_s14, %s43_s21  }
  0x14   : > { %p2846_p11 = por %p142_p10, %p56_p3  ;;  %p2427_p13 = scmp.lt.s32.totalorder %s2760_s17, 2 }
  0x15   : > { %s2853_s28 = sand.u32 1, %s2748_s14   ;;  %s2406_s30 = sshll.u32 %s2756_s16, 8 }
  0x16   : > { %s2323_s29 = sshll.u32 %s2853_s28, 8  ;;  %s4317_s0 = sld [smem:[#allocation34_spill]] }
  0x17   : > { %s166_s7 = scalar_lea.vmem [#allocation4], %s2323_s29  ;;  %p2862_p0 = pnand %p2427_p13, %p2829_p4 }
  0x18   : > { %s177_s8 = sshll.u32 %s166_s7, 4  ;;  %p2329_p1 = scmp.ge.s32.totalorder %s2760_s17, 1  ;;  %s178_s8 = int_to_ptr.vmem [resolvable:$true] %s177_s8 }
  0x19   : > { %s163_s11 = scalar_lea.sflag [#allocation5], %s2853_s28  ;;  %s2762_s18 = smov 512  }
  0x1a   : > { %s2763_s19 = smov 32   ;;  %p220_p2 = scmp.lt.s32.totalorder %s2760_s17, 3 }
  0x1b   : > { %s2326_s21 = sshll.u32 %s2853_s28, 9  ;;  %s2407_s23 = sshll.u32 %s2756_s16, 9 }
  0x1c   : > { %s174_s6 = scalar_lea.hbm %s4317_s0, %s2406_s30  ;;  %p221_p3 = pnand %p2329_p1, %p220_p2 }
  0x1d   : > { %s175_s9 = sshll.u32 %s174_s6, 4  ;;  %s209_s22 = scalar_lea.hbm %s4255_s2, %s2407_s23  ;;  %s176_s9 = int_to_ptr.hbm [resolvable:$true] %s175_s9 }
  0x1e   : > { %2419 = dma.hbm_to_vmem [thread:$0]  (!%p2862_p0), %s176_s9, 4096, %s178_s8, %s163_s11, %s2762_s18, %s2762_s18, %s2763_s19  }
  0x1f   : > { %s204_s4 = scalar_lea.vmem [#allocation7], %s2326_s21  ;;  %s210_s6 = sshll.u32 %s209_s22, 4  ;;  %s211_s6 = int_to_ptr.hbm [resolvable:$true] %s210_s6 }
  0x20   : > { %s212_s5 = sshll.u32 %s204_s4, 4  ;;  %s201_s7 = scalar_lea.sflag [#allocation8], %s2853_s28  ;;  %s213_s5 = int_to_ptr.vmem [resolvable:$true] %s212_s5 }
  0x21   : > { %2422 = dma.hbm_to_vmem [thread:$0]  (!%p2862_p0), %s211_s6, 8192, %s213_s5, %s201_s7, %s2762_s18, %s2762_s18, %s2763_s19  }
  0x22   : > { %224 = sbr.rel (%p221_p3) target bundleno = 1486 (0x5ce), region = 32 }
  0x27   : > { %s2880_s8 = sand.u32 1, %s2744_s13  }
  0x28   : > { %s2330_s9 = sshll.u32 %s2880_s8, 8  ;;  %s227_s11 = scalar_lea.sflag [#allocation5], %s2880_s8 }
  0x29   : > { %s2884_s0 = scalar_lea.vmem [#allocation4], %s2330_s9 }
  0x2a   : > { %2727 = dma.done.wait (%p2835_p8), %s227_s11, 4096  }
  0x2b   : > { %2729 = vsyncadd (%p2835_p8), %s227_s11, 4294963200  ;;  %s2331_s28 = sshll.u32 %s2880_s8, 9  ;;  %s237_s10 = scalar_lea.sflag [#allocation8], %s2880_s8 }
  0x2c   : > { %s2892_s18 = scalar_lea.vmem [#allocation7], %s2331_s28 }
  0x2d   : > { %2731 = dma.done.wait (%p2835_p8), %s237_s10, 8192  }
  0x2e   : > { %2733 = vsyncadd (%p2835_p8), %s237_s10, 4294959104  ;;  %v2899_v0 = vld [vmem:[%s2892_s18 + $0x1e0] sm:$0xff]  ;;  %v2902_v1 = vld [vmem:[%s2892_s18 + $0x1e8] sm:$0xff]  ;;  %p280_p4 = scmp.lt.s32.totalorder %s2752_s15, 1  ;;  %v2764_v60 = vmov 0.0   ;;  %v4261_v63 = vmov 0  }
  0x2f   : > { %v2905_v2 = vld [vmem:[%s2892_s18 + $0x1f8] sm:$0xff]  ;;  %366 = vmatpush.msra.mxu0 %v2899_v0  ;;  %386 = vmatpush.msra.mxu1 %v2902_v1  ;;  %v2910_v3 = vld [vmem:[%s2892_s18 + $0x1c0] sm:$0xff]  ;;  %v2913_v4 = vld [vmem:[%s2892_s18 + $0x1c8] sm:$0xff]  ;;  %s2332_s30 = sshll.u32 %s2880_s8, 6 }
  0x30   : > { %v2916_v5 = vld [vmem:[%s2892_s18 + $0x1d8] sm:$0xff]  ;;  %426 = vmatpush.msra.mxu3 %v2905_v2  ;;  %v2920_v6 = vld [vmem:[%s2892_s18 + $0x1a0] sm:$0xff]  ;;  %v2923_v7 = vld [vmem:[%s2892_s18 + $0x1a8] sm:$0xff]  ;;  %s3080_s24 = scalar_select %p280_p4, %s2752_s15, 1  ;;  %2483 = vset.pattern.permute.xlu0 %v4261_v63 }
  0x31   : > { %367 = vmatpush.msra.mxu0 %v2910_v3  ;;  %387 = vmatpush.msra.mxu1 %v2913_v4  ;;  %v2928_v8 = vld [vmem:[%s2892_s18 + $0x1b8] sm:$0xff]  ;;  %v2932_v9 = vld [vmem:[%s2892_s18 + $0x180] sm:$0xff]  ;;  %v2935_v10 = vld [vmem:[%s2892_s18 + $0x188] sm:$0xff]  ;;  %s3309_s22 = scalar_lea.vmem [#allocation9], %s2332_s30 }
  0x32   : > { %427 = vmatpush.msra.mxu3 %v2916_v5  ;;  %4319 = vst [vmem:[#allocation13_spill] sm:$0xff] %v2932_v9  ;;  %v2940_v11 = vld [vmem:[%s2892_s18 + $0x198] sm:$0xff]  ;;  %v2944_v12 = vld [vmem:[%s2892_s18 + $0x160] sm:$0xff]  ;;  %v2947_v13 = vld [vmem:[%s2892_s18 + $0x168] sm:$0xff]  ;;  %s2408_s19 = sshll.u32 %s3080_s24, 6  ;;  %s2188_s7 = sshll.u32 %s3309_s22, 4  ;;  %s2189_s7 = int_to_ptr.vmem [resolvable:$true] %s2188_s7 }
  0x33   : > { %368 = vmatpush.msra.mxu0 %v2920_v6  ;;  %388 = vmatpush.msra.mxu1 %v2923_v7  ;;  %v2952_v14 = vld [vmem:[%s2892_s18 + $0x178] sm:$0xff]  ;;  %v2956_v15 = vld [vmem:[%s2892_s18 + $0x140] sm:$0xff]  ;;  %v2959_v16 = vld [vmem:[%s2892_s18 + $0x148] sm:$0xff]  ;;  %s3139_s29 = scalar_lea.vmem %s4254_s1, %s2408_s19  ;;  %s2694_s24 = scalar_lea.hbm %s4256_s3, 128 }
  0x34   : > { %428 = vmatpush.msra.mxu3 %v2928_v8  ;;  %v2962_v17 = vld [vmem:[%s2892_s18 + $0x1f0] sm:$0xff]  ;;  %v2967_v18 = vld [vmem:[%s2892_s18 + $0x158] sm:$0xff]  ;;  %v2974_v20 = vld [vmem:[%s2892_s18 + $0x120] sm:$0xff] }
  0x35   : > { %369 = vmatpush.msra.mxu0 %v2932_v9  ;;  %389 = vmatpush.msra.mxu1 %v2935_v10  ;;  %v2970_v19 = vld [vmem:[%s2892_s18 + $0x1d0] sm:$0xff]  ;;  %v2977_v21 = vld [vmem:[%s2892_s18 + $0x128] sm:$0xff]  ;;  %v2983_v22 = vld [vmem:[%s2892_s18 + $0x138] sm:$0xff] }
  0x36   : > { %429 = vmatpush.msra.mxu3 %v2940_v11  ;;  %406 = vmatpush.msra.mxu2 %v2962_v17  ;;  %v2986_v23 = vld [vmem:[%s2892_s18 + $0x1b0] sm:$0xff]  ;;  %v2990_v24 = vld [vmem:[%s2892_s18 + $0x100] sm:$0xff]  ;;  %v2993_v25 = vld [vmem:[%s2892_s18 + $0x108] sm:$0xff] }
  0x37   : > { %370 = vmatpush.msra.mxu0 %v2944_v12  ;;  %390 = vmatpush.msra.mxu1 %v2947_v13  ;;  %v2999_v26 = vld [vmem:[%s2892_s18 + $0x118] sm:$0xff]  ;;  %v3002_v27 = vld [vmem:[%s2892_s18 + $0x190] sm:$0xff]  ;;  %v3006_v28 = vld [vmem:[%s2892_s18 + $0xe0] sm:$0xff] }
  0x38   : > { %430 = vmatpush.msra.mxu3 %v2952_v14  ;;  %407 = vmatpush.msra.mxu2 %v2970_v19  ;;  %v3009_v29 = vld [vmem:[%s2892_s18 + $0xe8] sm:$0xff]  ;;  %v3015_v30 = vld [vmem:[%s2892_s18 + $0xf8] sm:$0xff]  ;;  %v3018_v31 = vld [vmem:[%s2892_s18 + $0x170] sm:$0xff] }
  0x39   : > { %371 = vmatpush.msra.mxu0 %v2956_v15  ;;  %391 = vmatpush.msra.mxu1 %v2959_v16  ;;  %v3022_v32 = vld [vmem:[%s2892_s18 + $0xc0] sm:$0xff]  ;;  %v3025_v33 = vld [vmem:[%s2892_s18 + $0xc8] sm:$0xff]  ;;  %v3031_v34 = vld [vmem:[%s2892_s18 + $0xd8] sm:$0xff] }
  0x3a   : > { %431 = vmatpush.msra.mxu3 %v2967_v18  ;;  %408 = vmatpush.msra.mxu2 %v2986_v23  ;;  %v3034_v35 = vld [vmem:[%s2892_s18 + $0x150] sm:$0xff]  ;;  %v3038_v36 = vld [vmem:[%s2892_s18 + $0xa0] sm:$0xff]  ;;  %v3041_v37 = vld [vmem:[%s2892_s18 + $0xa8] sm:$0xff] }
  0x3b   : > { %372 = vmatpush.msra.mxu0 %v2974_v20  ;;  %392 = vmatpush.msra.mxu1 %v2977_v21  ;;  %v3048_v38 = vld [vmem:[%s2892_s18 + $0xb8] sm:$0xff]  ;;  %v3051_v39 = vld [vmem:[%s2892_s18 + $0x130] sm:$0xff]  ;;  %v3055_v40 = vld [vmem:[%s2892_s18 + $0x80] sm:$0xff] }
  0x3c   : > { %432 = vmatpush.msra.mxu3 %v2983_v22  ;;  %409 = vmatpush.msra.mxu2 %v3002_v27  ;;  %v3058_v41 = vld [vmem:[%s2892_s18 + $0x88] sm:$0xff]  ;;  %v3064_v42 = vld [vmem:[%s2892_s18 + $0x98] sm:$0xff]  ;;  %v3067_v43 = vld [vmem:[%s2892_s18 + $0x110] sm:$0xff] }
  0x3d   : > { %373 = vmatpush.msra.mxu0 %v2990_v24  ;;  %393 = vmatpush.msra.mxu1 %v2993_v25  ;;  %v3071_v44 = vld [vmem:[%s2892_s18 + $0x60] sm:$0xff]  ;;  %v3074_v45 = vld [vmem:[%s2892_s18 + $0x68] sm:$0xff]  ;;  %v3085_v46 = vld [vmem:[%s2892_s18 + $0x78] sm:$0xff] }
  0x3e   : > { %433 = vmatpush.msra.mxu3 %v2999_v26  ;;  %410 = vmatpush.msra.mxu2 %v3018_v31  ;;  %v3088_v47 = vld [vmem:[%s2892_s18 + $0xf0] sm:$0xff]  ;;  %v3092_v48 = vld [vmem:[%s2892_s18 + $0x40] sm:$0xff]  ;;  %v3095_v49 = vld [vmem:[%s2892_s18 + $0x48] sm:$0xff] }
  0x3f   : > { %374 = vmatpush.msra.mxu0 %v3006_v28  ;;  %394 = vmatpush.msra.mxu1 %v3009_v29  ;;  %v3101_v50 = vld [vmem:[%s2892_s18 + $0x58] sm:$0xff]  ;;  %v3104_v51 = vld [vmem:[%s2892_s18 + $0xd0] sm:$0xff]  ;;  %v3108_v52 = vld [vmem:[%s2892_s18 + $0x20] sm:$0xff] }
  0x40   : > { %434 = vmatpush.msra.mxu3 %v3015_v30  ;;  %411 = vmatpush.msra.mxu2 %v3034_v35  ;;  %v3111_v53 = vld [vmem:[%s2892_s18 + $0x28] sm:$0xff]  ;;  %v3118_v54 = vld [vmem:[%s2892_s18 + $0x38] sm:$0xff]  ;;  %v3121_v55 = vld [vmem:[%s2892_s18 + $0xb0] sm:$0xff] }
  0x41   : > { %375 = vmatpush.msra.mxu0 %v3022_v32  ;;  %395 = vmatpush.msra.mxu1 %v3025_v33  ;;  %v3125_v56 = vld [vmem:[%s2892_s18] sm:$0xff]  ;;  %v3128_v57 = vld [vmem:[%s2892_s18 + $0x8] sm:$0xff]  ;;  %v3134_v58 = vld [vmem:[%s2892_s18 + $0x18] sm:$0xff] }
  0x42   : > { %435 = vmatpush.msra.mxu3 %v3031_v34  ;;  %412 = vmatpush.msra.mxu2 %v3051_v39  ;;  %4320 = vst [vmem:[#allocation14_spill] sm:$0xff] %v3128_v57  ;;  %v3146_v59 = vld [vmem:[%s2892_s18 + $0x90] sm:$0xff]  ;;  %v450_v61 = vld [vmem:[%s3139_s29] sm:$0xff] }
  0x43   : > { %376 = vmatpush.msra.mxu0 %v3038_v36  ;;  %396 = vmatpush.msra.mxu1 %v3041_v37  ;;  %4321 = vst [vmem:[#allocation15_spill] sm:$0xff] %v3134_v58  ;;  %v3151_v62 = vld [vmem:[%s2892_s18 + $0x70] sm:$0xff] }
  0x44   : > { %436 = vmatpush.msra.mxu3 %v3048_v38  ;;  %413 = vmatpush.msra.mxu2 %v3067_v43  ;;  %v3169_v63 = vld [vmem:[%s2892_s18 + $0x10] sm:$0xff] }
  0x45   : > { %377 = vmatpush.msra.mxu0 %v3055_v40  ;;  %397 = vmatpush.msra.mxu1 %v3058_v41 }
  0x46   : > { %437 = vmatpush.msra.mxu3 %v3064_v42  ;;  %414 = vmatpush.msra.mxu2 %v3088_v47 }
  0x47   : > { %378 = vmatpush.msra.mxu0 %v3071_v44  ;;  %398 = vmatpush.msra.mxu1 %v3074_v45 }
  0x48   : > { %438 = vmatpush.msra.mxu3 %v3085_v46  ;;  %415 = vmatpush.msra.mxu2 %v3104_v51 }
  0x49   : > { %379 = vmatpush.msra.mxu0 %v3092_v48  ;;  %399 = vmatpush.msra.mxu1 %v3095_v49 }
  0x4a   : > { %439 = vmatpush.msra.mxu3 %v3101_v50  ;;  %416 = vmatpush.msra.mxu2 %v3121_v55 }
  0x4b   : > { %380 = vmatpush.msra.mxu0 %v3108_v52  ;;  %400 = vmatpush.msra.mxu1 %v3111_v53 }
  0x4c   : > { %440 = vmatpush.msra.mxu3 %v3118_v54  ;;  %417 = vmatpush.msra.mxu2 %v3146_v59 }
  0x4d   : > { %381 = vmatpush.msra.mxu0 %v3125_v56  ;;  %401 = vmatpush.msra.mxu1 %v3128_v57  ;;  %v3156_v57 = vld [vmem:[%s2892_s18 + $0x50] sm:$0xff] }
  0x4e   : > { %441 = vmatpush.msra.mxu3 %v3134_v58  ;;  %382 = vmatmul.f32.vlgmr.msra.gmra.mxu0 %v2764_v60  ;;  %v3162_v58 = vld [vmem:[%s2892_s18 + $0x30] sm:$0xff] }
  0x4f   : > { %402 = vmatmul.f32.vlgmr.msra.gmra.mxu1 %v2764_v60  ;;  %442 = vmatmul.f32.vlgmr.msra.gmra.mxu3 %v2764_v60 }
  0x50   : > { %517 = vperm.xlu0 %2483, %v450_v61   ;;  %599 = vmatpush.msrb.mxu0 %v2899_v0  ;;  %v2342_v61 = vld [vmem:[%s3139_s29 + $0x8] sm:$0xff] }
  0x51   : > { %418 = vmatpush.msra.mxu2 %v3151_v62  ;;  %619 = vmatpush.msrb.mxu1 %v2902_v1 }
  0x52   : > { %659 = vmatpush.msrb.mxu3 %v2905_v2  ;;  %600 = vmatpush.msrb.mxu0 %v2910_v3 }
  0x53   : > { %419 = vmatpush.msra.mxu2 %v3156_v57  ;;  %620 = vmatpush.msrb.mxu1 %v2913_v4 }
  0x54   : > { %660 = vmatpush.msrb.mxu3 %v2916_v5  ;;  %601 = vmatpush.msrb.mxu0 %v2920_v6 }
  0x55   : > { %420 = vmatpush.msra.mxu2 %v3162_v58  ;;  %621 = vmatpush.msrb.mxu1 %v2923_v7 }
  0x56   : > { %661 = vmatpush.msrb.mxu3 %v2928_v8  ;;  %602 = vmatpush.msrb.mxu0 %v2932_v9  ;;  %v2387_v9 = vld [vmem:[%s3139_s29 + $0x30] sm:$0xff] }
  0x57   : > { %421 = vmatpush.msra.mxu2 %v3169_v63  ;;  %622 = vmatpush.msrb.mxu1 %v2935_v10 }
  0x58   : > { %422 = vmatmul.f32.vlgmr.msra.gmra.mxu2 %v2764_v60  ;;  %751 = vperm.xlu0 %2483, %v2342_v61   ;;  %v4323_v60 = vld [vmem:[#allocation15_spill] sm:$0xff] }
  0x59   : > { %639 = vmatpush.msrb.mxu2 %v2962_v17  ;;  %662 = vmatpush.msrb.mxu3 %v2940_v11 }
  0x5a   : > { %603 = vmatpush.msrb.mxu0 %v2944_v12  ;;  %623 = vmatpush.msrb.mxu1 %v2947_v13 }
  0x5b   : > { %640 = vmatpush.msrb.mxu2 %v2970_v19  ;;  %663 = vmatpush.msrb.mxu3 %v2952_v14 }
  0x5c   : > { %604 = vmatpush.msrb.mxu0 %v2956_v15  ;;  %624 = vmatpush.msrb.mxu1 %v2959_v16 }
  0x5d   : > { %641 = vmatpush.msrb.mxu2 %v2986_v23  ;;  %664 = vmatpush.msrb.mxu3 %v2967_v18 }
  0x5e   : > { %605 = vmatpush.msrb.mxu0 %v2974_v20  ;;  %625 = vmatpush.msrb.mxu1 %v2977_v21 }
  0x5f   : > { %642 = vmatpush.msrb.mxu2 %v3002_v27  ;;  %665 = vmatpush.msrb.mxu3 %v2983_v22 }
  0x60   : > { %1926 = vperm.xlu0 %2483, %v2387_v9   ;;  %606 = vmatpush.msrb.mxu0 %v2990_v24  ;;  %v4322_v9 = vld [vmem:[#allocation14_spill] sm:$0xff] }
  0x61   : > { %643 = vmatpush.msrb.mxu2 %v3018_v31  ;;  %626 = vmatpush.msrb.mxu1 %v2993_v25 }
  0x62   : > { %666 = vmatpush.msrb.mxu3 %v2999_v26  ;;  %607 = vmatpush.msrb.mxu0 %v3006_v28 }
  0x63   : > { %644 = vmatpush.msrb.mxu2 %v3034_v35  ;;  %627 = vmatpush.msrb.mxu1 %v3009_v29 }
  0x64   : > { %667 = vmatpush.msrb.mxu3 %v3015_v30  ;;  %608 = vmatpush.msrb.mxu0 %v3022_v32 }
  0x65   : > { %645 = vmatpush.msrb.mxu2 %v3051_v39  ;;  %628 = vmatpush.msrb.mxu1 %v3025_v33 }
  0x66   : > { %668 = vmatpush.msrb.mxu3 %v3031_v34  ;;  %609 = vmatpush.msrb.mxu0 %v3038_v36 }
  0x67   : > { %646 = vmatpush.msrb.mxu2 %v3067_v43  ;;  %629 = vmatpush.msrb.mxu1 %v3041_v37 }
  0x68   : > { %669 = vmatpush.msrb.mxu3 %v3048_v38  ;;  %610 = vmatpush.msrb.mxu0 %v3055_v40 }
  0x69   : > { %647 = vmatpush.msrb.mxu2 %v3088_v47  ;;  %630 = vmatpush.msrb.mxu1 %v3058_v41 }
  0x6a   : > { %670 = vmatpush.msrb.mxu3 %v3064_v42  ;;  %611 = vmatpush.msrb.mxu0 %v3071_v44 }
  0x6b   : > { %648 = vmatpush.msrb.mxu2 %v3104_v51  ;;  %631 = vmatpush.msrb.mxu1 %v3074_v45 }
  0x6c   : > { %671 = vmatpush.msrb.mxu3 %v3085_v46  ;;  %612 = vmatpush.msrb.mxu0 %v3092_v48 }
  0x6d   : > { %649 = vmatpush.msrb.mxu2 %v3121_v55  ;;  %632 = vmatpush.msrb.mxu1 %v3095_v49 }
  0x6e   : > { %672 = vmatpush.msrb.mxu3 %v3101_v50  ;;  %613 = vmatpush.msrb.mxu0 %v3108_v52 }
  0x6f   : > { %650 = vmatpush.msrb.mxu2 %v3146_v59  ;;  %633 = vmatpush.msrb.mxu1 %v3111_v53 }
  0x70   : > { %673 = vmatpush.msrb.mxu3 %v3118_v54  ;;  %614 = vmatpush.msrb.mxu0 %v3125_v56 }
  0x71   : > { %651 = vmatpush.msrb.mxu2 %v3151_v62  ;;  %634 = vmatpush.msrb.mxu1 %v4322_v9 }
  0x72   : > { %674 = vmatpush.msrb.mxu3 %v4323_v60  ;;  %834 = vmatpush.msra.mxu0 %v2899_v0  ;;  %v4324_v0 = vld [vmem:[#allocation13_spill] sm:$0xff] }
  0x73   : > { %652 = vmatpush.msrb.mxu2 %v3156_v57  ;;  %854 = vmatpush.msra.mxu1 %v2902_v1  ;;  %v4325_v1 = vmov 0  }
  0x74   : > { %894 = vmatpush.msra.mxu3 %v2905_v2  ;;  %835 = vmatpush.msra.mxu0 %v2910_v3  ;;  %v298_v2 = vld [vmem:[%s2884_s0] sm:$0xff]  ;;  %v299_v3 = vld [vmem:[%s2884_s0 + $0x8] sm:$0xff] }
  0x75   : > { %653 = vmatpush.msrb.mxu2 %v3162_v58  ;;  %855 = vmatpush.msra.mxu1 %v2913_v4 }
  0x76   : > { %895 = vmatpush.msra.mxu3 %v2916_v5  ;;  %836 = vmatpush.msra.mxu0 %v2920_v6 }
  0x77   : > { %654 = vmatpush.msrb.mxu2 %v3169_v63  ;;  %856 = vmatpush.msra.mxu1 %v2923_v7 }
  0x78   : > { %896 = vmatpush.msra.mxu3 %v2928_v8  ;;  %837 = vmatpush.msra.mxu0 %v4324_v0 }
  0x79   : > { %874 = vmatpush.msra.mxu2 %v2962_v17  ;;  %857 = vmatpush.msra.mxu1 %v2935_v10 }
  0x7a   : > { %897 = vmatpush.msra.mxu3 %v2940_v11  ;;  %838 = vmatpush.msra.mxu0 %v2944_v12  ;;  %v301_v11 = vld [vmem:[%s2884_s0 + $0x18] sm:$0xff] }
  0x7b   : > { %875 = vmatpush.msra.mxu2 %v2970_v19  ;;  %858 = vmatpush.msra.mxu1 %v2947_v13  ;;  %v300_v19 = vld [vmem:[%s2884_s0 + $0x10] sm:$0xff] }
  0x7c   : > { %898 = vmatpush.msra.mxu3 %v2952_v14  ;;  %839 = vmatpush.msra.mxu0 %v2956_v15 }
  0x7d   : > { %876 = vmatpush.msra.mxu2 %v2986_v23  ;;  %859 = vmatpush.msra.mxu1 %v2959_v16 }
  0x7e   : > { %899 = vmatpush.msra.mxu3 %v2967_v18  ;;  %840 = vmatpush.msra.mxu0 %v2974_v20 }
  0x7f   : > { %877 = vmatpush.msra.mxu2 %v3002_v27  ;;  %860 = vmatpush.msra.mxu1 %v2977_v21 }
  0x80   : > { %900 = vmatpush.msra.mxu3 %v2983_v22  ;;  %841 = vmatpush.msra.mxu0 %v2990_v24 }
  0x81   : > { %878 = vmatpush.msra.mxu2 %v3018_v31  ;;  %861 = vmatpush.msra.mxu1 %v2993_v25 }
  0x82   : > { %901 = vmatpush.msra.mxu3 %v2999_v26  ;;  %842 = vmatpush.msra.mxu0 %v3006_v28 }
  0x83   : > { %879 = vmatpush.msra.mxu2 %v3034_v35  ;;  %862 = vmatpush.msra.mxu1 %v3009_v29 }
  0x84   : > { %902 = vmatpush.msra.mxu3 %v3015_v30  ;;  %843 = vmatpush.msra.mxu0 %v3022_v32 }
  0x85   : > { %880 = vmatpush.msra.mxu2 %v3051_v39  ;;  %863 = vmatpush.msra.mxu1 %v3025_v33 }
  0x86   : > { %903 = vmatpush.msra.mxu3 %v3031_v34  ;;  %844 = vmatpush.msra.mxu0 %v3038_v36 }
  0x87   : > { %881 = vmatpush.msra.mxu2 %v3067_v43  ;;  %864 = vmatpush.msra.mxu1 %v3041_v37 }
  0x88   : > { %904 = vmatpush.msra.mxu3 %v3048_v38  ;;  %845 = vmatpush.msra.mxu0 %v3055_v40 }
  0x89   : > { %882 = vmatpush.msra.mxu2 %v3088_v47  ;;  %865 = vmatpush.msra.mxu1 %v3058_v41 }
  0x8a   : > { %905 = vmatpush.msra.mxu3 %v3064_v42  ;;  %846 = vmatpush.msra.mxu0 %v3071_v44 }
  0x8b   : > { %883 = vmatpush.msra.mxu2 %v3104_v51  ;;  %866 = vmatpush.msra.mxu1 %v3074_v45 }
  0x8c   : > { %906 = vmatpush.msra.mxu3 %v3085_v46  ;;  %847 = vmatpush.msra.mxu0 %v3092_v48 }
  0x8d   : > { %884 = vmatpush.msra.mxu2 %v3121_v55  ;;  %867 = vmatpush.msra.mxu1 %v3095_v49 }
  0x8e   : > { %907 = vmatpush.msra.mxu3 %v3101_v50  ;;  %848 = vmatpush.msra.mxu0 %v3108_v52 }
  0x8f   : > { %885 = vmatpush.msra.mxu2 %v3146_v59  ;;  %868 = vmatpush.msra.mxu1 %v3111_v53 }
  0x90   : > { %908 = vmatpush.msra.mxu3 %v3118_v54  ;;  %849 = vmatpush.msra.mxu0 %v3125_v56 }
  0x91   : > { %886 = vmatpush.msra.mxu2 %v3151_v62  ;;  %869 = vmatpush.msra.mxu1 %v4322_v9  ;;  %v2338_v9 = vld [vmem:[%s2884_s0 + $0x20] sm:$0xff] }
  0x92   : > { %909 = vmatpush.msra.mxu3 %v4323_v60  ;;  %2484 = vset.pattern.permute.xlu1 %v4325_v1  ;;  %v2339_v60 = vld [vmem:[%s2884_s0 + $0x28] sm:$0xff] }
  0x93   : > { %887 = vmatpush.msra.mxu2 %v3156_v57  ;;  %2485 = vset.pattern.permute.xlu2 %v4325_v1 }
  0x95   : > { %888 = vmatpush.msra.mxu2 %v3162_v58 }
  0x97   : > { %889 = vmatpush.msra.mxu2 %v3169_v63 }
  0xc2   : > { %v518_v52 = vpop.permute.xlu0 %517 }
  0xcb   : > { %v383_v4 = vpop.f32.mrf.mxu0 }
  0xcc   : > { %v446_v5 = vadd.f32 %v383_v4, %v298_v2  ;;  %v403_v6 = vpop.f32.mrf.mxu1 }
  0xcd   : > { %v447_v7 = vadd.f32 %v403_v6, %v299_v3  ;;  %v2341_v6 = vld [vmem:[%s2884_s0 + $0x38] sm:$0xff] }
  0xce   : > { %v2335_v8 = vmul.f32 -1.442695, %v446_v5 }
  0xcf   : > { %v2336_v10 = vmul.f32 -1.442695, %v447_v7 }
  0xd0   : > { %2486 = vpow2.f32 %v2335_v8 }
  0xd1   : > { %2488 = vpow2.f32 %v2336_v10 }
  0xd2   : > { %v443_v12 = vpop.f32.mrf.mxu3 }
  0xd3   : > { %v449_v13 = vadd.f32 %v443_v12, %v301_v11 }
  0xd5   : > { %v2337_v14 = vmul.f32 -1.442695, %v449_v13 }
  0xd6   : > { %v2487_v15 = vpop.eup %2486 }
  0xd7   : > { %v2489_v16 = vpop.eup %2488  ;;  %v454_v17 = vadd.f32 1.0, %v2487_v15  ;;  %2490 = vpow2.f32 %v2337_v14  ;;  %v2340_v15 = vld [vmem:[%s2884_s0 + $0x30] sm:$0xff] }
  0xd8   : > { %v473_v18 = vadd.f32 1.0, %v2489_v16 }
  0xd9   : > { %2492 = vrcp.f32 %v454_v17  ;;  %v466_v30 = vand.u32 2147483648, %v454_v17  ;;  %v464_v32 = vand.u32 2147483647, %v454_v17  ;;  %vm460_vm2 = vweird.f32 %v454_v17 }
  0xda   : > { %2494 = vrcp.f32 %v473_v18  ;;  %v485_v33 = vand.u32 2147483648, %v473_v18  ;;  %v483_v35 = vand.u32 2147483647, %v473_v18  ;;  %vm479_vm4 = vweird.f32 %v473_v18 }
  0xdb   : > { %v423_v20 = vpop.f32.mrf.mxu2  ;;  %v467_v40 = vor.u32 1.1754944e-38, %v466_v30  ;;  %vm465_vm5 = vcmp.eq.f32.partialorder %v464_v32, 8.507059e+37 }
  0xdc   : > { %v448_v22 = vadd.f32 %v423_v20, %v300_v19  ;;  %v486_v43 = vor.u32 1.1754944e-38, %v485_v33  ;;  %vm484_vm7 = vcmp.eq.f32.partialorder %v483_v35, 8.507059e+37  ;;  %v2360_v33 = vld [vmem:[%s3139_s29 + $0x18] sm:$0xff] }
  0xdd   : > { %v2491_v21 = vpop.eup %2490 }
  0xde   : > { %v493_v23 = vadd.f32 1.0, %v2491_v21  ;;  %v2351_v21 = vld [vmem:[%s3139_s29 + $0x10] sm:$0xff] }
  0xdf   : > { %v2493_v24 = vpop.eup %2492  ;;  %986 = vperm.xlu1 %2484, %v2351_v21   ;;  %v3415_v21 = vld [vmem:[%s2892_s18 + $0x178] sm:$0xff] }
  0xe0   : > { %v2495_v25 = vpop.eup %2494  ;;  %v456_v26 = vmul.f32 %v2493_v24, %v454_v17  ;;  %2496 = vrcp.f32 %v493_v23  ;;  %vm461_vm0 = vweird.f32 %v2493_v24  ;;  %v505_v54 = vand.u32 2147483648, %v493_v23 }
  0xe1   : > { %v475_v27 = vmul.f32 %v2495_v25, %v473_v18  ;;  %2498 = vtanh.f32 %v448_v22  ;;  %vm480_vm1 = vweird.f32 %v2495_v25  ;;  %vm462_vm3 = vmor %vm460_vm2, %vm461_vm0  ;;  %vm499_vm9 = vweird.f32 %v493_v23 }
  0xe2   : > { %v457_v28 = vsub.f32 1.0, %v456_v26  ;;  %vm481_vm6 = vmor %vm479_vm4, %vm480_vm1  ;;  %v503_v56 = vand.u32 2147483647, %v493_v23  ;;  %v506_v58 = vor.u32 1.1754944e-38, %v505_v54  ;;  %v752_v54 = vpop.permute.xlu0 %751 }
  0xe3   : > { %v476_v29 = vsub.f32 1.0, %v475_v27 }
  0xe4   : > { %v458_v31 = vmul.f32 %v2493_v24, %v457_v28  ;;  %vm504_vm11 = vcmp.eq.f32.partialorder %v503_v56, 8.507059e+37 }
  0xe5   : > { %v477_v34 = vmul.f32 %v2495_v25, %v476_v29 }
  0xe6   : > { %v2497_v36 = vpop.eup %2496  ;;  %v459_v37 = vadd.f32 %v2493_v24, %v458_v31 }
  0xe7   : > { %v2499_v38 = vpop.eup %2498  ;;  %v495_v39 = vmul.f32 %v2497_v36, %v493_v23  ;;  %v478_v41 = vadd.f32 %v2495_v25, %v477_v34  ;;  %vm500_vm8 = vweird.f32 %v2497_v36  ;;  %1221 = vperm.xlu1 %2484, %v2360_v33  }
  0xe8   : > { %v463_v42 = vsel %vm462_vm3, %v2493_v24, %v459_v37  ;;  %vm501_vm10 = vmor %vm499_vm9, %vm500_vm8 }
  0xe9   : > { %v468_v44 = vsel %vm465_vm5, %v467_v40, %v463_v42  ;;  %v482_v45 = vsel %vm481_vm6, %v2495_v25, %v478_v41  ;;  %v496_v46 = vsub.f32 1.0, %v495_v39 }
  0xea   : > { %v487_v47 = vsel %vm484_vm7, %v486_v43, %v482_v45  ;;  %v510_v48 = vmul.f32 %v2499_v38, %v468_v44 }
  0xeb   : > { %v497_v49 = vmul.f32 %v2497_v36, %v496_v46  ;;  %v509_v50 = vmul.f32 0.0, %v487_v47 }
  0xed   : > { %v511_v51 = vadd.f32 %v510_v48, %v509_v50  ;;  %v498_v53 = vadd.f32 %v2497_v36, %v497_v49  ;;  %v2396_v50 = vld [vmem:[%s3139_s29 + $0x38] sm:$0xff] }
  0xef   : > { %2500 = vtanh.f32 %v511_v51  ;;  %v3304_v55 = vmul.f32 %v518_v52, %v511_v51  ;;  %v502_v57 = vsel %vm501_vm10, %v2497_v36, %v498_v53  ;;  %2161 = vperm.xlu1 %2484, %v2396_v50  }
  0xf0   : > { %v507_v62 = vsel %vm504_vm11, %v506_v58, %v502_v57 }
  0xf5   : > { %v2501_v59 = vpop.eup %2500 }
  0xf6   : > { %v513_v63 = vmul.f32 %v2501_v59, %v507_v62 }
  0xf8   : > { %v3307_v61 = vmul.f32 %v518_v52, %v513_v63 }
  0xfa   : > { %527 = vst [vmem:[%s3309_s22] sm:$0xff] %v3307_v61  ;;  %615 = vmatmul.f32.vlgmr.msrb.gmra.mxu0 %v3307_v61  ;;  %635 = vmatmul.f32.vlgmr.msrb.gmra.mxu1 %v3307_v61 }
  0xfb   : > { %655 = vmatmul.f32.vlgmr.msrb.gmra.mxu2 %v3307_v61  ;;  %675 = vmatmul.f32.vlgmr.msrb.gmra.mxu3 %v3307_v61 }
 0x177   : > { %v616_v0 = vpop.f32.mrf.mxu0  ;;  %v636_v1 = vpop.f32.mrf.mxu1 }
 0x178   : > { %v679_v2 = vadd.f32 %v2338_v9, %v616_v0  ;;  %v680_v3 = vadd.f32 %v2339_v60, %v636_v1 }
 0x17a   : > { %v2343_v4 = vmul.f32 -1.442695, %v679_v2  ;;  %v2344_v5 = vmul.f32 -1.442695, %v680_v3  ;;  %v3343_v3 = vld [vmem:[%s2892_s18 + $0x1e8] sm:$0xff] }
 0x17b   : > { %4327 = vst [vmem:[#allocation15_spill] sm:$0xff] %v3343_v3  ;;  %1089 = vmatpush.msrb.mxu1 %v3343_v3 }
 0x17c   : > { %2502 = vpow2.f32 %v2343_v4  ;;  %v3351_v4 = vld [vmem:[%s2892_s18 + $0x1f8] sm:$0xff] }
 0x17d   : > { %2504 = vpow2.f32 %v2344_v5  ;;  %1129 = vmatpush.msrb.mxu3 %v3351_v4  ;;  %v3356_v5 = vld [vmem:[%s2892_s18 + $0x1c0] sm:$0xff] }
 0x17e   : > { %v676_v7 = vpop.f32.mrf.mxu3  ;;  %v656_v16 = vpop.f32.mrf.mxu2 }
 0x17f   : > { %v682_v8 = vadd.f32 %v2341_v6, %v676_v7  ;;  %v681_v20 = vadd.f32 %v2340_v15, %v656_v16  ;;  %v3359_v6 = vld [vmem:[%s2892_s18 + $0x1c8] sm:$0xff]  ;;  %v3362_v7 = vld [vmem:[%s2892_s18 + $0x1d0] sm:$0xff] }
 0x180   : > { %1090 = vmatpush.msrb.mxu1 %v3359_v6  ;;  %v3391_v15 = vld [vmem:[%s2892_s18 + $0x188] sm:$0xff]  ;;  %v3394_v16 = vld [vmem:[%s2892_s18 + $0x190] sm:$0xff] }
 0x181   : > { %v2345_v10 = vmul.f32 -1.442695, %v682_v8  ;;  %v3367_v8 = vld [vmem:[%s2892_s18 + $0x1d8] sm:$0xff]  ;;  %4333 = vst [vmem:[#allocation20_spill] sm:$0xff] %v3391_v15 }
 0x182   : > { %v2503_v11 = vpop.eup %2502  ;;  %1130 = vmatpush.msrb.mxu3 %v3367_v8 }
 0x183   : > { %v2505_v12 = vpop.eup %2504  ;;  %v688_v13 = vadd.f32 1.0, %v2503_v11  ;;  %2506 = vpow2.f32 %v2345_v10  ;;  %v3372_v10 = vld [vmem:[%s2892_s18 + $0x1a0] sm:$0xff]  ;;  %v3375_v11 = vld [vmem:[%s2892_s18 + $0x1a8] sm:$0xff] }
 0x184   : > { %v707_v14 = vadd.f32 1.0, %v2505_v12  ;;  %4329 = vst [vmem:[#allocation16_spill] sm:$0xff] %v3372_v10  ;;  %v3378_v12 = vld [vmem:[%s2892_s18 + $0x1b0] sm:$0xff]  ;;  %1091 = vmatpush.msrb.mxu1 %v3375_v11 }
 0x185   : > { %2508 = vrcp.f32 %v688_v13  ;;  %v700_v27 = vand.u32 2147483648, %v688_v13  ;;  %v698_v30 = vand.u32 2147483647, %v688_v13  ;;  %vm694_vm14 = vweird.f32 %v688_v13  ;;  %4330 = vst [vmem:[#allocation17_spill] sm:$0xff] %v3375_v11 }
 0x186   : > { %2510 = vrcp.f32 %v707_v14  ;;  %v719_v28 = vand.u32 2147483648, %v707_v14  ;;  %v717_v32 = vand.u32 2147483647, %v707_v14  ;;  %vm713_vm15 = vweird.f32 %v707_v14  ;;  %1092 = vmatpush.msrb.mxu1 %v3391_v15 }
 0x187   : > { %v701_v36 = vor.u32 1.1754944e-38, %v700_v27  ;;  %vm699_vm2 = vcmp.eq.f32.partialorder %v698_v30, 8.507059e+37  ;;  %v3433_v27 = vld [vmem:[%s2892_s18 + $0x158] sm:$0xff]  ;;  %v3438_v30 = vld [vmem:[%s2892_s18 + $0x120] sm:$0xff] }
 0x188   : > { %v720_v39 = vor.u32 1.1754944e-38, %v719_v28  ;;  %vm718_vm3 = vcmp.eq.f32.partialorder %v717_v32, 8.507059e+37  ;;  %v3444_v32 = vld [vmem:[%s2892_s18 + $0x130] sm:$0xff] }
 0x189   : > { %v2507_v17 = vpop.eup %2506 }
 0x18a   : > { %v727_v18 = vadd.f32 1.0, %v2507_v17  ;;  %v3399_v17 = vld [vmem:[%s2892_s18 + $0x198] sm:$0xff] }
 0x18b   : > { %v2509_v19 = vpop.eup %2508 }
 0x18c   : > { %v2511_v22 = vpop.eup %2510  ;;  %v690_v23 = vmul.f32 %v2509_v19, %v688_v13  ;;  %2512 = vrcp.f32 %v727_v18  ;;  %vm695_vm12 = vweird.f32 %v2509_v19  ;;  %v739_v53 = vand.u32 2147483648, %v727_v18  ;;  %v3383_v13 = vld [vmem:[%s2892_s18 + $0x1b8] sm:$0xff] }
 0x18d   : > { %v709_v24 = vmul.f32 %v2511_v22, %v707_v14  ;;  %2514 = vtanh.f32 %v681_v20  ;;  %vm714_vm13 = vweird.f32 %v2511_v22  ;;  %vm696_vm0 = vmor %vm694_vm14, %vm695_vm12  ;;  %vm733_vm5 = vweird.f32 %v727_v18  ;;  %4331 = vst [vmem:[#allocation18_spill] sm:$0xff] %v3383_v13  ;;  %1131 = vmatpush.msrb.mxu3 %v3383_v13  ;;  %v3388_v14 = vld [vmem:[%s2892_s18 + $0x180] sm:$0xff]  ;;  %v3410_v20 = vld [vmem:[%s2892_s18 + $0x170] sm:$0xff] }
 0x18e   : > { %v691_v25 = vsub.f32 1.0, %v690_v23  ;;  %vm715_vm1 = vmor %vm713_vm15, %vm714_vm13  ;;  %v737_v56 = vand.u32 2147483647, %v727_v18  ;;  %v740_v59 = vor.u32 1.1754944e-38, %v739_v53  ;;  %4332 = vst [vmem:[#allocation19_spill] sm:$0xff] %v3388_v14  ;;  %v2348_v23 = vld [vmem:[%s2884_s0 + $0x48] sm:$0xff] }
 0x18f   : > { %v710_v26 = vsub.f32 1.0, %v709_v24  ;;  %1132 = vmatpush.msrb.mxu3 %v3399_v17  ;;  %v3422_v24 = vld [vmem:[%s2892_s18 + $0x140] sm:$0xff] }
 0x190   : > { %v692_v29 = vmul.f32 %v2509_v19, %v691_v25  ;;  %vm738_vm7 = vcmp.eq.f32.partialorder %v737_v56, 8.507059e+37  ;;  %v3425_v25 = vld [vmem:[%s2892_s18 + $0x148] sm:$0xff]  ;;  %v3503_v53 = vld [vmem:[%s2892_s18 + $0xa0] sm:$0xff]  ;;  %v3509_v56 = vld [vmem:[%s2892_s18 + $0xb0] sm:$0xff] }
 0x191   : > { %v711_v31 = vmul.f32 %v2511_v22, %v710_v26  ;;  %1133 = vmatpush.msrb.mxu3 %v3415_v21  ;;  %v3428_v26 = vld [vmem:[%s2892_s18 + $0x150] sm:$0xff] }
 0x192   : > { %v2513_v34 = vpop.eup %2512  ;;  %v693_v35 = vadd.f32 %v2509_v19, %v692_v29 }
 0x193   : > { %v712_v37 = vadd.f32 %v2511_v22, %v711_v31  ;;  %v729_v38 = vmul.f32 %v2513_v34, %v727_v18  ;;  %v2515_v41 = vpop.eup %2514  ;;  %vm734_vm4 = vweird.f32 %v2513_v34  ;;  %v3404_v18 = vld [vmem:[%s2892_s18 + $0x160] sm:$0xff]  ;;  %1134 = vmatpush.msrb.mxu3 %v3433_v27  ;;  %v3441_v31 = vld [vmem:[%s2892_s18 + $0x128] sm:$0xff] }
 0x194   : > { %v697_v40 = vsel %vm696_vm0, %v2509_v19, %v693_v35  ;;  %vm735_vm6 = vmor %vm733_vm5, %vm734_vm4  ;;  %v3407_v19 = vld [vmem:[%s2892_s18 + $0x168] sm:$0xff]  ;;  %v3449_v35 = vld [vmem:[%s2892_s18 + $0x138] sm:$0xff] }
 0x195   : > { %v702_v42 = vsel %vm699_vm2, %v701_v36, %v697_v40  ;;  %v716_v43 = vsel %vm715_vm1, %v2511_v22, %v712_v37  ;;  %v730_v44 = vsub.f32 1.0, %v729_v38  ;;  %1093 = vmatpush.msrb.mxu1 %v3407_v19  ;;  %v2347_v22 = vld [vmem:[%s2884_s0 + $0x40] sm:$0xff]  ;;  %1135 = vmatpush.msrb.mxu3 %v3449_v35  ;;  %v3457_v37 = vld [vmem:[%s2892_s18 + $0x108] sm:$0xff]  ;;  %v3460_v38 = vld [vmem:[%s2892_s18 + $0x110] sm:$0xff] }
 0x196   : > { %v721_v45 = vsel %vm718_vm3, %v720_v39, %v716_v43  ;;  %v744_v46 = vmul.f32 %v2515_v41, %v702_v42  ;;  %v3454_v36 = vld [vmem:[%s2892_s18 + $0x100] sm:$0xff]  ;;  %v3465_v41 = vld [vmem:[%s2892_s18 + $0x118] sm:$0xff]  ;;  %v3473_v43 = vld [vmem:[%s2892_s18 + $0xe8] sm:$0xff] }
 0x197   : > { %v743_v47 = vmul.f32 %v721_v45, %v3304_v55  ;;  %v731_v48 = vmul.f32 %v2513_v34, %v730_v44  ;;  %1094 = vmatpush.msrb.mxu1 %v3425_v25  ;;  %1136 = vmatpush.msrb.mxu3 %v3465_v41  ;;  %v3470_v42 = vld [vmem:[%s2892_s18 + $0xe0] sm:$0xff]  ;;  %v3476_v44 = vld [vmem:[%s2892_s18 + $0xf0] sm:$0xff]  ;;  %v2350_v45 = vld [vmem:[%s2884_s0 + $0x58] sm:$0xff] }
 0x199   : > { %v745_v49 = vadd.f32 %v744_v46, %v743_v47  ;;  %v732_v51 = vadd.f32 %v2513_v34, %v731_v48  ;;  %1095 = vmatpush.msrb.mxu1 %v3441_v31  ;;  %v3482_v46 = vld [vmem:[%s2892_s18 + $0xf8] sm:$0xff]  ;;  %v3487_v47 = vld [vmem:[%s2892_s18 + $0xc0] sm:$0xff]  ;;  %v3490_v48 = vld [vmem:[%s2892_s18 + $0xc8] sm:$0xff] }
 0x19a   : > { %1137 = vmatpush.msrb.mxu3 %v3482_v46 }
 0x19b   : > { %2516 = vtanh.f32 %v745_v49  ;;  %v756_v52 = vsub.f32 %v745_v49, %v3304_v55  ;;  %v736_v58 = vsel %vm735_vm6, %v2513_v34, %v732_v51  ;;  %1096 = vmatpush.msrb.mxu1 %v3457_v37  ;;  %v3493_v49 = vld [vmem:[%s2892_s18 + $0xd0] sm:$0xff]  ;;  %v3498_v51 = vld [vmem:[%s2892_s18 + $0xd8] sm:$0xff] }
 0x19c   : > { %v741_v9 = vsel %vm738_vm7, %v740_v59, %v736_v58  ;;  %1138 = vmatpush.msrb.mxu3 %v3498_v51  ;;  %v3519_v59 = vld [vmem:[%s2892_s18 + $0x80] sm:$0xff] }
 0x19d   : > { %v757_v57 = vmul.f32 %v756_v52, %v752_v54  ;;  %1097 = vmatpush.msrb.mxu1 %v3473_v43 }
 0x19f   : > { %v3327_v62 = vadd.f32 %v757_v57, %v3304_v55  ;;  %v3340_v55 = vld [vmem:[%s2892_s18 + $0x1e0] sm:$0xff]  ;;  %1098 = vmatpush.msrb.mxu1 %v3490_v48  ;;  %v3514_v57 = vld [vmem:[%s2892_s18 + $0xb8] sm:$0xff] }
 0x1a0   : > { %4326 = vst [vmem:[#allocation14_spill] sm:$0xff] %v3340_v55  ;;  %1069 = vmatpush.msrb.mxu0 %v3340_v55  ;;  %1139 = vmatpush.msrb.mxu3 %v3514_v57 }
 0x1a1   : > { %v2517_v63 = vpop.eup %2516 }
 0x1a2   : > { %v747_v60 = vmul.f32 %v2517_v63, %v741_v9  ;;  %1070 = vmatpush.msrb.mxu0 %v3356_v5  ;;  %v3522_v63 = vld [vmem:[%s2892_s18 + $0x88] sm:$0xff]  ;;  %v3525_v9 = vld [vmem:[%s2892_s18 + $0x90] sm:$0xff] }
 0x1a4   : > { %v748_v0 = vsub.f32 %v747_v60, %v3307_v61  ;;  %1071 = vmatpush.msrb.mxu0 %v3372_v10 }
 0x1a6   : > { %v754_v1 = vmul.f32 %v752_v54, %v748_v0  ;;  %1072 = vmatpush.msrb.mxu0 %v3388_v14  ;;  %v3506_v54 = vld [vmem:[%s2892_s18 + $0xa8] sm:$0xff]  ;;  %v3530_v0 = vld [vmem:[%s2892_s18 + $0x98] sm:$0xff] }
 0x1a7   : > { %1099 = vmatpush.msrb.mxu1 %v3506_v54  ;;  %1140 = vmatpush.msrb.mxu3 %v3530_v0 }
 0x1a8   : > { %v3331_v2 = vadd.f32 %v754_v1, %v3307_v61  ;;  %v3346_v61 = vld [vmem:[%s2892_s18 + $0x1f0] sm:$0xff]  ;;  %1073 = vmatpush.msrb.mxu0 %v3404_v18 }
 0x1a9   : > { %4328 = vst [vmem:[#allocation13_spill] sm:$0xff] %v3346_v61  ;;  %1109 = vmatpush.msrb.mxu2 %v3346_v61  ;;  %1100 = vmatpush.msrb.mxu1 %v3522_v63 }
 0x1aa   : > { %850 = vmatmul.f32.vlgmr.msra.gmra.mxu0 %v3331_v2  ;;  %2346 = vst [vmem:[%s3309_s22 + $0x8] sm:$0xff] %v3331_v2  ;;  %870 = vmatmul.f32.vlgmr.msra.gmra.mxu1 %v3331_v2 }
 0x1ab   : > { %890 = vmatmul.f32.vlgmr.msra.gmra.mxu2 %v3331_v2  ;;  %910 = vmatmul.f32.vlgmr.msra.gmra.mxu3 %v3331_v2 }
 0x1ac   : > { %1110 = vmatpush.msrb.mxu2 %v3362_v7  ;;  %1074 = vmatpush.msrb.mxu0 %v3422_v24 }
 0x1ae   : > { %1111 = vmatpush.msrb.mxu2 %v3378_v12  ;;  %1075 = vmatpush.msrb.mxu0 %v3438_v30 }
 0x1b0   : > { %1112 = vmatpush.msrb.mxu2 %v3394_v16  ;;  %1076 = vmatpush.msrb.mxu0 %v3454_v36 }
 0x1b2   : > { %1113 = vmatpush.msrb.mxu2 %v3410_v20  ;;  %1077 = vmatpush.msrb.mxu0 %v3470_v42 }
 0x1b4   : > { %1114 = vmatpush.msrb.mxu2 %v3428_v26  ;;  %1078 = vmatpush.msrb.mxu0 %v3487_v47 }
 0x1b6   : > { %1115 = vmatpush.msrb.mxu2 %v3444_v32  ;;  %1079 = vmatpush.msrb.mxu0 %v3503_v53 }
 0x1b8   : > { %1116 = vmatpush.msrb.mxu2 %v3460_v38  ;;  %1080 = vmatpush.msrb.mxu0 %v3519_v59 }
 0x1ba   : > { %1117 = vmatpush.msrb.mxu2 %v3476_v44 }
 0x1bc   : > { %1118 = vmatpush.msrb.mxu2 %v3493_v49 }
 0x1be   : > { %1119 = vmatpush.msrb.mxu2 %v3509_v56 }
 0x1c0   : > { %1120 = vmatpush.msrb.mxu2 %v3525_v9 }
 0x227   : > { %v851_v28 = vpop.f32.mrf.mxu0  ;;  %v871_v29 = vpop.f32.mrf.mxu1 }
 0x228   : > { %v914_v33 = vadd.f32 %v2347_v22, %v851_v28  ;;  %v915_v34 = vadd.f32 %v2348_v23, %v871_v29  ;;  %v3537_v23 = vld [vmem:[%s2892_s18 + $0x60] sm:$0xff]  ;;  %v3540_v28 = vld [vmem:[%s2892_s18 + $0x68] sm:$0xff]  ;;  %v3543_v29 = vld [vmem:[%s2892_s18 + $0x70] sm:$0xff] }
 0x229   : > { %4334 = vst [vmem:[#allocation21_spill] sm:$0xff] %v3537_v23  ;;  %1081 = vmatpush.msrb.mxu0 %v3537_v23  ;;  %1101 = vmatpush.msrb.mxu1 %v3540_v28 }
 0x22a   : > { %v2352_v39 = vmul.f32 -1.442695, %v914_v33  ;;  %v2353_v40 = vmul.f32 -1.442695, %v915_v34  ;;  %4335 = vst [vmem:[#allocation22_spill] sm:$0xff] %v3540_v28  ;;  %v3550_v34 = vld [vmem:[%s2892_s18 + $0x78] sm:$0xff]  ;;  %1121 = vmatpush.msrb.mxu2 %v3543_v29 }
 0x22b   : > { %4336 = vst [vmem:[#allocation23_spill] sm:$0xff] %v3543_v29  ;;  %1141 = vmatpush.msrb.mxu3 %v3550_v34  ;;  %v3596_v29 = vld [vmem:[%s2892_s18 + $0x10] sm:$0xff] }
 0x22c   : > { %2518 = vpow2.f32 %v2352_v39  ;;  %4337 = vst [vmem:[#allocation24_spill] sm:$0xff] %v3550_v34  ;;  %v3556_v39 = vld [vmem:[%s2892_s18 + $0x40] sm:$0xff] }
 0x22d   : > { %2520 = vpow2.f32 %v2353_v40  ;;  %4338 = vst [vmem:[#allocation25_spill] sm:$0xff] %v3556_v39  ;;  %v3559_v40 = vld [vmem:[%s2892_s18 + $0x48] sm:$0xff]  ;;  %1082 = vmatpush.msrb.mxu0 %v3556_v39 }
 0x22e   : > { %v911_v50 = vpop.f32.mrf.mxu3  ;;  %4339 = vst [vmem:[#allocation26_spill] sm:$0xff] %v3559_v40  ;;  %1102 = vmatpush.msrb.mxu1 %v3559_v40  ;;  %v891_v39 = vpop.f32.mrf.mxu2  ;;  %v3585_v40 = vld [vmem:[%s2892_s18 + $0x38] sm:$0xff] }
 0x22f   : > { %v917_v52 = vadd.f32 %v2350_v45, %v911_v50  ;;  %v3562_v45 = vld [vmem:[%s2892_s18 + $0x50] sm:$0xff]  ;;  %v3568_v50 = vld [vmem:[%s2892_s18 + $0x58] sm:$0xff]  ;;  %4345 = vst [vmem:[#allocation32_spill] sm:$0xff] %v3585_v40 }
 0x230   : > { %4340 = vst [vmem:[#allocation27_spill] sm:$0xff] %v3562_v45  ;;  %1122 = vmatpush.msrb.mxu2 %v3562_v45  ;;  %1142 = vmatpush.msrb.mxu3 %v3568_v50  ;;  %v3593_v45 = vld [vmem:[%s2892_s18 + $0x8] sm:$0xff] }
 0x231   : > { %v2354_v58 = vmul.f32 -1.442695, %v917_v52  ;;  %4341 = vst [vmem:[#allocation28_spill] sm:$0xff] %v3568_v50  ;;  %v3573_v52 = vld [vmem:[%s2892_s18 + $0x20] sm:$0xff] }
 0x232   : > { %v2519_v60 = vpop.eup %2518  ;;  %4342 = vst [vmem:[#allocation29_spill] sm:$0xff] %v3573_v52  ;;  %1083 = vmatpush.msrb.mxu0 %v3573_v52  ;;  %1143 = vmatpush.msrb.mxu3 %v3585_v40  ;;  %v3590_v50 = vld [vmem:[%s2892_s18] sm:$0xff] }
 0x233   : > { %v2521_v1 = vpop.eup %2520  ;;  %v3532_v22 = vadd.f32 1.0, %v2519_v60  ;;  %2522 = vpow2.f32 %v2354_v58  ;;  %v3576_v58 = vld [vmem:[%s2892_s18 + $0x28] sm:$0xff]  ;;  %v3579_v60 = vld [vmem:[%s2892_s18 + $0x30] sm:$0xff] }
 0x234   : > { %v3545_v33 = vadd.f32 1.0, %v2521_v1  ;;  %4343 = vst [vmem:[#allocation30_spill] sm:$0xff] %v3576_v58  ;;  %v2349_v1 = vld [vmem:[%s2884_s0 + $0x50] sm:$0xff]  ;;  %1103 = vmatpush.msrb.mxu1 %v3576_v58  ;;  %1123 = vmatpush.msrb.mxu2 %v3579_v60  ;;  %v3603_v58 = vld [vmem:[%s2892_s18 + $0x18] sm:$0xff] }
 0x235   : > { %2524 = vrcp.f32 %v3532_v22  ;;  %4344 = vst [vmem:[#allocation31_spill] sm:$0xff] %v3579_v60  ;;  %1084 = vmatpush.msrb.mxu0 %v3590_v50  ;;  %v916_v23 = vadd.f32 %v2349_v1, %v891_v39  ;;  %1144 = vmatpush.msrb.mxu3 %v3603_v58  ;;  %vm929_vm10 = vweird.f32 %v3532_v22 }
 0x236   : > { %2526 = vrcp.f32 %v3545_v33  ;;  %1104 = vmatpush.msrb.mxu1 %v3593_v45  ;;  %4346 = vst [vmem:[#allocation33_spill] sm:$0xff] %v3603_v58  ;;  %1124 = vmatpush.msrb.mxu2 %v3596_v29  ;;  %v935_v58 = vand.u32 2147483648, %v3532_v22  ;;  %vm948_vm12 = vweird.f32 %v3545_v33 }
 0x237   : > { %1304 = vmatpush.msra.mxu0 %v3340_v55  ;;  %1364 = vmatpush.msra.mxu3 %v3351_v4  ;;  %v933_v55 = vand.u32 2147483647, %v3532_v22 }
 0x238   : > { %1324 = vmatpush.msra.mxu1 %v3343_v3  ;;  %1344 = vmatpush.msra.mxu2 %v3346_v61  ;;  %v954_v61 = vand.u32 2147483648, %v3545_v33 }
 0x239   : > { %v2523_v34 = vpop.eup %2522  ;;  %1305 = vmatpush.msra.mxu0 %v3356_v5  ;;  %1365 = vmatpush.msra.mxu3 %v3367_v8  ;;  %vm934_vm13 = vcmp.eq.f32.partialorder %v933_v55, 8.507059e+37 }
 0x23a   : > { %v3598_v28 = vadd.f32 1.0, %v2523_v34  ;;  %1325 = vmatpush.msra.mxu1 %v3359_v6  ;;  %1345 = vmatpush.msra.mxu2 %v3362_v7 }
 0x23b   : > { %v2525_v52 = vpop.eup %2524  ;;  %1306 = vmatpush.msra.mxu0 %v3372_v10  ;;  %1366 = vmatpush.msra.mxu3 %v3383_v13 }
 0x23c   : > { %v2527_v40 = vpop.eup %2526  ;;  %v925_v60 = vmul.f32 %v2525_v52, %v3532_v22  ;;  %2528 = vrcp.f32 %v3598_v28  ;;  %vm930_vm8 = vweird.f32 %v2525_v52  ;;  %1326 = vmatpush.msra.mxu1 %v3375_v11  ;;  %1346 = vmatpush.msra.mxu2 %v3378_v12  ;;  %v955_v22 = vor.u32 1.1754944e-38, %v954_v61 }
 0x23d   : > { %v944_v34 = vmul.f32 %v2527_v40, %v3545_v33  ;;  %2530 = vtanh.f32 %v916_v23  ;;  %vm949_vm9 = vweird.f32 %v2527_v40  ;;  %v952_v23 = vand.u32 2147483647, %v3545_v33  ;;  %1307 = vmatpush.msra.mxu0 %v3388_v14  ;;  %vm931_vm11 = vmor %vm929_vm10, %vm930_vm8  ;;  %1367 = vmatpush.msra.mxu3 %v3399_v17 }
 0x23e   : > { %v926_v39 = vsub.f32 1.0, %v925_v60  ;;  %1327 = vmatpush.msra.mxu1 %v3391_v15  ;;  %1347 = vmatpush.msra.mxu2 %v3394_v16  ;;  %vm950_vm14 = vmor %vm948_vm12, %vm949_vm9  ;;  %vm968_vm1 = vweird.f32 %v3598_v28 }
 0x23f   : > { %v945_v1 = vsub.f32 1.0, %v944_v34  ;;  %1308 = vmatpush.msra.mxu0 %v3404_v18  ;;  %vm953_vm15 = vcmp.eq.f32.partialorder %v952_v23, 8.507059e+37  ;;  %1368 = vmatpush.msra.mxu3 %v3415_v21 }
 0x240   : > { %v927_v3 = vmul.f32 %v2525_v52, %v926_v39  ;;  %1328 = vmatpush.msra.mxu1 %v3407_v19  ;;  %1348 = vmatpush.msra.mxu2 %v3410_v20 }
 0x241   : > { %v946_v60 = vmul.f32 %v2527_v40, %v945_v1  ;;  %v936_v1 = vor.u32 1.1754944e-38, %v935_v58  ;;  %1309 = vmatpush.msra.mxu0 %v3422_v24  ;;  %1369 = vmatpush.msra.mxu3 %v3433_v27 }
 0x242   : > { %v3626_v34 = vpop.eup %2528  ;;  %v928_v39 = vadd.f32 %v2525_v52, %v927_v3  ;;  %1329 = vmatpush.msra.mxu1 %v3425_v25  ;;  %1349 = vmatpush.msra.mxu2 %v3428_v26 }
 0x243   : > { %v964_v11 = vmul.f32 %v3626_v34, %v3598_v28  ;;  %v947_v10 = vadd.f32 %v2527_v40, %v946_v60  ;;  %v2531_v15 = vpop.eup %2530  ;;  %1310 = vmatpush.msra.mxu0 %v3438_v30  ;;  %1370 = vmatpush.msra.mxu3 %v3449_v35  ;;  %vm969_vm0 = vweird.f32 %v3626_v34 }
 0x244   : > { %v932_v3 = vsel %vm931_vm11, %v2525_v52, %v928_v39  ;;  %1330 = vmatpush.msra.mxu1 %v3441_v31  ;;  %1350 = vmatpush.msra.mxu2 %v3444_v32  ;;  %vm3664_vm2 = vmor %vm968_vm1, %vm969_vm0  ;;  %v4357_v52 = vld [vmem:[#allocation29_spill] sm:$0xff] }
 0x245   : > { %v965_v14 = vsub.f32 1.0, %v964_v11  ;;  %v937_v13 = vsel %vm934_vm13, %v936_v1, %v932_v3  ;;  %v951_v58 = vsel %vm950_vm14, %v2527_v40, %v947_v10  ;;  %1311 = vmatpush.msra.mxu0 %v3454_v36  ;;  %1371 = vmatpush.msra.mxu3 %v3465_v41  ;;  %v972_v40 = vand.u32 2147483647, %v3598_v28 }
 0x246   : > { %v956_v33 = vsel %vm953_vm15, %v955_v22, %v951_v58  ;;  %v979_v60 = vmul.f32 %v2531_v15, %v937_v13  ;;  %1331 = vmatpush.msra.mxu1 %v3457_v37  ;;  %v974_v13 = vand.u32 2147483648, %v3598_v28  ;;  %1351 = vmatpush.msra.mxu2 %v3460_v38  ;;  %v987_v15 = vpop.permute.xlu1 %986  ;;  %v4349_v58 = vld [vmem:[#allocation21_spill] sm:$0xff] }
 0x247   : > { %v966_v55 = vmul.f32 %v3626_v34, %v965_v14  ;;  %v978_v61 = vmul.f32 %v956_v33, %v3327_v62  ;;  %1312 = vmatpush.msra.mxu0 %v3470_v42  ;;  %1372 = vmatpush.msra.mxu3 %v3482_v46  ;;  %vm973_vm3 = vcmp.eq.f32.partialorder %v972_v40, 8.507059e+37  ;;  %v4350_v33 = vld [vmem:[#allocation22_spill] sm:$0xff] }
 0x248   : > { %1332 = vmatpush.msra.mxu1 %v3473_v43  ;;  %1352 = vmatpush.msra.mxu2 %v3476_v44  ;;  %v975_v28 = vor.u32 1.1754944e-38, %v974_v13  ;;  %v4355_v13 = vld [vmem:[#allocation27_spill] sm:$0xff] }
 0x249   : > { %v980_v10 = vadd.f32 %v979_v60, %v978_v61  ;;  %v967_v11 = vadd.f32 %v3626_v34, %v966_v55  ;;  %1313 = vmatpush.msra.mxu0 %v3487_v47  ;;  %1373 = vmatpush.msra.mxu3 %v3498_v51  ;;  %v4351_v60 = vld [vmem:[#allocation23_spill] sm:$0xff]  ;;  %v4352_v55 = vld [vmem:[#allocation24_spill] sm:$0xff] }
 0x24a   : > { %1333 = vmatpush.msra.mxu1 %v3490_v48  ;;  %1353 = vmatpush.msra.mxu2 %v3493_v49 }
 0x24b   : > { %2532 = vtanh.f32 %v980_v10  ;;  %v991_v14 = vsub.f32 %v980_v10, %v3327_v62  ;;  %v971_v39 = vsel %vm3664_vm2, %v3626_v34, %v967_v11  ;;  %1314 = vmatpush.msra.mxu0 %v3503_v53  ;;  %1374 = vmatpush.msra.mxu3 %v3514_v57  ;;  %v4353_v10 = vld [vmem:[#allocation25_spill] sm:$0xff]  ;;  %v4354_v11 = vld [vmem:[#allocation26_spill] sm:$0xff] }
 0x24c   : > { %1334 = vmatpush.msra.mxu1 %v3506_v54  ;;  %v976_v22 = vsel %vm973_vm3, %v975_v28, %v971_v39  ;;  %1354 = vmatpush.msra.mxu2 %v3509_v56  ;;  %v4359_v39 = vld [vmem:[#allocation31_spill] sm:$0xff]  ;;  %v4360_v28 = vld [vmem:[#allocation32_spill] sm:$0xff] }
 0x24d   : > { %v992_v23 = vmul.f32 %v991_v14, %v987_v15  ;;  %1315 = vmatpush.msra.mxu0 %v3519_v59  ;;  %1375 = vmatpush.msra.mxu3 %v3530_v0  ;;  %v4356_v14 = vld [vmem:[#allocation28_spill] sm:$0xff] }
 0x24e   : > { %1335 = vmatpush.msra.mxu1 %v3522_v63  ;;  %1355 = vmatpush.msra.mxu2 %v3525_v9 }
 0x24f   : > { %v3676_v1 = vadd.f32 %v992_v23, %v3327_v62  ;;  %1316 = vmatpush.msra.mxu0 %v4349_v58  ;;  %1376 = vmatpush.msra.mxu3 %v4352_v55  ;;  %v4358_v23 = vld [vmem:[#allocation30_spill] sm:$0xff] }
 0x250   : > { %1336 = vmatpush.msra.mxu1 %v4350_v33  ;;  %1356 = vmatpush.msra.mxu2 %v4351_v60 }
 0x251   : > { %v2533_v3 = vpop.eup %2532  ;;  %1317 = vmatpush.msra.mxu0 %v4353_v10  ;;  %1377 = vmatpush.msra.mxu3 %v4356_v14 }
 0x252   : > { %v982_v34 = vmul.f32 %v2533_v3, %v976_v22  ;;  %1337 = vmatpush.msra.mxu1 %v4354_v11  ;;  %1357 = vmatpush.msra.mxu2 %v4355_v13  ;;  %v4363_v3 = vld [vmem:[#allocation15_spill] sm:$0xff]  ;;  %v4364_v22 = vld [vmem:[#allocation13_spill] sm:$0xff] }
 0x253   : > { %1318 = vmatpush.msra.mxu0 %v4357_v52  ;;  %1378 = vmatpush.msra.mxu3 %v4360_v28 }
 0x254   : > { %v983_v62 = vsub.f32 %v982_v34, %v3331_v2  ;;  %1338 = vmatpush.msra.mxu1 %v4358_v23  ;;  %1358 = vmatpush.msra.mxu2 %v4359_v39  ;;  %v4365_v34 = vld [vmem:[#allocation16_spill] sm:$0xff] }
 0x255   : > { %1319 = vmatpush.msra.mxu0 %v3590_v50 }
 0x256   : > { %v989_v61 = vmul.f32 %v987_v15, %v983_v62  ;;  %1339 = vmatpush.msra.mxu1 %v3593_v45  ;;  %1359 = vmatpush.msra.mxu2 %v3596_v29  ;;  %v4362_v15 = vld [vmem:[#allocation14_spill] sm:$0xff]  ;;  %v4366_v62 = vld [vmem:[#allocation17_spill] sm:$0xff] }
 0x258   : > { %v3698_v40 = vadd.f32 %v989_v61, %v3331_v2  ;;  %v4361_v2 = vld [vmem:[#allocation33_spill] sm:$0xff]  ;;  %v4367_v61 = vld [vmem:[#allocation18_spill] sm:$0xff] }
 0x259   : > { %1379 = vmatpush.msra.mxu3 %v4361_v2 }
 0x25a   : > { %2355 = vst [vmem:[%s3309_s22 + $0x10] sm:$0xff] %v3698_v40  ;;  %1085 = vmatmul.f32.vlgmr.msrb.gmra.mxu0 %v3698_v40  ;;  %1105 = vmatmul.f32.vlgmr.msrb.gmra.mxu1 %v3698_v40 }
 0x25b   : > { %1125 = vmatmul.f32.vlgmr.msrb.gmra.mxu2 %v3698_v40  ;;  %1145 = vmatmul.f32.vlgmr.msrb.gmra.mxu3 %v3698_v40 }
 0x25c   : > { %1539 = vmatpush.msrb.mxu0 %v4362_v15  ;;  %1559 = vmatpush.msrb.mxu1 %v4363_v3  ;;  %v4368_v15 = vld [vmem:[#allocation19_spill] sm:$0xff]  ;;  %v4369_v3 = vld [vmem:[#allocation20_spill] sm:$0xff] }
 0x25d   : > { %1579 = vmatpush.msrb.mxu2 %v4364_v22  ;;  %1599 = vmatpush.msrb.mxu3 %v3351_v4  ;;  %v2356_v4 = vld [vmem:[%s2884_s0 + $0x60] sm:$0xff] }
 0x25e   : > { %1540 = vmatpush.msrb.mxu0 %v3356_v5  ;;  %1560 = vmatpush.msrb.mxu1 %v3359_v6  ;;  %v2357_v5 = vld [vmem:[%s2884_s0 + $0x68] sm:$0xff] }
 0x25f   : > { %1580 = vmatpush.msrb.mxu2 %v3362_v7  ;;  %1600 = vmatpush.msrb.mxu3 %v3367_v8 }
 0x260   : > { %1541 = vmatpush.msrb.mxu0 %v4365_v34  ;;  %1561 = vmatpush.msrb.mxu1 %v4366_v62 }
 0x261   : > { %1581 = vmatpush.msrb.mxu2 %v3378_v12  ;;  %1601 = vmatpush.msrb.mxu3 %v4367_v61 }
 0x262   : > { %1542 = vmatpush.msrb.mxu0 %v4368_v15  ;;  %1562 = vmatpush.msrb.mxu1 %v4369_v3 }
 0x263   : > { %1582 = vmatpush.msrb.mxu2 %v3394_v16  ;;  %1602 = vmatpush.msrb.mxu3 %v3399_v17 }
 0x264   : > { %1543 = vmatpush.msrb.mxu0 %v3404_v18  ;;  %1563 = vmatpush.msrb.mxu1 %v3407_v19  ;;  %v2359_v18 = vld [vmem:[%s2884_s0 + $0x78] sm:$0xff] }
 0x265   : > { %1583 = vmatpush.msrb.mxu2 %v3410_v20  ;;  %1603 = vmatpush.msrb.mxu3 %v3415_v21 }
 0x266   : > { %1544 = vmatpush.msrb.mxu0 %v3422_v24  ;;  %1564 = vmatpush.msrb.mxu1 %v3425_v25 }
 0x267   : > { %1584 = vmatpush.msrb.mxu2 %v3428_v26  ;;  %1604 = vmatpush.msrb.mxu3 %v3433_v27 }
 0x268   : > { %1545 = vmatpush.msrb.mxu0 %v3438_v30  ;;  %1565 = vmatpush.msrb.mxu1 %v3441_v31  ;;  %v2358_v30 = vld [vmem:[%s2884_s0 + $0x70] sm:$0xff] }
 0x269   : > { %1585 = vmatpush.msrb.mxu2 %v3444_v32  ;;  %1605 = vmatpush.msrb.mxu3 %v3449_v35 }
 0x26a   : > { %1546 = vmatpush.msrb.mxu0 %v3454_v36  ;;  %1566 = vmatpush.msrb.mxu1 %v3457_v37 }
 0x26b   : > { %1586 = vmatpush.msrb.mxu2 %v3460_v38  ;;  %1606 = vmatpush.msrb.mxu3 %v3465_v41  ;;  %v2369_v38 = vld [vmem:[%s3139_s29 + $0x20] sm:$0xff] }
 0x26c   : > { %1547 = vmatpush.msrb.mxu0 %v3470_v42  ;;  %1567 = vmatpush.msrb.mxu1 %v3473_v43 }
 0x26d   : > { %1587 = vmatpush.msrb.mxu2 %v3476_v44  ;;  %1607 = vmatpush.msrb.mxu3 %v3482_v46 }
 0x26e   : > { %1548 = vmatpush.msrb.mxu0 %v3487_v47  ;;  %1568 = vmatpush.msrb.mxu1 %v3490_v48 }
 0x26f   : > { %1588 = vmatpush.msrb.mxu2 %v3493_v49  ;;  %1608 = vmatpush.msrb.mxu3 %v3498_v51 }
 0x270   : > { %1549 = vmatpush.msrb.mxu0 %v3503_v53  ;;  %1569 = vmatpush.msrb.mxu1 %v3506_v54 }
 0x271   : > { %1589 = vmatpush.msrb.mxu2 %v3509_v56  ;;  %1609 = vmatpush.msrb.mxu3 %v3514_v57  ;;  %v2378_v56 = vld [vmem:[%s3139_s29 + $0x28] sm:$0xff] }
 0x272   : > { %1550 = vmatpush.msrb.mxu0 %v3519_v59  ;;  %1570 = vmatpush.msrb.mxu1 %v3522_v63 }
 0x273   : > { %1590 = vmatpush.msrb.mxu2 %v3525_v9  ;;  %1610 = vmatpush.msrb.mxu3 %v3530_v0 }
 0x274   : > { %1551 = vmatpush.msrb.mxu0 %v4349_v58  ;;  %1571 = vmatpush.msrb.mxu1 %v4350_v33 }
 0x275   : > { %1591 = vmatpush.msrb.mxu2 %v4351_v60  ;;  %1611 = vmatpush.msrb.mxu3 %v4352_v55 }
 0x276   : > { %1552 = vmatpush.msrb.mxu0 %v4353_v10  ;;  %1572 = vmatpush.msrb.mxu1 %v4354_v11 }
 0x277   : > { %1592 = vmatpush.msrb.mxu2 %v4355_v13  ;;  %1612 = vmatpush.msrb.mxu3 %v4356_v14 }
 0x278   : > { %1553 = vmatpush.msrb.mxu0 %v4357_v52  ;;  %1573 = vmatpush.msrb.mxu1 %v4358_v23 }
 0x279   : > { %1593 = vmatpush.msrb.mxu2 %v4359_v39  ;;  %1613 = vmatpush.msrb.mxu3 %v4360_v28  ;;  %v1222_v28 = vpop.permute.xlu1 %1221 }
 0x27a   : > { %1554 = vmatpush.msrb.mxu0 %v3590_v50  ;;  %1574 = vmatpush.msrb.mxu1 %v3593_v45 }
 0x27b   : > { %1594 = vmatpush.msrb.mxu2 %v3596_v29  ;;  %1614 = vmatpush.msrb.mxu3 %v4361_v2 }
 0x27c   : > { %1456 = vperm.xlu2 %2485, %v2369_v38  }
 0x284   : > { %1691 = vperm.xlu2 %2485, %v2378_v56  }
 0x2d7   : > { %v1086_v6 = vpop.f32.mrf.mxu0  ;;  %v1106_v7 = vpop.f32.mrf.mxu1 }
 0x2d8   : > { %v1149_v8 = vadd.f32 %v2356_v4, %v1086_v6  ;;  %v1150_v12 = vadd.f32 %v2357_v5, %v1106_v7 }
 0x2da   : > { %v2361_v16 = vmul.f32 -1.442695, %v1149_v8  ;;  %v2362_v17 = vmul.f32 -1.442695, %v1150_v12  ;;  %v2366_v8 = vld [vmem:[%s2884_s0 + $0x88] sm:$0xff] }
 0x2dc   : > { %2534 = vpow2.f32 %v2361_v16 }
 0x2dd   : > { %2536 = vpow2.f32 %v2362_v17 }
 0x2de   : > { %v1146_v19 = vpop.f32.mrf.mxu3  ;;  %v1126_v31 = vpop.f32.mrf.mxu2 }
 0x2df   : > { %v1152_v20 = vadd.f32 %v2359_v18, %v1146_v19  ;;  %v1151_v37 = vadd.f32 %v2358_v30, %v1126_v31 }
 0x2e1   : > { %v2363_v21 = vmul.f32 -1.442695, %v1152_v20  ;;  %v2368_v20 = vld [vmem:[%s2884_s0 + $0x98] sm:$0xff] }
 0x2e2   : > { %v2535_v24 = vpop.eup %2534 }
 0x2e3   : > { %v2537_v25 = vpop.eup %2536  ;;  %v1158_v26 = vadd.f32 1.0, %v2535_v24  ;;  %2538 = vpow2.f32 %v2363_v21 }
 0x2e4   : > { %v1177_v27 = vadd.f32 1.0, %v2537_v25 }
 0x2e5   : > { %2540 = vrcp.f32 %v1158_v26  ;;  %v1170_v47 = vand.u32 2147483648, %v1158_v26  ;;  %v1168_v51 = vand.u32 2147483647, %v1158_v26  ;;  %vm1164_vm6 = vweird.f32 %v1158_v26 }
 0x2e6   : > { %2542 = vrcp.f32 %v1177_v27  ;;  %v1189_v48 = vand.u32 2147483648, %v1177_v27  ;;  %v1187_v54 = vand.u32 2147483647, %v1177_v27  ;;  %vm1183_vm7 = vweird.f32 %v1177_v27 }
 0x2e7   : > { %v1171_v63 = vor.u32 1.1754944e-38, %v1170_v47  ;;  %vm1169_vm10 = vcmp.eq.f32.partialorder %v1168_v51, 8.507059e+37 }
 0x2e8   : > { %v1190_v29 = vor.u32 1.1754944e-38, %v1189_v48  ;;  %vm1188_vm11 = vcmp.eq.f32.partialorder %v1187_v54, 8.507059e+37 }
 0x2e9   : > { %v2539_v32 = vpop.eup %2538 }
 0x2ea   : > { %v1197_v35 = vadd.f32 1.0, %v2539_v32  ;;  %v2367_v32 = vld [vmem:[%s2884_s0 + $0x90] sm:$0xff] }
 0x2eb   : > { %v2541_v36 = vpop.eup %2540 }
 0x2ec   : > { %v2543_v41 = vpop.eup %2542  ;;  %v1160_v42 = vmul.f32 %v2541_v36, %v1158_v26  ;;  %2544 = vrcp.f32 %v1197_v35  ;;  %vm1165_vm4 = vweird.f32 %v2541_v36  ;;  %v1209_v39 = vand.u32 2147483648, %v1197_v35 }
 0x2ed   : > { %v1179_v43 = vmul.f32 %v2543_v41, %v1177_v27  ;;  %2546 = vtanh.f32 %v1151_v37  ;;  %vm1184_vm5 = vweird.f32 %v2543_v41  ;;  %vm1166_vm8 = vmor %vm1164_vm6, %vm1165_vm4  ;;  %vm1203_vm13 = vweird.f32 %v1197_v35 }
 0x2ee   : > { %v1161_v44 = vsub.f32 1.0, %v1160_v42  ;;  %vm1185_vm9 = vmor %vm1183_vm7, %vm1184_vm5  ;;  %v1207_v2 = vand.u32 2147483647, %v1197_v35  ;;  %v1210_v62 = vor.u32 1.1754944e-38, %v1209_v39 }
 0x2ef   : > { %v1180_v46 = vsub.f32 1.0, %v1179_v43 }
 0x2f0   : > { %v1162_v49 = vmul.f32 %v2541_v36, %v1161_v44  ;;  %vm1208_vm15 = vcmp.eq.f32.partialorder %v1207_v2, 8.507059e+37 }
 0x2f1   : > { %v1181_v53 = vmul.f32 %v2543_v41, %v1180_v46 }
 0x2f2   : > { %v2545_v57 = vpop.eup %2544  ;;  %v1163_v59 = vadd.f32 %v2541_v36, %v1162_v49 }
 0x2f3   : > { %v1182_v9 = vadd.f32 %v2543_v41, %v1181_v53  ;;  %v1199_v0 = vmul.f32 %v2545_v57, %v1197_v35  ;;  %v2547_v50 = vpop.eup %2546  ;;  %vm1204_vm12 = vweird.f32 %v2545_v57 }
 0x2f4   : > { %v1167_v45 = vsel %vm1166_vm8, %v2541_v36, %v1163_v59  ;;  %vm1205_vm14 = vmor %vm1203_vm13, %vm1204_vm12 }
 0x2f5   : > { %v1172_v58 = vsel %vm1169_vm10, %v1171_v63, %v1167_v45  ;;  %v1186_v33 = vsel %vm1185_vm9, %v2543_v41, %v1182_v9  ;;  %v1200_v60 = vsub.f32 1.0, %v1199_v0 }
 0x2f6   : > { %v1191_v55 = vsel %vm1188_vm11, %v1190_v29, %v1186_v33  ;;  %v1214_v10 = vmul.f32 %v2547_v50, %v1172_v58 }
 0x2f7   : > { %v1213_v11 = vmul.f32 %v1191_v55, %v3676_v1  ;;  %v1201_v13 = vmul.f32 %v2545_v57, %v1200_v60 }
 0x2f9   : > { %v1215_v14 = vadd.f32 %v1214_v10, %v1213_v11  ;;  %v1202_v52 = vadd.f32 %v2545_v57, %v1201_v13 }
 0x2fb   : > { %2548 = vtanh.f32 %v1215_v14  ;;  %v1226_v23 = vsub.f32 %v1215_v14, %v3676_v1  ;;  %v1206_v34 = vsel %vm1205_vm14, %v2545_v57, %v1202_v52  ;;  %v1457_v52 = vpop.permute.xlu2 %1456 }
 0x2fc   : > { %v1211_v3 = vsel %vm1208_vm15, %v1210_v62, %v1206_v34 }
 0x2fd   : > { %v1227_v22 = vmul.f32 %v1226_v23, %v1222_v28 }
 0x2ff   : > { %v3787_v61 = vadd.f32 %v1227_v22, %v3676_v1  ;;  %v2365_v1 = vld [vmem:[%s2884_s0 + $0x80] sm:$0xff] }
 0x301   : > { %v2549_v15 = vpop.eup %2548 }
 0x302   : > { %v1217_v4 = vmul.f32 %v2549_v15, %v1211_v3 }
 0x304   : > { %v1218_v5 = vsub.f32 %v1217_v4, %v3698_v40 }
 0x306   : > { %v1224_v6 = vmul.f32 %v1222_v28, %v1218_v5 }
 0x308   : > { %v3791_v7 = vadd.f32 %v1224_v6, %v3698_v40 }
 0x30a   : > { %1320 = vmatmul.f32.vlgmr.msra.gmra.mxu0 %v3791_v7  ;;  %2364 = vst [vmem:[%s3309_s22 + $0x18] sm:$0xff] %v3791_v7  ;;  %1340 = vmatmul.f32.vlgmr.msra.gmra.mxu1 %v3791_v7 }
 0x30b   : > { %1360 = vmatmul.f32.vlgmr.msra.gmra.mxu2 %v3791_v7  ;;  %1380 = vmatmul.f32.vlgmr.msra.gmra.mxu3 %v3791_v7 }
 0x387   : > { %v1321_v12 = vpop.f32.mrf.mxu0  ;;  %v1341_v16 = vpop.f32.mrf.mxu1 }
 0x388   : > { %v1384_v17 = vadd.f32 %v2365_v1, %v1321_v12  ;;  %v1385_v18 = vadd.f32 %v2366_v8, %v1341_v16  ;;  %v3822_v12 = vld [vmem:[%s2892_s18 + $0x1e8] sm:$0xff]  ;;  %v3830_v16 = vld [vmem:[%s2892_s18 + $0x1f8] sm:$0xff] }
 0x389   : > { %1794 = vmatpush.msra.mxu1 %v3822_v12  ;;  %1834 = vmatpush.msra.mxu3 %v3830_v16 }
 0x38a   : > { %v2370_v19 = vmul.f32 -1.442695, %v1384_v17  ;;  %v2371_v40 = vmul.f32 -1.442695, %v1385_v18  ;;  %v3835_v17 = vld [vmem:[%s2892_s18 + $0x1c0] sm:$0xff]  ;;  %v3838_v18 = vld [vmem:[%s2892_s18 + $0x1c8] sm:$0xff] }
 0x38b   : > { %1795 = vmatpush.msra.mxu1 %v3838_v18 }
 0x38c   : > { %2550 = vpow2.f32 %v2370_v19  ;;  %v3841_v19 = vld [vmem:[%s2892_s18 + $0x1d0] sm:$0xff] }
 0x38d   : > { %2552 = vpow2.f32 %v2371_v40  ;;  %v3846_v40 = vld [vmem:[%s2892_s18 + $0x1d8] sm:$0xff] }
 0x38e   : > { %v1381_v21 = vpop.f32.mrf.mxu3  ;;  %v1361_v35 = vpop.f32.mrf.mxu2  ;;  %1835 = vmatpush.msra.mxu3 %v3846_v40 }
 0x38f   : > { %v1387_v24 = vadd.f32 %v2368_v20, %v1381_v21  ;;  %v1386_v41 = vadd.f32 %v2367_v32, %v1361_v35  ;;  %v3851_v20 = vld [vmem:[%s2892_s18 + $0x1a0] sm:$0xff]  ;;  %v3854_v21 = vld [vmem:[%s2892_s18 + $0x1a8] sm:$0xff] }
 0x390   : > { %1796 = vmatpush.msra.mxu1 %v3854_v21  ;;  %v3883_v32 = vld [vmem:[%s2892_s18 + $0x160] sm:$0xff]  ;;  %v3886_v35 = vld [vmem:[%s2892_s18 + $0x168] sm:$0xff] }
 0x391   : > { %v2372_v25 = vmul.f32 -1.442695, %v1387_v24  ;;  %v3857_v24 = vld [vmem:[%s2892_s18 + $0x1b0] sm:$0xff] }
 0x392   : > { %v2551_v26 = vpop.eup %2550 }
 0x393   : > { %v2553_v27 = vpop.eup %2552  ;;  %v1393_v30 = vadd.f32 1.0, %v2551_v26  ;;  %2554 = vpow2.f32 %v2372_v25  ;;  %v3862_v25 = vld [vmem:[%s2892_s18 + $0x1b8] sm:$0xff]  ;;  %v3867_v26 = vld [vmem:[%s2892_s18 + $0x180] sm:$0xff] }
 0x394   : > { %v1412_v31 = vadd.f32 1.0, %v2553_v27  ;;  %1836 = vmatpush.msra.mxu3 %v3862_v25  ;;  %v3870_v27 = vld [vmem:[%s2892_s18 + $0x188] sm:$0xff] }
 0x395   : > { %2556 = vrcp.f32 %v1393_v30  ;;  %v1405_v48 = vand.u32 2147483648, %v1393_v30  ;;  %v1403_v51 = vand.u32 2147483647, %v1393_v30  ;;  %vm1399_vm2 = vweird.f32 %v1393_v30  ;;  %1797 = vmatpush.msra.mxu1 %v3870_v27 }
 0x396   : > { %2558 = vrcp.f32 %v1412_v31  ;;  %v1424_v53 = vand.u32 2147483648, %v1412_v31  ;;  %v1422_v56 = vand.u32 2147483647, %v1412_v31  ;;  %vm1418_vm4 = vweird.f32 %v1412_v31 }
 0x397   : > { %v1406_v9 = vor.u32 1.1754944e-38, %v1405_v48  ;;  %vm1404_vm5 = vcmp.eq.f32.partialorder %v1403_v51, 8.507059e+37  ;;  %1798 = vmatpush.msra.mxu1 %v3886_v35  ;;  %v3920_v51 = vld [vmem:[%s2892_s18 + $0x128] sm:$0xff] }
 0x398   : > { %v1425_v45 = vor.u32 1.1754944e-38, %v1424_v53  ;;  %vm1423_vm7 = vcmp.eq.f32.partialorder %v1422_v56, 8.507059e+37  ;;  %v3923_v53 = vld [vmem:[%s2892_s18 + $0x130] sm:$0xff] }
 0x399   : > { %v2555_v36 = vpop.eup %2554 }
 0x39a   : > { %v1432_v37 = vadd.f32 1.0, %v2555_v36  ;;  %v3889_v36 = vld [vmem:[%s2892_s18 + $0x170] sm:$0xff] }
 0x39b   : > { %v2557_v38 = vpop.eup %2556 }
 0x39c   : > { %v2559_v42 = vpop.eup %2558  ;;  %v1395_v43 = vmul.f32 %v2557_v38, %v1393_v30  ;;  %2560 = vrcp.f32 %v1432_v37  ;;  %vm1400_vm0 = vweird.f32 %v2557_v38  ;;  %v1444_v39 = vand.u32 2147483648, %v1432_v37  ;;  %v3873_v30 = vld [vmem:[%s2892_s18 + $0x190] sm:$0xff] }
 0x39d   : > { %v1414_v44 = vmul.f32 %v2559_v42, %v1412_v31  ;;  %2562 = vtanh.f32 %v1386_v41  ;;  %vm1419_vm1 = vweird.f32 %v2559_v42  ;;  %vm1401_vm3 = vmor %vm1399_vm2, %vm1400_vm0  ;;  %vm1438_vm9 = vweird.f32 %v1432_v37  ;;  %v3878_v31 = vld [vmem:[%s2892_s18 + $0x198] sm:$0xff] }
 0x39e   : > { %v1396_v46 = vsub.f32 1.0, %v1395_v43  ;;  %vm1420_vm6 = vmor %vm1418_vm4, %vm1419_vm1  ;;  %v1442_v2 = vand.u32 2147483647, %v1432_v37  ;;  %v1445_v62 = vor.u32 1.1754944e-38, %v1444_v39  ;;  %1837 = vmatpush.msra.mxu3 %v3878_v31  ;;  %v3896_v41 = vld [vmem:[%s2892_s18 + $0x178] sm:$0xff]  ;;  %v3904_v43 = vld [vmem:[%s2892_s18 + $0x148] sm:$0xff] }
 0x39f   : > { %v1415_v47 = vsub.f32 1.0, %v1414_v44  ;;  %v3907_v44 = vld [vmem:[%s2892_s18 + $0x150] sm:$0xff]  ;;  %1799 = vmatpush.msra.mxu1 %v3904_v43  ;;  %v3982_v39 = vld [vmem:[%s2892_s18 + $0xa0] sm:$0xff] }
 0x3a0   : > { %v1397_v49 = vmul.f32 %v2557_v38, %v1396_v46  ;;  %vm1443_vm11 = vcmp.eq.f32.partialorder %v1442_v2, 8.507059e+37  ;;  %1838 = vmatpush.msra.mxu3 %v3896_v41  ;;  %v3912_v46 = vld [vmem:[%s2892_s18 + $0x158] sm:$0xff]  ;;  %v3988_v2 = vld [vmem:[%s2892_s18 + $0xb0] sm:$0xff] }
 0x3a1   : > { %v1416_v54 = vmul.f32 %v2559_v42, %v1415_v47  ;;  %1800 = vmatpush.msra.mxu1 %v3920_v51 }
 0x3a2   : > { %v2561_v57 = vpop.eup %2560  ;;  %v1398_v59 = vadd.f32 %v2557_v38, %v1397_v49  ;;  %1839 = vmatpush.msra.mxu3 %v3912_v46  ;;  %v3917_v49 = vld [vmem:[%s2892_s18 + $0x120] sm:$0xff] }
 0x3a3   : > { %v1434_v63 = vmul.f32 %v2561_v57, %v1432_v37  ;;  %v1417_v0 = vadd.f32 %v2559_v42, %v1416_v54  ;;  %v2563_v50 = vpop.eup %2562  ;;  %vm1439_vm8 = vweird.f32 %v2561_v57  ;;  %v2374_v37 = vld [vmem:[%s2884_s0 + $0xa0] sm:$0xff] }
 0x3a4   : > { %v1402_v29 = vsel %vm1401_vm3, %v2557_v38, %v1398_v59  ;;  %vm1440_vm10 = vmor %vm1438_vm9, %vm1439_vm8  ;;  %v2375_v38 = vld [vmem:[%s2884_s0 + $0xa8] sm:$0xff]  ;;  %v3933_v59 = vld [vmem:[%s2892_s18 + $0x100] sm:$0xff] }
 0x3a5   : > { %v1435_v58 = vsub.f32 1.0, %v1434_v63  ;;  %v1407_v33 = vsel %vm1404_vm5, %v1406_v9, %v1402_v29  ;;  %v1421_v60 = vsel %vm1420_vm6, %v2559_v42, %v1417_v0  ;;  %v3901_v42 = vld [vmem:[%s2892_s18 + $0x140] sm:$0xff]  ;;  %v3936_v63 = vld [vmem:[%s2892_s18 + $0x108] sm:$0xff]  ;;  %v3939_v9 = vld [vmem:[%s2892_s18 + $0x110] sm:$0xff] }
 0x3a6   : > { %v1426_v55 = vsel %vm1423_vm7, %v1425_v45, %v1421_v60  ;;  %v1449_v10 = vmul.f32 %v2563_v50, %v1407_v33  ;;  %1801 = vmatpush.msra.mxu1 %v3936_v63  ;;  %v3944_v45 = vld [vmem:[%s2892_s18 + $0x118] sm:$0xff]  ;;  %v3949_v50 = vld [vmem:[%s2892_s18 + $0xe0] sm:$0xff]  ;;  %v3955_v33 = vld [vmem:[%s2892_s18 + $0xf0] sm:$0xff] }
 0x3a7   : > { %v1436_v11 = vmul.f32 %v2561_v57, %v1435_v58  ;;  %v1448_v13 = vmul.f32 %v1426_v55, %v3787_v61  ;;  %v3952_v58 = vld [vmem:[%s2892_s18 + $0xe8] sm:$0xff]  ;;  %v2377_v60 = vld [vmem:[%s2884_s0 + $0xb8] sm:$0xff] }
 0x3a8   : > { %1802 = vmatpush.msra.mxu1 %v3952_v58  ;;  %v3961_v55 = vld [vmem:[%s2892_s18 + $0xf8] sm:$0xff] }
 0x3a9   : > { %v1450_v14 = vadd.f32 %v1449_v10, %v1448_v13  ;;  %v1437_v23 = vadd.f32 %v2561_v57, %v1436_v11  ;;  %v3966_v10 = vld [vmem:[%s2892_s18 + $0xc0] sm:$0xff]  ;;  %v3969_v11 = vld [vmem:[%s2892_s18 + $0xc8] sm:$0xff]  ;;  %v3972_v13 = vld [vmem:[%s2892_s18 + $0xd0] sm:$0xff] }
 0x3aa   : > { %1803 = vmatpush.msra.mxu1 %v3969_v11 }
 0x3ab   : > { %2564 = vtanh.f32 %v1450_v14  ;;  %v1461_v28 = vsub.f32 %v1450_v14, %v3787_v61  ;;  %v1441_v34 = vsel %vm1440_vm10, %v2561_v57, %v1437_v23  ;;  %v3928_v57 = vld [vmem:[%s2892_s18 + $0x138] sm:$0xff] }
 0x3ac   : > { %v1446_v4 = vsel %vm1443_vm11, %v1445_v62, %v1441_v34  ;;  %1840 = vmatpush.msra.mxu3 %v3928_v57  ;;  %v3998_v62 = vld [vmem:[%s2892_s18 + $0x80] sm:$0xff] }
 0x3ad   : > { %v1462_v22 = vmul.f32 %v1461_v28, %v1457_v52  ;;  %v3985_v28 = vld [vmem:[%s2892_s18 + $0xa8] sm:$0xff] }
 0x3ae   : > { %1841 = vmatpush.msra.mxu3 %v3944_v45  ;;  %1804 = vmatpush.msra.mxu1 %v3985_v28 }
 0x3af   : > { %v3806_v15 = vadd.f32 %v1462_v22, %v3787_v61  ;;  %v3819_v61 = vld [vmem:[%s2892_s18 + $0x1e0] sm:$0xff]  ;;  %v3993_v22 = vld [vmem:[%s2892_s18 + $0xb8] sm:$0xff] }
 0x3b0   : > { %1774 = vmatpush.msra.mxu0 %v3819_v61  ;;  %1842 = vmatpush.msra.mxu3 %v3961_v55 }
 0x3b1   : > { %v2565_v3 = vpop.eup %2564 }
 0x3b2   : > { %v1452_v5 = vmul.f32 %v2565_v3, %v1446_v4  ;;  %1775 = vmatpush.msra.mxu0 %v3835_v17  ;;  %v4001_v3 = vld [vmem:[%s2892_s18 + $0x88] sm:$0xff]  ;;  %v4004_v4 = vld [vmem:[%s2892_s18 + $0x90] sm:$0xff] }
 0x3b3   : > { %1805 = vmatpush.msra.mxu1 %v4001_v3 }
 0x3b4   : > { %v1453_v6 = vsub.f32 %v1452_v5, %v3791_v7  ;;  %1776 = vmatpush.msra.mxu0 %v3851_v20 }
 0x3b6   : > { %v1459_v1 = vmul.f32 %v1457_v52, %v1453_v6  ;;  %1777 = vmatpush.msra.mxu0 %v3867_v26  ;;  %v3977_v52 = vld [vmem:[%s2892_s18 + $0xd8] sm:$0xff] }
 0x3b7   : > { %1843 = vmatpush.msra.mxu3 %v3977_v52  ;;  %v4009_v6 = vld [vmem:[%s2892_s18 + $0x98] sm:$0xff] }
 0x3b8   : > { %v3810_v8 = vadd.f32 %v1459_v1, %v3791_v7  ;;  %v3825_v7 = vld [vmem:[%s2892_s18 + $0x1f0] sm:$0xff]  ;;  %1778 = vmatpush.msra.mxu0 %v3883_v32  ;;  %4371 = vst [vmem:[#allocation22_spill] sm:$0xff] %v4009_v6 }
 0x3b9   : > { %1814 = vmatpush.msra.mxu2 %v3825_v7  ;;  %1844 = vmatpush.msra.mxu3 %v3993_v22 }
 0x3ba   : > { %4370 = vst [vmem:[#allocation21_spill] sm:$0xff] %v3810_v8  ;;  %1555 = vmatmul.f32.vlgmr.msrb.gmra.mxu0 %v3810_v8  ;;  %1575 = vmatmul.f32.vlgmr.msrb.gmra.mxu1 %v3810_v8 }
 0x3bb   : > { %2373 = vst [vmem:[%s3309_s22 + $0x20] sm:$0xff] %v3810_v8  ;;  %1595 = vmatmul.f32.vlgmr.msrb.gmra.mxu2 %v3810_v8  ;;  %1615 = vmatmul.f32.vlgmr.msrb.gmra.mxu3 %v3810_v8 }
 0x3bc   : > { %1815 = vmatpush.msra.mxu2 %v3841_v19  ;;  %1779 = vmatpush.msra.mxu0 %v3901_v42 }
 0x3bd   : > { %1845 = vmatpush.msra.mxu3 %v4009_v6 }
 0x3be   : > { %1816 = vmatpush.msra.mxu2 %v3857_v24  ;;  %1780 = vmatpush.msra.mxu0 %v3917_v49 }
 0x3c0   : > { %1817 = vmatpush.msra.mxu2 %v3873_v30  ;;  %1781 = vmatpush.msra.mxu0 %v3933_v59 }
 0x3c2   : > { %1818 = vmatpush.msra.mxu2 %v3889_v36  ;;  %1782 = vmatpush.msra.mxu0 %v3949_v50 }
 0x3c4   : > { %1819 = vmatpush.msra.mxu2 %v3907_v44  ;;  %1783 = vmatpush.msra.mxu0 %v3966_v10 }
 0x3c6   : > { %1820 = vmatpush.msra.mxu2 %v3923_v53  ;;  %1784 = vmatpush.msra.mxu0 %v3982_v39 }
 0x3c8   : > { %1821 = vmatpush.msra.mxu2 %v3939_v9  ;;  %1785 = vmatpush.msra.mxu0 %v3998_v62 }
 0x3ca   : > { %1822 = vmatpush.msra.mxu2 %v3955_v33 }
 0x3cc   : > { %1823 = vmatpush.msra.mxu2 %v3972_v13 }
 0x3ce   : > { %1824 = vmatpush.msra.mxu2 %v3988_v2 }
 0x3d0   : > { %1825 = vmatpush.msra.mxu2 %v4004_v4 }
 0x437   : > { %v1556_v47 = vpop.f32.mrf.mxu0  ;;  %v1576_v48 = vpop.f32.mrf.mxu1 }
 0x438   : > { %v1619_v54 = vadd.f32 %v2374_v37, %v1556_v47  ;;  %v1620_v56 = vadd.f32 %v2375_v38, %v1576_v48  ;;  %v4016_v38 = vld [vmem:[%s2892_s18 + $0x60] sm:$0xff]  ;;  %v4019_v47 = vld [vmem:[%s2892_s18 + $0x68] sm:$0xff]  ;;  %v4022_v48 = vld [vmem:[%s2892_s18 + $0x70] sm:$0xff] }
 0x439   : > { %4372 = vst [vmem:[#allocation23_spill] sm:$0xff] %v4016_v38  ;;  %1786 = vmatpush.msra.mxu0 %v4016_v38  ;;  %1806 = vmatpush.msra.mxu1 %v4019_v47  ;;  %v4076_v38 = vld [vmem:[%s2892_s18 + $0x18] sm:$0xff] }
 0x43a   : > { %v2379_v0 = vmul.f32 -1.442695, %v1619_v54  ;;  %v2380_v29 = vmul.f32 -1.442695, %v1620_v56  ;;  %4373 = vst [vmem:[#allocation24_spill] sm:$0xff] %v4019_v47  ;;  %v4029_v56 = vld [vmem:[%s2892_s18 + $0x78] sm:$0xff]  ;;  %1826 = vmatpush.msra.mxu2 %v4022_v48 }
 0x43b   : > { %4374 = vst [vmem:[#allocation25_spill] sm:$0xff] %v4022_v48  ;;  %1846 = vmatpush.msra.mxu3 %v4029_v56  ;;  %v4065_v48 = vld [vmem:[%s2892_s18] sm:$0xff] }
 0x43c   : > { %2566 = vpow2.f32 %v2379_v0  ;;  %4375 = vst [vmem:[#allocation26_spill] sm:$0xff] %v4029_v56  ;;  %v4035_v0 = vld [vmem:[%s2892_s18 + $0x40] sm:$0xff]  ;;  %v4062_v56 = vld [vmem:[%s2892_s18 + $0x38] sm:$0xff] }
 0x43d   : > { %2568 = vpow2.f32 %v2380_v29  ;;  %4376 = vst [vmem:[#allocation27_spill] sm:$0xff] %v4035_v0  ;;  %v4038_v29 = vld [vmem:[%s2892_s18 + $0x48] sm:$0xff]  ;;  %1787 = vmatpush.msra.mxu0 %v4035_v0  ;;  %v4073_v0 = vld [vmem:[%s2892_s18 + $0x10] sm:$0xff] }
 0x43e   : > { %v1616_v14 = vpop.f32.mrf.mxu3  ;;  %4377 = vst [vmem:[#allocation28_spill] sm:$0xff] %v4038_v29  ;;  %1807 = vmatpush.msra.mxu1 %v4038_v29  ;;  %v1596_v47 = vpop.f32.mrf.mxu2  ;;  %v4070_v29 = vld [vmem:[%s2892_s18 + $0x8] sm:$0xff] }
 0x43f   : > { %v1622_v23 = vadd.f32 %v2377_v60, %v1616_v14  ;;  %v4041_v60 = vld [vmem:[%s2892_s18 + $0x50] sm:$0xff]  ;;  %4382 = vst [vmem:[#allocation33_spill] sm:$0xff] %v4076_v38 }
 0x440   : > { %4378 = vst [vmem:[#allocation29_spill] sm:$0xff] %v4041_v60  ;;  %v2376_v14 = vld [vmem:[%s2884_s0 + $0xb0] sm:$0xff]  ;;  %1827 = vmatpush.msra.mxu2 %v4041_v60 }
 0x441   : > { %v2381_v34 = vmul.f32 -1.442695, %v1622_v23  ;;  %v4048_v23 = vld [vmem:[%s2892_s18 + $0x58] sm:$0xff]  ;;  %v1621_v8 = vadd.f32 %v2376_v14, %v1596_v47 }
 0x442   : > { %v2567_v5 = vpop.eup %2566  ;;  %4379 = vst [vmem:[#allocation30_spill] sm:$0xff] %v4048_v23  ;;  %1847 = vmatpush.msra.mxu3 %v4048_v23 }
 0x443   : > { %v2569_v1 = vpop.eup %2568  ;;  %v4011_v37 = vadd.f32 1.0, %v2567_v5  ;;  %2570 = vpow2.f32 %v2381_v34  ;;  %v4051_v34 = vld [vmem:[%s2892_s18 + $0x20] sm:$0xff]  ;;  %v4054_v5 = vld [vmem:[%s2892_s18 + $0x28] sm:$0xff] }
 0x444   : > { %v4024_v54 = vadd.f32 1.0, %v2569_v1  ;;  %4380 = vst [vmem:[#allocation31_spill] sm:$0xff] %v4051_v34  ;;  %v4059_v1 = vld [vmem:[%s2892_s18 + $0x30] sm:$0xff]  ;;  %1788 = vmatpush.msra.mxu0 %v4051_v34  ;;  %1808 = vmatpush.msra.mxu1 %v4054_v5 }
 0x445   : > { %2572 = vrcp.f32 %v4011_v37  ;;  %4381 = vst [vmem:[#allocation32_spill] sm:$0xff] %v4054_v5  ;;  %1828 = vmatpush.msra.mxu2 %v4059_v1  ;;  %1848 = vmatpush.msra.mxu3 %v4062_v56  ;;  %vm1634_vm14 = vweird.f32 %v4011_v37 }
 0x446   : > { %2574 = vrcp.f32 %v4024_v54  ;;  %1789 = vmatpush.msra.mxu0 %v4065_v48  ;;  %1809 = vmatpush.msra.mxu1 %v4070_v29  ;;  %vm1653_vm15 = vweird.f32 %v4024_v54 }
 0x447   : > { %1829 = vmatpush.msra.mxu2 %v4073_v0  ;;  %1849 = vmatpush.msra.mxu3 %v4076_v38  ;;  %v1640_v38 = vand.u32 2147483648, %v4011_v37 }
 0x448   : > { %2009 = vmatpush.msrb.mxu0 %v3819_v61  ;;  %2029 = vmatpush.msrb.mxu1 %v3822_v12  ;;  %v1659_v61 = vand.u32 2147483648, %v4024_v54 }
 0x449   : > { %v2571_v60 = vpop.eup %2570  ;;  %2049 = vmatpush.msrb.mxu2 %v3825_v7  ;;  %2069 = vmatpush.msrb.mxu3 %v3830_v16  ;;  %v1638_v7 = vand.u32 2147483647, %v4011_v37 }
 0x44a   : > { %v4080_v23 = vadd.f32 1.0, %v2571_v60  ;;  %2010 = vmatpush.msrb.mxu0 %v3835_v17  ;;  %2030 = vmatpush.msrb.mxu1 %v3838_v18  ;;  %v1657_v17 = vand.u32 2147483647, %v4024_v54 }
 0x44b   : > { %v2573_v34 = vpop.eup %2572  ;;  %2050 = vmatpush.msrb.mxu2 %v3841_v19  ;;  %2070 = vmatpush.msrb.mxu3 %v3846_v40  ;;  %v1641_v19 = vor.u32 1.1754944e-38, %v1640_v38  ;;  %vm1639_vm2 = vcmp.eq.f32.partialorder %v1638_v7, 8.507059e+37 }
 0x44c   : > { %v2575_v5 = vpop.eup %2574  ;;  %v1630_v6 = vmul.f32 %v2573_v34, %v4011_v37  ;;  %2576 = vrcp.f32 %v4080_v23  ;;  %vm1635_vm12 = vweird.f32 %v2573_v34  ;;  %2011 = vmatpush.msrb.mxu0 %v3851_v20  ;;  %2031 = vmatpush.msrb.mxu1 %v3854_v21  ;;  %v1660_v21 = vor.u32 1.1754944e-38, %v1659_v61 }
 0x44d   : > { %v1649_v60 = vmul.f32 %v2575_v5, %v4024_v54  ;;  %2578 = vtanh.f32 %v1621_v8  ;;  %vm1654_vm13 = vweird.f32 %v2575_v5  ;;  %2051 = vmatpush.msrb.mxu2 %v3857_v24  ;;  %2071 = vmatpush.msrb.mxu3 %v3862_v25  ;;  %vm1636_vm0 = vmor %vm1634_vm14, %vm1635_vm12  ;;  %vm1658_vm3 = vcmp.eq.f32.partialorder %v1657_v17, 8.507059e+37 }
 0x44e   : > { %v1631_v47 = vsub.f32 1.0, %v1630_v6  ;;  %2012 = vmatpush.msrb.mxu0 %v3867_v26  ;;  %2032 = vmatpush.msrb.mxu1 %v3870_v27  ;;  %vm1655_vm1 = vmor %vm1653_vm15, %vm1654_vm13  ;;  %vm1673_vm5 = vweird.f32 %v4080_v23 }
 0x44f   : > { %v1650_v14 = vsub.f32 1.0, %v1649_v60  ;;  %2052 = vmatpush.msrb.mxu2 %v3873_v30  ;;  %2072 = vmatpush.msrb.mxu3 %v3878_v31 }
 0x450   : > { %v1632_v12 = vmul.f32 %v2573_v34, %v1631_v47  ;;  %2013 = vmatpush.msrb.mxu0 %v3883_v32  ;;  %2033 = vmatpush.msrb.mxu1 %v3886_v35 }
 0x451   : > { %v1651_v16 = vmul.f32 %v2575_v5, %v1650_v14  ;;  %2053 = vmatpush.msrb.mxu2 %v3889_v36  ;;  %2073 = vmatpush.msrb.mxu3 %v3896_v41 }
 0x452   : > { %v4105_v8 = vpop.eup %2576  ;;  %v1633_v18 = vadd.f32 %v2573_v34, %v1632_v12  ;;  %2014 = vmatpush.msrb.mxu0 %v3901_v42  ;;  %2034 = vmatpush.msrb.mxu1 %v3904_v43  ;;  %v1679_v42 = vand.u32 2147483648, %v4080_v23  ;;  %v1692_v43 = vpop.permute.xlu2 %1691  ;;  %v2385_v12 = vld [vmem:[%s2884_s0 + $0xd0] sm:$0xff] }
 0x453   : > { %v1652_v40 = vadd.f32 %v2575_v5, %v1651_v16  ;;  %v1669_v20 = vmul.f32 %v4105_v8, %v4080_v23  ;;  %v2579_v25 = vpop.eup %2578  ;;  %2054 = vmatpush.msrb.mxu2 %v3907_v44  ;;  %2074 = vmatpush.msrb.mxu3 %v3912_v46  ;;  %vm1674_vm4 = vweird.f32 %v4105_v8  ;;  %v1677_v44 = vand.u32 2147483647, %v4080_v23 }
 0x454   : > { %v1637_v24 = vsel %vm1636_vm0, %v2573_v34, %v1633_v18  ;;  %2015 = vmatpush.msrb.mxu0 %v3917_v49  ;;  %2035 = vmatpush.msrb.mxu1 %v3920_v51  ;;  %vm1675_vm6 = vmor %vm1673_vm5, %vm1674_vm4 }
 0x455   : > { %v1642_v26 = vsel %vm1639_vm2, %v1641_v19, %v1637_v24  ;;  %v1656_v27 = vsel %vm1655_vm1, %v2575_v5, %v1652_v40  ;;  %v1670_v6 = vsub.f32 1.0, %v1669_v20  ;;  %2055 = vmatpush.msrb.mxu2 %v3923_v53  ;;  %2075 = vmatpush.msrb.mxu3 %v3928_v57  ;;  %v1680_v53 = vor.u32 1.1754944e-38, %v1679_v42 }
 0x456   : > { %v1661_v30 = vsel %vm1658_vm3, %v1660_v21, %v1656_v27  ;;  %v1684_v31 = vmul.f32 %v2579_v25, %v1642_v26  ;;  %2016 = vmatpush.msrb.mxu0 %v3933_v59  ;;  %2036 = vmatpush.msrb.mxu1 %v3936_v63  ;;  %vm1678_vm7 = vcmp.eq.f32.partialorder %v1677_v44, 8.507059e+37 }
 0x457   : > { %v1683_v37 = vmul.f32 %v1661_v30, %v3806_v15  ;;  %v1671_v32 = vmul.f32 %v4105_v8, %v1670_v6  ;;  %2056 = vmatpush.msrb.mxu2 %v3939_v9  ;;  %2076 = vmatpush.msrb.mxu3 %v3944_v45  ;;  %v4384_v9 = vld [vmem:[#allocation21_spill] sm:$0xff] }
 0x458   : > { %2017 = vmatpush.msrb.mxu0 %v3949_v50  ;;  %2037 = vmatpush.msrb.mxu1 %v3952_v58  ;;  %v4385_v50 = vld [vmem:[#allocation23_spill] sm:$0xff]  ;;  %v4386_v58 = vld [vmem:[#allocation24_spill] sm:$0xff] }
 0x459   : > { %v1685_v35 = vadd.f32 %v1684_v31, %v1683_v37  ;;  %v1672_v36 = vadd.f32 %v4105_v8, %v1671_v32  ;;  %2057 = vmatpush.msrb.mxu2 %v3955_v33  ;;  %2077 = vmatpush.msrb.mxu3 %v3961_v55  ;;  %v4387_v33 = vld [vmem:[#allocation25_spill] sm:$0xff]  ;;  %v4388_v55 = vld [vmem:[#allocation26_spill] sm:$0xff] }
 0x45a   : > { %2018 = vmatpush.msrb.mxu0 %v3966_v10  ;;  %2038 = vmatpush.msrb.mxu1 %v3969_v11  ;;  %v4389_v11 = vld [vmem:[#allocation27_spill] sm:$0xff] }
 0x45b   : > { %2580 = vtanh.f32 %v1685_v35  ;;  %v1696_v41 = vsub.f32 %v1685_v35, %v3806_v15  ;;  %v1676_v49 = vsel %vm1675_vm6, %v4105_v8, %v1672_v36  ;;  %2058 = vmatpush.msrb.mxu2 %v3972_v13  ;;  %2078 = vmatpush.msrb.mxu3 %v3977_v52  ;;  %v4390_v13 = vld [vmem:[#allocation28_spill] sm:$0xff]  ;;  %v4391_v52 = vld [vmem:[#allocation29_spill] sm:$0xff] }
 0x45c   : > { %2019 = vmatpush.msrb.mxu0 %v3982_v39  ;;  %2039 = vmatpush.msrb.mxu1 %v3985_v28  ;;  %v1681_v59 = vsel %vm1678_vm7, %v1680_v53, %v1676_v49  ;;  %v4392_v39 = vld [vmem:[#allocation30_spill] sm:$0xff] }
 0x45d   : > { %v1697_v46 = vmul.f32 %v1696_v41, %v1692_v43  ;;  %2059 = vmatpush.msrb.mxu2 %v3988_v2  ;;  %2079 = vmatpush.msrb.mxu3 %v3993_v22  ;;  %v4393_v2 = vld [vmem:[#allocation31_spill] sm:$0xff]  ;;  %v4394_v22 = vld [vmem:[#allocation32_spill] sm:$0xff] }
 0x45e   : > { %2020 = vmatpush.msrb.mxu0 %v3998_v62  ;;  %2040 = vmatpush.msrb.mxu1 %v4001_v3  ;;  %v4395_v62 = vld [vmem:[#allocation33_spill] sm:$0xff] }
 0x45f   : > { %v4149_v51 = vadd.f32 %v1697_v46, %v3806_v15  ;;  %2060 = vmatpush.msrb.mxu2 %v4004_v4  ;;  %v4383_v15 = vld [vmem:[#allocation22_spill] sm:$0xff]  ;;  %v2383_v3 = vld [vmem:[%s2884_s0 + $0xc0] sm:$0xff] }
 0x460   : > { %2080 = vmatpush.msrb.mxu3 %v4383_v15  ;;  %2021 = vmatpush.msrb.mxu0 %v4385_v50  ;;  %v2384_v4 = vld [vmem:[%s2884_s0 + $0xc8] sm:$0xff] }
 0x461   : > { %v2581_v57 = vpop.eup %2580  ;;  %2041 = vmatpush.msrb.mxu1 %v4386_v58  ;;  %2061 = vmatpush.msrb.mxu2 %v4387_v33  ;;  %v1927_v33 = vpop.permute.xlu0 %1926 }
 0x462   : > { %v1687_v63 = vmul.f32 %v2581_v57, %v1681_v59  ;;  %2081 = vmatpush.msrb.mxu3 %v4388_v55  ;;  %2022 = vmatpush.msrb.mxu0 %v4389_v11 }
 0x463   : > { %2042 = vmatpush.msrb.mxu1 %v4390_v13  ;;  %2062 = vmatpush.msrb.mxu2 %v4391_v52 }
 0x464   : > { %v1688_v45 = vsub.f32 %v1687_v63, %v4384_v9  ;;  %2082 = vmatpush.msrb.mxu3 %v4392_v39  ;;  %2023 = vmatpush.msrb.mxu0 %v4393_v2 }
 0x465   : > { %2043 = vmatpush.msrb.mxu1 %v4394_v22  ;;  %2063 = vmatpush.msrb.mxu2 %v4059_v1  ;;  %v2386_v1 = vld [vmem:[%s2884_s0 + $0xd8] sm:$0xff] }
 0x466   : > { %v1694_v10 = vmul.f32 %v1692_v43, %v1688_v45  ;;  %2083 = vmatpush.msrb.mxu3 %v4062_v56  ;;  %2024 = vmatpush.msrb.mxu0 %v4065_v48 }
 0x467   : > { %2044 = vmatpush.msrb.mxu1 %v4070_v29  ;;  %2064 = vmatpush.msrb.mxu2 %v4073_v0 }
 0x468   : > { %v4171_v28 = vadd.f32 %v1694_v10, %v4384_v9  ;;  %2084 = vmatpush.msrb.mxu3 %v4395_v62 }
 0x46a   : > { %1790 = vmatmul.f32.vlgmr.msra.gmra.mxu0 %v4171_v28  ;;  %2382 = vst [vmem:[%s3309_s22 + $0x28] sm:$0xff] %v4171_v28  ;;  %1810 = vmatmul.f32.vlgmr.msra.gmra.mxu1 %v4171_v28 }
 0x46b   : > { %1830 = vmatmul.f32.vlgmr.msra.gmra.mxu2 %v4171_v28  ;;  %1850 = vmatmul.f32.vlgmr.msra.gmra.mxu3 %v4171_v28 }
 0x4e7   : > { %v1791_v38 = vpop.f32.mrf.mxu0  ;;  %v1811_v54 = vpop.f32.mrf.mxu1 }
 0x4e8   : > { %v1854_v56 = vadd.f32 %v2383_v3, %v1791_v38  ;;  %v1855_v23 = vadd.f32 %v2384_v4, %v1811_v54  ;;  %v2393_v38 = vld [vmem:[%s2884_s0 + $0xe8] sm:$0xff] }
 0x4ea   : > { %v2388_v34 = vmul.f32 -1.442695, %v1854_v56  ;;  %v2389_v5 = vmul.f32 -1.442695, %v1855_v23 }
 0x4ec   : > { %2582 = vpow2.f32 %v2388_v34 }
 0x4ed   : > { %2584 = vpow2.f32 %v2389_v5 }
 0x4ee   : > { %v1851_v60 = vpop.f32.mrf.mxu3  ;;  %v1831_v7 = vpop.f32.mrf.mxu2 }
 0x4ef   : > { %v1857_v48 = vadd.f32 %v2386_v1, %v1851_v60  ;;  %v1856_v18 = vadd.f32 %v2385_v12, %v1831_v7  ;;  %v2395_v1 = vld [vmem:[%s2884_s0 + $0xf8] sm:$0xff]  ;;  %v2394_v12 = vld [vmem:[%s2884_s0 + $0xf0] sm:$0xff] }
 0x4f1   : > { %v2390_v47 = vmul.f32 -1.442695, %v1857_v48 }
 0x4f2   : > { %v2583_v29 = vpop.eup %2582 }
 0x4f3   : > { %v2585_v14 = vpop.eup %2584  ;;  %v1863_v0 = vadd.f32 1.0, %v2583_v29  ;;  %2586 = vpow2.f32 %v2390_v47 }
 0x4f4   : > { %v1882_v61 = vadd.f32 1.0, %v2585_v14 }
 0x4f5   : > { %2588 = vrcp.f32 %v1863_v0  ;;  %v1875_v25 = vand.u32 2147483648, %v1863_v0  ;;  %v1873_v6 = vand.u32 2147483647, %v1863_v0  ;;  %vm1869_vm10 = vweird.f32 %v1863_v0 }
 0x4f6   : > { %2590 = vrcp.f32 %v1882_v61  ;;  %v1894_v26 = vand.u32 2147483648, %v1882_v61  ;;  %v1892_v31 = vand.u32 2147483647, %v1882_v61  ;;  %vm1888_vm11 = vweird.f32 %v1882_v61 }
 0x4f7   : > { %v1876_v35 = vor.u32 1.1754944e-38, %v1875_v25  ;;  %vm1874_vm14 = vcmp.eq.f32.partialorder %v1873_v6, 8.507059e+37 }
 0x4f8   : > { %v1895_v42 = vor.u32 1.1754944e-38, %v1894_v26  ;;  %vm1893_vm15 = vcmp.eq.f32.partialorder %v1892_v31, 8.507059e+37 }
 0x4f9   : > { %v2587_v16 = vpop.eup %2586 }
 0x4fa   : > { %v1902_v17 = vadd.f32 1.0, %v2587_v16 }
 0x4fb   : > { %v2589_v8 = vpop.eup %2588 }
 0x4fc   : > { %v2591_v19 = vpop.eup %2590  ;;  %v1865_v40 = vmul.f32 %v2589_v8, %v1863_v0  ;;  %2592 = vrcp.f32 %v1902_v17  ;;  %vm1870_vm8 = vweird.f32 %v2589_v8  ;;  %v1914_v58 = vand.u32 2147483648, %v1902_v17 }
 0x4fd   : > { %v1884_v20 = vmul.f32 %v2591_v19, %v1882_v61  ;;  %2594 = vtanh.f32 %v1856_v18  ;;  %vm1889_vm9 = vweird.f32 %v2591_v19  ;;  %vm1871_vm12 = vmor %vm1869_vm10, %vm1870_vm8  ;;  %vm1908_vm1 = vweird.f32 %v1902_v17 }
 0x4fe   : > { %v1866_v21 = vsub.f32 1.0, %v1865_v40  ;;  %vm1890_vm13 = vmor %vm1888_vm11, %vm1889_vm9  ;;  %v1912_v55 = vand.u32 2147483647, %v1902_v17  ;;  %v1915_v13 = vor.u32 1.1754944e-38, %v1914_v58 }
 0x4ff   : > { %v1885_v24 = vsub.f32 1.0, %v1884_v20 }
 0x500   : > { %v1867_v27 = vmul.f32 %v2589_v8, %v1866_v21  ;;  %vm1913_vm3 = vcmp.eq.f32.partialorder %v1912_v55, 8.507059e+37 }
 0x501   : > { %v1886_v30 = vmul.f32 %v2591_v19, %v1885_v24 }
 0x502   : > { %v2593_v37 = vpop.eup %2592  ;;  %v1868_v32 = vadd.f32 %v2589_v8, %v1867_v27 }
 0x503   : > { %v1887_v36 = vadd.f32 %v2591_v19, %v1886_v30  ;;  %v1904_v41 = vmul.f32 %v2593_v37, %v1902_v17  ;;  %v2595_v44 = vpop.eup %2594  ;;  %vm1909_vm0 = vweird.f32 %v2593_v37 }
 0x504   : > { %v1872_v43 = vsel %vm1871_vm12, %v2589_v8, %v1868_v32  ;;  %vm1910_vm2 = vmor %vm1908_vm1, %vm1909_vm0 }
 0x505   : > { %v1877_v46 = vsel %vm1874_vm14, %v1876_v35, %v1872_v43  ;;  %v1891_v49 = vsel %vm1890_vm13, %v2591_v19, %v1887_v36  ;;  %v1905_v53 = vsub.f32 1.0, %v1904_v41 }
 0x506   : > { %v1896_v57 = vsel %vm1893_vm15, %v1895_v42, %v1891_v49  ;;  %v1919_v59 = vmul.f32 %v2595_v44, %v1877_v46 }
 0x507   : > { %v1918_v63 = vmul.f32 %v1896_v57, %v4149_v51  ;;  %v1906_v15 = vmul.f32 %v2593_v37, %v1905_v53 }
 0x509   : > { %v1920_v9 = vadd.f32 %v1919_v59, %v1918_v63  ;;  %v1907_v45 = vadd.f32 %v2593_v37, %v1906_v15 }
 0x50b   : > { %2596 = vtanh.f32 %v1920_v9  ;;  %v1931_v50 = vsub.f32 %v1920_v9, %v4149_v51  ;;  %v1911_v11 = vsel %vm1910_vm2, %v2593_v37, %v1907_v45 }
 0x50c   : > { %v1916_v2 = vsel %vm1913_vm3, %v1915_v13, %v1911_v11 }
 0x50d   : > { %v1932_v10 = vmul.f32 %v1931_v50, %v1927_v33 }
 0x50f   : > { %v4194_v52 = vadd.f32 %v1932_v10, %v4149_v51  ;;  %v2392_v51 = vld [vmem:[%s2884_s0 + $0xe0] sm:$0xff]  ;;  %s2409_s0 = sshll.u32 %s2752_s15, 6  ;;  %s2174_s15 = scalar_lea.sflag [#allocation6], %s2880_s8 }
 0x510   : > { %s2187_s6 = scalar_lea.hbm %s4256_s3, %s2409_s0 }
 0x511   : > { %v2597_v39 = vpop.eup %2596  ;;  %s2190_s9 = sshll.u32 %s2187_s6, 4  ;;  %s2191_s9 = int_to_ptr.hbm [resolvable:$true] %s2190_s9 }
 0x512   : > { %v1922_v22 = vmul.f32 %v2597_v39, %v1916_v2  ;;  %v2162_v39 = vpop.permute.xlu1 %2161  ;;  %s2688_s11 = sshra.s32 %s2191_s9, 4  ;;  %s2689_s11 = int_to_ptr.hbm [resolvable:$true] %s2688_s11 }
 0x513   : > { %s2690_s28 = scalar_lea.hbm %s2689_s11, 64  ;;  %p2695_p8 = scmp.lt.s32.totalorder %s2689_s11, %s4256_s3 }
 0x514   : > { %v1923_v62 = vsub.f32 %v1922_v22, %v4171_v28  ;;  %p2691_p5 = scmp.ne.s32.totalorder %s2689_s11, %s2690_s28  ;;  %p2696_p10 = scmp.lt.s32.totalorder %s2694_s24, %s2690_s28 }
 0x516   : > { %v1929_v3 = vmul.f32 %v1927_v33, %v1923_v62  ;;  %p2692_p6 = pnand %p2691_p5, %p2839_p9  ;;  %p2697_p13 = por %p2696_p10, %p2695_p8 }
 0x518   : > { %v4198_v4 = vadd.f32 %v1929_v3, %v4171_v28  ;;  %p2693_p7 = pneg %p2692_p6 }
 0x51a   : > { %2025 = vmatmul.f32.vlgmr.msrb.gmra.mxu0 %v4198_v4  ;;  %2391 = vst [vmem:[%s3309_s22 + $0x30] sm:$0xff] %v4198_v4  ;;  %2045 = vmatmul.f32.vlgmr.msrb.gmra.mxu1 %v4198_v4  ;;  %p2698_p0 = pnand %p2697_p13, %p2693_p7 }
 0x51b   : > { %2065 = vmatmul.f32.vlgmr.msrb.gmra.mxu2 %v4198_v4  ;;  %2085 = vmatmul.f32.vlgmr.msrb.gmra.mxu3 %v4198_v4 }
 0x597   : > { %v2026_v54 = vpop.f32.mrf.mxu0  ;;  %v2046_v56 = vpop.f32.mrf.mxu1 }
 0x598   : > { %v2089_v23 = vadd.f32 %v2392_v51, %v2026_v54  ;;  %v2090_v34 = vadd.f32 %v2393_v38, %v2046_v56 }
 0x59a   : > { %v2397_v5 = vmul.f32 -1.442695, %v2089_v23  ;;  %v2398_v28 = vmul.f32 -1.442695, %v2090_v34 }
 0x59c   : > { %2598 = vpow2.f32 %v2397_v5 }
 0x59d   : > { %2600 = vpow2.f32 %v2398_v28 }
 0x59e   : > { %v2086_v60 = vpop.f32.mrf.mxu3  ;;  %v2066_v7 = vpop.f32.mrf.mxu2 }
 0x59f   : > { %v2092_v48 = vadd.f32 %v2395_v1, %v2086_v60  ;;  %v2091_v18 = vadd.f32 %v2394_v12, %v2066_v7 }
 0x5a1   : > { %v2399_v47 = vmul.f32 -1.442695, %v2092_v48 }
 0x5a2   : > { %v2599_v29 = vpop.eup %2598 }
 0x5a3   : > { %v2601_v14 = vpop.eup %2600  ;;  %v2098_v0 = vadd.f32 1.0, %v2599_v29  ;;  %2602 = vpow2.f32 %v2399_v47 }
 0x5a4   : > { %v2117_v61 = vadd.f32 1.0, %v2601_v14 }
 0x5a5   : > { %2604 = vrcp.f32 %v2098_v0  ;;  %v2110_v25 = vand.u32 2147483648, %v2098_v0  ;;  %v2108_v6 = vand.u32 2147483647, %v2098_v0  ;;  %vm2104_vm6 = vweird.f32 %v2098_v0 }
 0x5a6   : > { %2606 = vrcp.f32 %v2117_v61  ;;  %v2129_v26 = vand.u32 2147483648, %v2117_v61  ;;  %v2127_v31 = vand.u32 2147483647, %v2117_v61  ;;  %vm2123_vm7 = vweird.f32 %v2117_v61 }
 0x5a7   : > { %v2111_v35 = vor.u32 1.1754944e-38, %v2110_v25  ;;  %vm2109_vm10 = vcmp.eq.f32.partialorder %v2108_v6, 8.507059e+37 }
 0x5a8   : > { %v2130_v42 = vor.u32 1.1754944e-38, %v2129_v26  ;;  %vm2128_vm11 = vcmp.eq.f32.partialorder %v2127_v31, 8.507059e+37 }
 0x5a9   : > { %v2603_v16 = vpop.eup %2602 }
 0x5aa   : > { %v2137_v17 = vadd.f32 1.0, %v2603_v16 }
 0x5ab   : > { %v2605_v8 = vpop.eup %2604 }
 0x5ac   : > { %v2607_v19 = vpop.eup %2606  ;;  %v2100_v40 = vmul.f32 %v2605_v8, %v2098_v0  ;;  %2608 = vrcp.f32 %v2137_v17  ;;  %vm2105_vm4 = vweird.f32 %v2605_v8  ;;  %v2149_v50 = vand.u32 2147483648, %v2137_v17 }
 0x5ad   : > { %v2119_v20 = vmul.f32 %v2607_v19, %v2117_v61  ;;  %2610 = vtanh.f32 %v2091_v18  ;;  %vm2124_vm5 = vweird.f32 %v2607_v19  ;;  %vm2106_vm8 = vmor %vm2104_vm6, %vm2105_vm4  ;;  %vm2143_vm13 = vweird.f32 %v2137_v17 }
 0x5ae   : > { %v2101_v21 = vsub.f32 1.0, %v2100_v40  ;;  %vm2125_vm9 = vmor %vm2123_vm7, %vm2124_vm5  ;;  %v2147_v58 = vand.u32 2147483647, %v2137_v17  ;;  %v2150_v55 = vor.u32 1.1754944e-38, %v2149_v50 }
 0x5af   : > { %v2120_v24 = vsub.f32 1.0, %v2119_v20 }
 0x5b0   : > { %v2102_v27 = vmul.f32 %v2605_v8, %v2101_v21  ;;  %vm2148_vm15 = vcmp.eq.f32.partialorder %v2147_v58, 8.507059e+37 }
 0x5b1   : > { %v2121_v30 = vmul.f32 %v2607_v19, %v2120_v24 }
 0x5b2   : > { %v2609_v37 = vpop.eup %2608  ;;  %v2103_v32 = vadd.f32 %v2605_v8, %v2102_v27 }
 0x5b3   : > { %v2122_v36 = vadd.f32 %v2607_v19, %v2121_v30  ;;  %v2139_v41 = vmul.f32 %v2609_v37, %v2137_v17  ;;  %v2611_v44 = vpop.eup %2610  ;;  %vm2144_vm12 = vweird.f32 %v2609_v37 }
 0x5b4   : > { %v2107_v43 = vsel %vm2106_vm8, %v2605_v8, %v2103_v32  ;;  %vm2145_vm14 = vmor %vm2143_vm13, %vm2144_vm12 }
 0x5b5   : > { %v2112_v46 = vsel %vm2109_vm10, %v2111_v35, %v2107_v43  ;;  %v2126_v49 = vsel %vm2125_vm9, %v2607_v19, %v2122_v36  ;;  %v2140_v53 = vsub.f32 1.0, %v2139_v41 }
 0x5b6   : > { %v2131_v57 = vsel %vm2128_vm11, %v2130_v42, %v2126_v49  ;;  %v2154_v59 = vmul.f32 %v2611_v44, %v2112_v46 }
 0x5b7   : > { %v2153_v63 = vmul.f32 %v2131_v57, %v4194_v52  ;;  %v2141_v15 = vmul.f32 %v2609_v37, %v2140_v53 }
 0x5b9   : > { %v2155_v9 = vadd.f32 %v2154_v59, %v2153_v63  ;;  %v2142_v45 = vadd.f32 %v2609_v37, %v2141_v15 }
 0x5bb   : > { %2612 = vtanh.f32 %v2155_v9  ;;  %v2146_v33 = vsel %vm2145_vm14, %v2609_v37, %v2142_v45 }
 0x5bc   : > { %v2151_v11 = vsel %vm2148_vm15, %v2150_v55, %v2146_v33 }
 0x5c1   : > { %v2613_v10 = vpop.eup %2612 }
 0x5c2   : > { %v2157_v13 = vmul.f32 %v2613_v10, %v2151_v11 }
 0x5c4   : > { %v2158_v52 = vsub.f32 %v2157_v13, %v4198_v4 }
 0x5c6   : > { %v2164_v2 = vmul.f32 %v2162_v39, %v2158_v52 }
 0x5c8   : > { %v2165_v22 = vadd.f32 %v2164_v2, %v4198_v4 }
 0x5ca   : > { %2400 = vst [vmem:[%s3309_s22 + $0x38] sm:$0xff] %v2165_v22 }
 0x5cb   : > { %2701 = shalt.err (!%p2698_p0)
}
 0x5cc   : > { %s2766_s8 = smov 128   ;;  %s2767_s23 = smov 8  }
 0x5cd   : > { %2414 = dma.vmem_to_hbm [thread:$0]  (%p2839_p9), %s2189_s7, 1024, %s2191_s9, %s2174_s15, %s2766_s8, %s2766_s8, %s2767_s23  }
 0x5ce PF: > { %s2205_s29 = sand.u32 1, %s2740_s12   ;;  %p2424_p1 = pnand %p2322_p12, %p2846_p11 }
 0x5cf   : > { %s2206_s30 = scalar_lea.sflag [#allocation6], %s2205_s29 }
 0x5d0   : > { %p2425_p2 = pneg %p2424_p1 }
 0x5d2   : > { %2735 = dma.done.wait (%p2425_p2), %s2206_s30, 1024  }
 0x5d3   : > { %2737 = vsyncadd (%p2425_p2), %s2206_s30, 4294966272  ;;  %s22_s17 = sadd.s32 1, %s2760_s17   ;;  %s4396_s12 = smov %s2744_s13 }
 0x5d4   : > { %p19_p3 = scmp.ge.s32.totalorder %s22_s17, 4   ;;  %s4397_s13 = smov %s2748_s14 }
 0x5d5   : > { %s4398_s14 = smov %s2844_s26  ;;  %s4399_s15 = smov %s2756_s16 }
 0x5d6   : > { %s4400_s16 = smov %s4402_s20  ;;  %21 = sbr.rel (!%p19_p3) target bundleno = 10 (0xa), region = 118 }
 0x5db   :  { %2212 = vsyncpa [#allocation5], 1 }
 0x5dc   :  { %2214 = vsyncpa [#allocation5 + $0x1], 1 }
 0x5dd   :  { %2215 = vsyncpa [#allocation8], 1 }
 0x5de   :  { %2217 = vsyncpa [#allocation8 + $0x1], 1 }
 0x5df   :  { %2218 = vsyncpa [#allocation6], 1 }
 0x5e0   :  { %2220 = vsyncpa [#allocation6 + $0x1], 1 }

</bundles_post_ra>
